<compile_context>
chip_gen: v7x
topology: tpu7x:2x2x1
jax: 0.10.0
libtpu: 0.0.40
codegen_flags: <defaults>
</compile_context>

<pallas_src>
import functools

import numpy as np
import jax
import jax.numpy as jnp
from jax.experimental import pallas as pl
from jax.experimental.pallas import tpu as pltpu

BN_EPS = 1e-5


def _elu(x):
    # F.elu, alpha=1.0, in f32.  exp(x)-1 keeps a guaranteed Mosaic lowering;
    # the positive-branch exp is discarded by the select (no NaN/Inf leaks).
    return jnp.where(x > 0, x, jnp.exp(x) - 1.0)


def _bn_rows(y, gamma, beta):
    """BatchNorm1d over all rows of (rows, features) with batch statistics.

    Single reduction pass (mean and E[y^2]) folded into one scale/shift FMA,
    per review ("leaner BN").  Biased variance, as BatchNorm uses.
    """
    mean = jnp.mean(y, axis=0, keepdims=True)
    mean_sq = jnp.mean(y * y, axis=0, keepdims=True)
    var = mean_sq - mean * mean
    scale = gamma * jax.lax.rsqrt(var + BN_EPS)
    shift = beta - mean * scale
    return y * scale + shift


# ---------------------------------------------------------------------------
# One fused Pallas kernel for the whole encoder forward pass
# ---------------------------------------------------------------------------
def _make_kernel(recv_idx, send_idx, n_atoms, batch, n_hid):
    recv_idx = tuple(int(i) for i in recv_idx)
    send_idx = tuple(int(i) for i in send_idx)
    N, B, H, E = int(n_atoms), int(batch), int(n_hid), len(recv_idx)

    def blk(a, i):  # row-block of entity i in the node-/edge-major layout
        return a[i * B:(i + 1) * B, :]

    def kernel(x_ref,
               ne_w1, ne_b1, ne_w2, ne_b2, ne_g, ne_bt,            # node-embed MLP
               e_w1r, e_w1s, e_b1, e_w2, e_b2, e_g, e_bt,          # n2e MLP (split W1)
               v_w1, v_b1, v_w2, v_b2, v_g, v_bt,                  # e2n MLP
               o_w1r, o_w1s, o_w1k, o_b1, o_w2, o_b2, o_g, o_bt,   # out MLP (3-way split W1)
               fo_w, fo_b,                                         # fc_out (lane-padded)
               out_ref):
        dot = functools.partial(jnp.dot, preferred_element_type=jnp.float32)
        bf = lambda a: a.astype(jnp.bfloat16)                      # MXU operands in bf16

        # ---- node-embedding MLP: (N*B, F_in) -> (N*B, H) ---------------------
        h = _elu(dot(x_ref[...], ne_w1[...]) + ne_b1[...])
        # dropout(do_prob) is an inference no-op.
        nodes = _bn_rows(_elu(dot(bf(h), ne_w2[...]) + ne_b2[...]),
                         ne_g[...], ne_bt[...])

        # ---- node2edge #1, folded through W1: (G x) W1r == G (x W1r) ----------
        nb = bf(nodes)
        nr = dot(nb, e_w1r[...])                                   # receiver proj (N*B, H)
        ns = dot(nb, e_w1s[...])                                   # sender   proj (N*B, H)
        h = jnp.concatenate(
            [blk(nr, recv_idx[e]) + blk(ns, send_idx[e]) for e in range(E)],
            axis=0)                                                # (E*B, H) static assembly
        h = _elu(h + e_b1[...])
        x_skip = _bn_rows(_elu(dot(bf(h), e_w2[...]) + e_b2[...]),
                          e_g[...], e_bt[...])                     # (E*B, H)

        # ---- edge2node: static per-receiver slice-sum, then * 1/N in f32 ------
        agg_blocks = []
        for n in range(N):
            acc = None
            for e in range(E):
                if recv_idx[e] == n:
                    piece = blk(x_skip, e)
                    acc = piece if acc is None else acc + piece
            if acc is None:                                        # node w/o incoming edge
                acc = jnp.zeros((B, H), jnp.float32)
            agg_blocks.append(acc)
        agg = jnp.concatenate(agg_blocks, axis=0) * (1.0 / N)      # (N*B, H)

        # ---- full_mlp_e2n ------------------------------------------------------
        h = _elu(dot(bf(agg), v_w1[...]) + v_b1[...])
        nodes2 = _bn_rows(_elu(dot(bf(h), v_w2[...]) + v_b2[...]),
                          v_g[...], v_bt[...])

        # ---- node2edge #2 + skip term, folded through the 3-way-split W1 ------
        nb2 = bf(nodes2)
        nr2 = dot(nb2, o_w1r[...])
        ns2 = dot(nb2, o_w1s[...])
        sk = dot(bf(x_skip), o_w1k[...])                           # already edge-major
        g = jnp.concatenate(
            [blk(nr2, recv_idx[e]) + blk(ns2, send_idx[e]) for e in range(E)],
            axis=0)
        h = _elu(g + sk + o_b1[...])
        y = _bn_rows(_elu(dot(bf(h), o_w2[...]) + o_b2[...]),
                     o_g[...], o_bt[...])

        # ---- fc_out fused on the VMEM-resident BN output (lane-dense store) ---
        out_ref[...] = dot(bf(y), fo_w[...]) + fo_b[...]

    return kernel


# ---------------------------------------------------------------------------
# Wrapper
# ---------------------------------------------------------------------------
def make_encoder_forward(recv_idx, send_idx):
    """Builds a jittable forward(inputs, params) for a fixed relation graph.

    The relation structure is compile-time Python (hoisted out of the jitted
    forward entirely), so no per-call relation-matrix materialization happens.
    """
    recv_idx = tuple(int(i) for i in np.asarray(recv_idx))
    send_idx = tuple(int(i) for i in np.asarray(send_idx))
    E = len(recv_idx)

    def forward(inputs, params):
        B, N, T, D = inputs.shape
        F = T * D
        ne = params["node_embed"]
        n2e = params["n2e"]
        e2n = params["e2n"]
        out_mlp = params["out"]
        fo_w, fo_b = params["fc_out"]
        H = ne[0].shape[1]
        n_out = fo_w.shape[1]
        n_out_pad = ((n_out + 127) // 128) * 128           # lane-dense final store

        # Node-major layout: node n owns rows [n*B, (n+1)*B)  ->  (N*B, F).
        x = jnp.transpose(inputs.reshape(B, N, F), (1, 0, 2)).reshape(N * B, F)

        bfc = lambda a: a.astype(jnp.bfloat16)
        ne_w1, ne_b1, ne_w2, ne_b2, ne_g, ne_bt = ne
        e_w1, e_b1, e_w2, e_b2, e_g, e_bt = n2e
        v_w1, v_b1, v_w2, v_b2, v_g, v_bt = e2n
        o_w1, o_b1, o_w2, o_b2, o_g, o_bt = out_mlp
        fo_w_p = jnp.zeros((H, n_out_pad), jnp.float32).at[:, :n_out].set(fo_w)
        fo_b_p = jnp.zeros((1, n_out_pad), jnp.float32).at[:, :n_out].set(fo_b)

        args = (
            bfc(x),
            bfc(ne_w1), ne_b1, bfc(ne_w2), ne_b2, ne_g, ne_bt,
            bfc(e_w1[:H]), bfc(e_w1[H:]), e_b1, bfc(e_w2), e_b2, e_g, e_bt,
            bfc(v_w1), v_b1, bfc(v_w2), v_b2, v_g, v_bt,
            bfc(o_w1[:H]), bfc(o_w1[H:2 * H]), bfc(o_w1[2 * H:]), o_b1,
            bfc(o_w2), o_b2, o_g, o_bt,
            bfc(fo_w_p), fo_b_p,
        )

        kernel = _make_kernel(recv_idx, send_idx, N, B, H)

        # Advisory cost estimate for the kron-free op mix.
        rn, re = N * B, E * B
        flops = 2 * (rn * F * H + rn * H * H                       # node-embed MLP
                     + 2 * rn * H * H + re * H * H                 # n2e: r/s proj + layer 2
                     + 2 * rn * H * H                              # e2n MLP
                     + 2 * rn * H * H + 2 * re * H * H             # out: r/s proj + skip + layer 2
                     + re * H * n_out_pad)                         # fc_out
        transcendentals = 4 * H * (rn + re)                        # ELU exp count
        bytes_accessed = (sum(int(np.prod(a.shape)) * jnp.dtype(a.dtype).itemsize
                              for a in args)
                          + re * n_out_pad * 4)

        # VMEM limit sized from the actual resident set, capped v7x-safe (<64 MiB).
        act_bytes = 4 * H * (10 * re + 8 * rn)
        vmem_limit = int(min(56 * 2 ** 20,
                             max(2 * (bytes_accessed + act_bytes), 16 * 2 ** 20)))

        out = pl.pallas_call(
            kernel,
            out_shape=jax.ShapeDtypeStruct((re, n_out_pad), jnp.float32),
            in_specs=[pl.BlockSpec(memory_space=pltpu.MemorySpace.VMEM)
                      for _ in args],
            out_specs=pl.BlockSpec(memory_space=pltpu.MemorySpace.VMEM),
            compiler_params=pltpu.CompilerParams(vmem_limit_bytes=vmem_limit),
            cost_estimate=pl.CostEstimate(flops=int(flops),
                                          transcendentals=int(transcendentals),
                                          bytes_accessed=int(bytes_accessed)),
        )(*args)

        # Drop lane padding, edge-major -> (B, E, n_edge_types).
        out = out[:, :n_out].reshape(E, B, n_out)
        return jnp.transpose(out, (1, 0, 2))

    return forward


# ---------------------------------------------------------------------------
# Parameter init (deterministic, matches module __init__ / init_weights)
# ---------------------------------------------------------------------------
def xavier_normal(key, shape):
    fan_in, fan_out = shape
    std = (2.0 / (fan_in + fan_out)) ** 0.5
    return std * jax.random.normal(key, shape, jnp.float32)


def init_mlp(key, n_in, n_hid, n_out):
    k1, k2 = jax.random.split(key)
    return (xavier_normal(k1, (n_in, n_hid)),
            jnp.full((1, n_hid), 0.1, jnp.float32),
            xavier_normal(k2, (n_hid, n_out)),
            jnp.full((1, n_out), 0.1, jnp.float32),
            jnp.ones((1, n_out), jnp.float32),     # BatchNorm1d affine defaults
            jnp.zeros((1, n_out), jnp.float32))


def init_params(key, n_in, n_hid, n_edge_types):
    k0, k1, k2, k3, k4 = jax.random.split(key, 5)
    return {
        "node_embed": init_mlp(k0, n_in, n_hid, n_hid),
        "n2e": init_mlp(k1, 2 * n_hid, n_hid, n_hid),
        "e2n": init_mlp(k2, n_hid, n_hid, n_hid),
        "out": init_mlp(k3, 3 * n_hid, n_hid, n_hid),
        "fc_out": (xavier_normal(k4, (n_hid, n_edge_types)),
                   jnp.full((1, n_edge_types), 0.1, jnp.float32)),
    }


# ---------------------------------------------------------------------------
# Pure-JAX reference mirroring the PyTorch forward (with concats / one-hots).
# matmul_dtype=bf16 mirrors the kernel's MXU precision policy; f32 is the
# bit-faithful module math.
# ---------------------------------------------------------------------------
def _reference_forward(inputs, params, rel_rec, rel_send,
                       matmul_dtype=jnp.float32):
    B, N, T, D = inputs.shape

    def mm(a, w):
        return jnp.einsum("brk,kh->brh",
                          a.astype(matmul_dtype), w.astype(matmul_dtype),
                          preferred_element_type=jnp.float32)

    def mlp(x3, p):
        w1, b1, w2, b2, g, bt = p
        h = _elu(mm(x3, w1) + b1)
        y = _elu(mm(h, w2) + b2)
        Bq, R, Hh = y.shape
        yf = y.reshape(Bq * R, Hh)
        mean = yf.mean(axis=0, keepdims=True)
        var = ((yf - mean) ** 2).mean(axis=0, keepdims=True)
        yf = (yf - mean) / jnp.sqrt(var + BN_EPS) * g + bt
        return yf.reshape(Bq, R, Hh)

    def node2edge(t):
        rec = jnp.einsum("en,bnh->beh", rel_rec, t)
        snd = jnp.einsum("en,bnh->beh", rel_send, t)
        return jnp.concatenate([rec, snd], axis=-1)

    x = inputs.reshape(B, N, T * D)
    x = mlp(x, params["node_embed"])
    x = mlp(node2edge(x), params["n2e"])
    x_skip = x
    x = jnp.einsum("en,beh->bnh", rel_rec, x) / N
    x = mlp(x, params["e2n"])
    x = jnp.concatenate([node2edge(x), x_skip], axis=-1)
    x = mlp(x, params["out"])
    w, b = params["fc_out"]
    return mm(x, w) + b


if __name__ == "__main__":
    key = jax.random.PRNGKey(0)
    k_in, k_p = jax.random.split(key)

    # Small demo shapes; per review n_hid is a multiple of 128 and B a multiple
    # of 8 so every row block / lane group is natively tiled.
    B, N, T, D = 8, 5, 8, 4           # batch, n_atoms, seq_len, n_dims
    n_hid = 128
    n_edge_types = 2
    n_in = T * D

    # Fully-connected relation graph without self-loops (E = N*(N-1)).
    off_diag = np.ones((N, N)) - np.eye(N)
    recv_idx, send_idx = np.where(off_diag)
    rel_rec = jnp.asarray(np.eye(N)[recv_idx], jnp.float32)       # (E, N)
    rel_send = jnp.asarray(np.eye(N)[send_idx], jnp.float32)      # (E, N)

    inputs = jax.random.normal(k_in, (B, N, T, D), jnp.float32)
    params = init_params(k_p, n_in, n_hid, n_edge_types)

    fwd = jax.jit(make_encoder_forward(recv_idx, send_idx))
    out = jax.block_until_ready(fwd(inputs, params))

    assert out.shape == (B, N * (N - 1), n_edge_types), out.shape
    assert bool(jnp.all(jnp.isfinite(out)))

    # Tight check vs. a reference that mirrors the kernel's bf16-MXU / f32-acc
    # policy, and a loose check vs. the pure-f32 module math (bf16 noise only).
    ref_bf16 = _reference_forward(inputs, params, rel_rec, rel_send,
                                  matmul_dtype=jnp.bfloat16)
    np.testing.assert_allclose(np.asarray(out), np.asarray(ref_bf16),
                               rtol=1e-2, atol=1e-2)
    ref_f32 = _reference_forward(inputs, params, rel_rec, rel_send,
                                 matmul_dtype=jnp.float32)
    np.testing.assert_allclose(np.asarray(out), np.asarray(ref_f32),
                               rtol=1e-1, atol=1e-1)
    print("KERNEL_OK")
</pallas_src>

<mosaic_0001>
module attributes {stable_mosaic.version = 11 : i64} {
  func.func @kernel(%arg0: memref<40x32xbf16, #tpu.memory_space<vmem>>, %arg1: memref<32x128xbf16, #tpu.memory_space<vmem>>, %arg2: memref<1x128xf32, #tpu.memory_space<vmem>>, %arg3: memref<128x128xbf16, #tpu.memory_space<vmem>>, %arg4: memref<1x128xf32, #tpu.memory_space<vmem>>, %arg5: memref<1x128xf32, #tpu.memory_space<vmem>>, %arg6: memref<1x128xf32, #tpu.memory_space<vmem>>, %arg7: memref<128x128xbf16, #tpu.memory_space<vmem>>, %arg8: memref<128x128xbf16, #tpu.memory_space<vmem>>, %arg9: memref<1x128xf32, #tpu.memory_space<vmem>>, %arg10: memref<128x128xbf16, #tpu.memory_space<vmem>>, %arg11: memref<1x128xf32, #tpu.memory_space<vmem>>, %arg12: memref<1x128xf32, #tpu.memory_space<vmem>>, %arg13: memref<1x128xf32, #tpu.memory_space<vmem>>, %arg14: memref<128x128xbf16, #tpu.memory_space<vmem>>, %arg15: memref<1x128xf32, #tpu.memory_space<vmem>>, %arg16: memref<128x128xbf16, #tpu.memory_space<vmem>>, %arg17: memref<1x128xf32, #tpu.memory_space<vmem>>, %arg18: memref<1x128xf32, #tpu.memory_space<vmem>>, %arg19: memref<1x128xf32, #tpu.memory_space<vmem>>, %arg20: memref<128x128xbf16, #tpu.memory_space<vmem>>, %arg21: memref<128x128xbf16, #tpu.memory_space<vmem>>, %arg22: memref<128x128xbf16, #tpu.memory_space<vmem>>, %arg23: memref<1x128xf32, #tpu.memory_space<vmem>>, %arg24: memref<128x128xbf16, #tpu.memory_space<vmem>>, %arg25: memref<1x128xf32, #tpu.memory_space<vmem>>, %arg26: memref<1x128xf32, #tpu.memory_space<vmem>>, %arg27: memref<1x128xf32, #tpu.memory_space<vmem>>, %arg28: memref<128x128xbf16, #tpu.memory_space<vmem>>, %arg29: memref<1x128xf32, #tpu.memory_space<vmem>>, %arg30: memref<160x128xf32, #tpu.memory_space<vmem>>) attributes {dimension_semantics = [], scalar_prefetch = 0 : i64, scratch_operands = 0 : i64, tpu.core_type = #tpu.core_type<tc>} {
    %c0 = arith.constant 0 : index
    %c0_0 = arith.constant 0 : index
    %0 = vector.load %arg0[%c0, %c0_0] : memref<40x32xbf16, #tpu.memory_space<vmem>>, vector<40x32xbf16>
    %c0_1 = arith.constant 0 : index
    %c0_2 = arith.constant 0 : index
    %1 = vector.load %arg1[%c0_1, %c0_2] : memref<32x128xbf16, #tpu.memory_space<vmem>>, vector<32x128xbf16>
    %cst = arith.constant dense<0.000000e+00> : vector<40x128xf32>
    %2 = tpu.matmul %0, %1, %cst {dimension_numbers = #tpu.dot_dimension_numbers<[1], [0], [0], [1], [0, 0, 1, 1], [], []>} : vector<40x32xbf16>, vector<32x128xbf16>, vector<40x128xf32> -> vector<40x128xf32>
    %c0_3 = arith.constant 0 : index
    %c0_4 = arith.constant 0 : index
    %3 = vector.load %arg2[%c0_3, %c0_4] : memref<1x128xf32, #tpu.memory_space<vmem>>, vector<1x128xf32>
    %4 = vector.broadcast %3 : vector<1x128xf32> to vector<40x128xf32>
    %5 = arith.addf %2, %4 : vector<40x128xf32>
    %cst_5 = arith.constant 0.000000e+00 : f32
    %6 = vector.broadcast %cst_5 : f32 to vector<40x128xf32>
    %7 = arith.cmpf ogt, %5, %6 : vector<40x128xf32>
    %8 = math.exp %5 : vector<40x128xf32>
    %cst_6 = arith.constant 1.000000e+00 : f32
    %9 = vector.broadcast %cst_6 : f32 to vector<40x128xf32>
    %10 = arith.subf %8, %9 : vector<40x128xf32>
    %11 = arith.select %7, %5, %10 : vector<40x128xi1>, vector<40x128xf32>
    %12 = arith.truncf %11 : vector<40x128xf32> to vector<40x128xbf16>
    %c0_7 = arith.constant 0 : index
    %c0_8 = arith.constant 0 : index
    %13 = vector.load %arg3[%c0_7, %c0_8] : memref<128x128xbf16, #tpu.memory_space<vmem>>, vector<128x128xbf16>
    %cst_9 = arith.constant dense<0.000000e+00> : vector<40x128xf32>
    %14 = tpu.matmul %12, %13, %cst_9 {dimension_numbers = #tpu.dot_dimension_numbers<[1], [0], [0], [1], [0, 0, 1, 1], [], []>} : vector<40x128xbf16>, vector<128x128xbf16>, vector<40x128xf32> -> vector<40x128xf32>
    %c0_10 = arith.constant 0 : index
    %c0_11 = arith.constant 0 : index
    %15 = vector.load %arg4[%c0_10, %c0_11] : memref<1x128xf32, #tpu.memory_space<vmem>>, vector<1x128xf32>
    %16 = vector.broadcast %15 : vector<1x128xf32> to vector<40x128xf32>
    %17 = arith.addf %14, %16 : vector<40x128xf32>
    %cst_12 = arith.constant 0.000000e+00 : f32
    %18 = vector.broadcast %cst_12 : f32 to vector<40x128xf32>
    %19 = arith.cmpf ogt, %17, %18 : vector<40x128xf32>
    %20 = math.exp %17 : vector<40x128xf32>
    %cst_13 = arith.constant 1.000000e+00 : f32
    %21 = vector.broadcast %cst_13 : f32 to vector<40x128xf32>
    %22 = arith.subf %20, %21 : vector<40x128xf32>
    %23 = arith.select %19, %17, %22 : vector<40x128xi1>, vector<40x128xf32>
    %c0_14 = arith.constant 0 : index
    %c0_15 = arith.constant 0 : index
    %24 = vector.load %arg5[%c0_14, %c0_15] : memref<1x128xf32, #tpu.memory_space<vmem>>, vector<1x128xf32>
    %c0_16 = arith.constant 0 : index
    %c0_17 = arith.constant 0 : index
    %25 = vector.load %arg6[%c0_16, %c0_17] : memref<1x128xf32, #tpu.memory_space<vmem>>, vector<1x128xf32>
    %cst_18 = arith.constant dense<0.000000e+00> : vector<128xf32>
    %26 = vector.multi_reduction <add>, %23, %cst_18 [0] : vector<40x128xf32> to vector<128xf32>
    %27 = vector.shape_cast %26 : vector<128xf32> to vector<1x128xf32>
    %cst_19 = arith.constant 4.000000e+01 : f32
    %28 = vector.broadcast %cst_19 : f32 to vector<1x128xf32>
    %29 = arith.divf %27, %28 : vector<1x128xf32>
    %30 = arith.mulf %23, %23 : vector<40x128xf32>
    %cst_20 = arith.constant dense<0.000000e+00> : vector<128xf32>
    %31 = vector.multi_reduction <add>, %30, %cst_20 [0] : vector<40x128xf32> to vector<128xf32>
    %32 = vector.shape_cast %31 : vector<128xf32> to vector<1x128xf32>
    %cst_21 = arith.constant 4.000000e+01 : f32
    %33 = vector.broadcast %cst_21 : f32 to vector<1x128xf32>
    %34 = arith.divf %32, %33 : vector<1x128xf32>
    %35 = arith.mulf %29, %29 : vector<1x128xf32>
    %36 = arith.subf %34, %35 : vector<1x128xf32>
    %cst_22 = arith.constant 9.99999974E-6 : f32
    %37 = vector.broadcast %cst_22 : f32 to vector<1x128xf32>
    %38 = arith.addf %36, %37 : vector<1x128xf32>
    %39 = math.rsqrt %38 : vector<1x128xf32>
    %40 = arith.mulf %24, %39 : vector<1x128xf32>
    %41 = arith.mulf %29, %40 : vector<1x128xf32>
    %42 = arith.subf %25, %41 : vector<1x128xf32>
    %43 = vector.broadcast %40 : vector<1x128xf32> to vector<40x128xf32>
    %44 = arith.mulf %23, %43 : vector<40x128xf32>
    %45 = vector.broadcast %42 : vector<1x128xf32> to vector<40x128xf32>
    %46 = arith.addf %44, %45 : vector<40x128xf32>
    %47 = arith.truncf %46 : vector<40x128xf32> to vector<40x128xbf16>
    %c0_23 = arith.constant 0 : index
    %c0_24 = arith.constant 0 : index
    %48 = vector.load %arg7[%c0_23, %c0_24] : memref<128x128xbf16, #tpu.memory_space<vmem>>, vector<128x128xbf16>
    %cst_25 = arith.constant dense<0.000000e+00> : vector<40x128xf32>
    %49 = tpu.matmul %47, %48, %cst_25 {dimension_numbers = #tpu.dot_dimension_numbers<[1], [0], [0], [1], [0, 0, 1, 1], [], []>} : vector<40x128xbf16>, vector<128x128xbf16>, vector<40x128xf32> -> vector<40x128xf32>
    %c0_26 = arith.constant 0 : index
    %c0_27 = arith.constant 0 : index
    %50 = vector.load %arg8[%c0_26, %c0_27] : memref<128x128xbf16, #tpu.memory_space<vmem>>, vector<128x128xbf16>
    %cst_28 = arith.constant dense<0.000000e+00> : vector<40x128xf32>
    %51 = tpu.matmul %47, %50, %cst_28 {dimension_numbers = #tpu.dot_dimension_numbers<[1], [0], [0], [1], [0, 0, 1, 1], [], []>} : vector<40x128xbf16>, vector<128x128xbf16>, vector<40x128xf32> -> vector<40x128xf32>
    %52 = vector.extract_strided_slice %49 {offsets = [0, 0], sizes = [8, 128], strides = [1, 1]} : vector<40x128xf32> to vector<8x128xf32>
    %53 = vector.extract_strided_slice %51 {offsets = [8, 0], sizes = [8, 128], strides = [1, 1]} : vector<40x128xf32> to vector<8x128xf32>
    %54 = arith.addf %52, %53 : vector<8x128xf32>
    %55 = vector.extract_strided_slice %49 {offsets = [0, 0], sizes = [8, 128], strides = [1, 1]} : vector<40x128xf32> to vector<8x128xf32>
    %56 = vector.extract_strided_slice %51 {offsets = [16, 0], sizes = [8, 128], strides = [1, 1]} : vector<40x128xf32> to vector<8x128xf32>
    %57 = arith.addf %55, %56 : vector<8x128xf32>
    %58 = vector.extract_strided_slice %49 {offsets = [0, 0], sizes = [8, 128], strides = [1, 1]} : vector<40x128xf32> to vector<8x128xf32>
    %59 = vector.extract_strided_slice %51 {offsets = [24, 0], sizes = [8, 128], strides = [1, 1]} : vector<40x128xf32> to vector<8x128xf32>
    %60 = arith.addf %58, %59 : vector<8x128xf32>
    %61 = vector.extract_strided_slice %49 {offsets = [0, 0], sizes = [8, 128], strides = [1, 1]} : vector<40x128xf32> to vector<8x128xf32>
    %62 = vector.extract_strided_slice %51 {offsets = [32, 0], sizes = [8, 128], strides = [1, 1]} : vector<40x128xf32> to vector<8x128xf32>
    %63 = arith.addf %61, %62 : vector<8x128xf32>
    %64 = vector.extract_strided_slice %49 {offsets = [8, 0], sizes = [8, 128], strides = [1, 1]} : vector<40x128xf32> to vector<8x128xf32>
    %65 = vector.extract_strided_slice %51 {offsets = [0, 0], sizes = [8, 128], strides = [1, 1]} : vector<40x128xf32> to vector<8x128xf32>
    %66 = arith.addf %64, %65 : vector<8x128xf32>
    %67 = vector.extract_strided_slice %49 {offsets = [8, 0], sizes = [8, 128], strides = [1, 1]} : vector<40x128xf32> to vector<8x128xf32>
    %68 = vector.extract_strided_slice %51 {offsets = [16, 0], sizes = [8, 128], strides = [1, 1]} : vector<40x128xf32> to vector<8x128xf32>
    %69 = arith.addf %67, %68 : vector<8x128xf32>
    %70 = vector.extract_strided_slice %49 {offsets = [8, 0], sizes = [8, 128], strides = [1, 1]} : vector<40x128xf32> to vector<8x128xf32>
    %71 = vector.extract_strided_slice %51 {offsets = [24, 0], sizes = [8, 128], strides = [1, 1]} : vector<40x128xf32> to vector<8x128xf32>
    %72 = arith.addf %70, %71 : vector<8x128xf32>
    %73 = vector.extract_strided_slice %49 {offsets = [8, 0], sizes = [8, 128], strides = [1, 1]} : vector<40x128xf32> to vector<8x128xf32>
    %74 = vector.extract_strided_slice %51 {offsets = [32, 0], sizes = [8, 128], strides = [1, 1]} : vector<40x128xf32> to vector<8x128xf32>
    %75 = arith.addf %73, %74 : vector<8x128xf32>
    %76 = vector.extract_strided_slice %49 {offsets = [16, 0], sizes = [8, 128], strides = [1, 1]} : vector<40x128xf32> to vector<8x128xf32>
    %77 = vector.extract_strided_slice %51 {offsets = [0, 0], sizes = [8, 128], strides = [1, 1]} : vector<40x128xf32> to vector<8x128xf32>
    %78 = arith.addf %76, %77 : vector<8x128xf32>
    %79 = vector.extract_strided_slice %49 {offsets = [16, 0], sizes = [8, 128], strides = [1, 1]} : vector<40x128xf32> to vector<8x128xf32>
    %80 = vector.extract_strided_slice %51 {offsets = [8, 0], sizes = [8, 128], strides = [1, 1]} : vector<40x128xf32> to vector<8x128xf32>
    %81 = arith.addf %79, %80 : vector<8x128xf32>
    %82 = vector.extract_strided_slice %49 {offsets = [16, 0], sizes = [8, 128], strides = [1, 1]} : vector<40x128xf32> to vector<8x128xf32>
    %83 = vector.extract_strided_slice %51 {offsets = [24, 0], sizes = [8, 128], strides = [1, 1]} : vector<40x128xf32> to vector<8x128xf32>
    %84 = arith.addf %82, %83 : vector<8x128xf32>
    %85 = vector.extract_strided_slice %49 {offsets = [16, 0], sizes = [8, 128], strides = [1, 1]} : vector<40x128xf32> to vector<8x128xf32>
    %86 = vector.extract_strided_slice %51 {offsets = [32, 0], sizes = [8, 128], strides = [1, 1]} : vector<40x128xf32> to vector<8x128xf32>
    %87 = arith.addf %85, %86 : vector<8x128xf32>
    %88 = vector.extract_strided_slice %49 {offsets = [24, 0], sizes = [8, 128], strides = [1, 1]} : vector<40x128xf32> to vector<8x128xf32>
    %89 = vector.extract_strided_slice %51 {offsets = [0, 0], sizes = [8, 128], strides = [1, 1]} : vector<40x128xf32> to vector<8x128xf32>
    %90 = arith.addf %88, %89 : vector<8x128xf32>
    %91 = vector.extract_strided_slice %49 {offsets = [24, 0], sizes = [8, 128], strides = [1, 1]} : vector<40x128xf32> to vector<8x128xf32>
    %92 = vector.extract_strided_slice %51 {offsets = [8, 0], sizes = [8, 128], strides = [1, 1]} : vector<40x128xf32> to vector<8x128xf32>
    %93 = arith.addf %91, %92 : vector<8x128xf32>
    %94 = vector.extract_strided_slice %49 {offsets = [24, 0], sizes = [8, 128], strides = [1, 1]} : vector<40x128xf32> to vector<8x128xf32>
    %95 = vector.extract_strided_slice %51 {offsets = [16, 0], sizes = [8, 128], strides = [1, 1]} : vector<40x128xf32> to vector<8x128xf32>
    %96 = arith.addf %94, %95 : vector<8x128xf32>
    %97 = vector.extract_strided_slice %49 {offsets = [24, 0], sizes = [8, 128], strides = [1, 1]} : vector<40x128xf32> to vector<8x128xf32>
    %98 = vector.extract_strided_slice %51 {offsets = [32, 0], sizes = [8, 128], strides = [1, 1]} : vector<40x128xf32> to vector<8x128xf32>
    %99 = arith.addf %97, %98 : vector<8x128xf32>
    %100 = vector.extract_strided_slice %49 {offsets = [32, 0], sizes = [8, 128], strides = [1, 1]} : vector<40x128xf32> to vector<8x128xf32>
    %101 = vector.extract_strided_slice %51 {offsets = [0, 0], sizes = [8, 128], strides = [1, 1]} : vector<40x128xf32> to vector<8x128xf32>
    %102 = arith.addf %100, %101 : vector<8x128xf32>
    %103 = vector.extract_strided_slice %49 {offsets = [32, 0], sizes = [8, 128], strides = [1, 1]} : vector<40x128xf32> to vector<8x128xf32>
    %104 = vector.extract_strided_slice %51 {offsets = [8, 0], sizes = [8, 128], strides = [1, 1]} : vector<40x128xf32> to vector<8x128xf32>
    %105 = arith.addf %103, %104 : vector<8x128xf32>
    %106 = vector.extract_strided_slice %49 {offsets = [32, 0], sizes = [8, 128], strides = [1, 1]} : vector<40x128xf32> to vector<8x128xf32>
    %107 = vector.extract_strided_slice %51 {offsets = [16, 0], sizes = [8, 128], strides = [1, 1]} : vector<40x128xf32> to vector<8x128xf32>
    %108 = arith.addf %106, %107 : vector<8x128xf32>
    %109 = vector.extract_strided_slice %49 {offsets = [32, 0], sizes = [8, 128], strides = [1, 1]} : vector<40x128xf32> to vector<8x128xf32>
    %110 = vector.extract_strided_slice %51 {offsets = [24, 0], sizes = [8, 128], strides = [1, 1]} : vector<40x128xf32> to vector<8x128xf32>
    %111 = arith.addf %109, %110 : vector<8x128xf32>
    %112 = tpu.concatenate %54, %57, %60, %63, %66, %69, %72, %75, %78, %81, %84, %87, %90, %93, %96, %99 in 0 : vector<8x128xf32>, vector<8x128xf32>, vector<8x128xf32>, vector<8x128xf32>, vector<8x128xf32>, vector<8x128xf32>, vector<8x128xf32>, vector<8x128xf32>, vector<8x128xf32>, vector<8x128xf32>, vector<8x128xf32>, vector<8x128xf32>, vector<8x128xf32>, vector<8x128xf32>, vector<8x128xf32>, vector<8x128xf32> -> vector<128x128xf32>
    %113 = tpu.concatenate %102, %105, %108, %111 in 0 : vector<8x128xf32>, vector<8x128xf32>, vector<8x128xf32>, vector<8x128xf32> -> vector<32x128xf32>
    %114 = tpu.concatenate %112, %113 in 0 : vector<128x128xf32>, vector<32x128xf32> -> vector<160x128xf32>
    %c0_29 = arith.constant 0 : index
    %c0_30 = arith.constant 0 : index
    %115 = vector.load %arg9[%c0_29, %c0_30] : memref<1x128xf32, #tpu.memory_space<vmem>>, vector<1x128xf32>
    %116 = vector.broadcast %115 : vector<1x128xf32> to vector<160x128xf32>
    %117 = arith.addf %114, %116 : vector<160x128xf32>
    %cst_31 = arith.constant 0.000000e+00 : f32
    %118 = vector.broadcast %cst_31 : f32 to vector<160x128xf32>
    %119 = arith.cmpf ogt, %117, %118 : vector<160x128xf32>
    %120 = math.exp %117 : vector<160x128xf32>
    %cst_32 = arith.constant 1.000000e+00 : f32
    %121 = vector.broadcast %cst_32 : f32 to vector<160x128xf32>
    %122 = arith.subf %120, %121 : vector<160x128xf32>
    %123 = arith.select %119, %117, %122 : vector<160x128xi1>, vector<160x128xf32>
    %124 = arith.truncf %123 : vector<160x128xf32> to vector<160x128xbf16>
    %c0_33 = arith.constant 0 : index
    %c0_34 = arith.constant 0 : index
    %125 = vector.load %arg10[%c0_33, %c0_34] : memref<128x128xbf16, #tpu.memory_space<vmem>>, vector<128x128xbf16>
    %cst_35 = arith.constant dense<0.000000e+00> : vector<160x128xf32>
    %126 = tpu.matmul %124, %125, %cst_35 {dimension_numbers = #tpu.dot_dimension_numbers<[1], [0], [0], [1], [0, 0, 1, 1], [], []>} : vector<160x128xbf16>, vector<128x128xbf16>, vector<160x128xf32> -> vector<160x128xf32>
    %c0_36 = arith.constant 0 : index
    %c0_37 = arith.constant 0 : index
    %127 = vector.load %arg11[%c0_36, %c0_37] : memref<1x128xf32, #tpu.memory_space<vmem>>, vector<1x128xf32>
    %128 = vector.broadcast %127 : vector<1x128xf32> to vector<160x128xf32>
    %129 = arith.addf %126, %128 : vector<160x128xf32>
    %cst_38 = arith.constant 0.000000e+00 : f32
    %130 = vector.broadcast %cst_38 : f32 to vector<160x128xf32>
    %131 = arith.cmpf ogt, %129, %130 : vector<160x128xf32>
    %132 = math.exp %129 : vector<160x128xf32>
    %cst_39 = arith.constant 1.000000e+00 : f32
    %133 = vector.broadcast %cst_39 : f32 to vector<160x128xf32>
    %134 = arith.subf %132, %133 : vector<160x128xf32>
    %135 = arith.select %131, %129, %134 : vector<160x128xi1>, vector<160x128xf32>
    %c0_40 = arith.constant 0 : index
    %c0_41 = arith.constant 0 : index
    %136 = vector.load %arg12[%c0_40, %c0_41] : memref<1x128xf32, #tpu.memory_space<vmem>>, vector<1x128xf32>
    %c0_42 = arith.constant 0 : index
    %c0_43 = arith.constant 0 : index
    %137 = vector.load %arg13[%c0_42, %c0_43] : memref<1x128xf32, #tpu.memory_space<vmem>>, vector<1x128xf32>
    %cst_44 = arith.constant dense<0.000000e+00> : vector<128xf32>
    %138 = vector.multi_reduction <add>, %135, %cst_44 [0] : vector<160x128xf32> to vector<128xf32>
    %139 = vector.shape_cast %138 : vector<128xf32> to vector<1x128xf32>
    %cst_45 = arith.constant 1.600000e+02 : f32
    %140 = vector.broadcast %cst_45 : f32 to vector<1x128xf32>
    %141 = arith.divf %139, %140 : vector<1x128xf32>
    %142 = arith.mulf %135, %135 : vector<160x128xf32>
    %cst_46 = arith.constant dense<0.000000e+00> : vector<128xf32>
    %143 = vector.multi_reduction <add>, %142, %cst_46 [0] : vector<160x128xf32> to vector<128xf32>
    %144 = vector.shape_cast %143 : vector<128xf32> to vector<1x128xf32>
    %cst_47 = arith.constant 1.600000e+02 : f32
    %145 = vector.broadcast %cst_47 : f32 to vector<1x128xf32>
    %146 = arith.divf %144, %145 : vector<1x128xf32>
    %147 = arith.mulf %141, %141 : vector<1x128xf32>
    %148 = arith.subf %146, %147 : vector<1x128xf32>
    %cst_48 = arith.constant 9.99999974E-6 : f32
    %149 = vector.broadcast %cst_48 : f32 to vector<1x128xf32>
    %150 = arith.addf %148, %149 : vector<1x128xf32>
    %151 = math.rsqrt %150 : vector<1x128xf32>
    %152 = arith.mulf %136, %151 : vector<1x128xf32>
    %153 = arith.mulf %141, %152 : vector<1x128xf32>
    %154 = arith.subf %137, %153 : vector<1x128xf32>
    %155 = vector.broadcast %152 : vector<1x128xf32> to vector<160x128xf32>
    %156 = arith.mulf %135, %155 : vector<160x128xf32>
    %157 = vector.broadcast %154 : vector<1x128xf32> to vector<160x128xf32>
    %158 = arith.addf %156, %157 : vector<160x128xf32>
    %159 = vector.extract_strided_slice %158 {offsets = [0, 0], sizes = [8, 128], strides = [1, 1]} : vector<160x128xf32> to vector<8x128xf32>
    %160 = vector.extract_strided_slice %158 {offsets = [8, 0], sizes = [8, 128], strides = [1, 1]} : vector<160x128xf32> to vector<8x128xf32>
    %161 = arith.addf %159, %160 : vector<8x128xf32>
    %162 = vector.extract_strided_slice %158 {offsets = [16, 0], sizes = [8, 128], strides = [1, 1]} : vector<160x128xf32> to vector<8x128xf32>
    %163 = arith.addf %161, %162 : vector<8x128xf32>
    %164 = vector.extract_strided_slice %158 {offsets = [24, 0], sizes = [8, 128], strides = [1, 1]} : vector<160x128xf32> to vector<8x128xf32>
    %165 = arith.addf %163, %164 : vector<8x128xf32>
    %166 = vector.extract_strided_slice %158 {offsets = [32, 0], sizes = [8, 128], strides = [1, 1]} : vector<160x128xf32> to vector<8x128xf32>
    %167 = vector.extract_strided_slice %158 {offsets = [40, 0], sizes = [8, 128], strides = [1, 1]} : vector<160x128xf32> to vector<8x128xf32>
    %168 = arith.addf %166, %167 : vector<8x128xf32>
    %169 = vector.extract_strided_slice %158 {offsets = [48, 0], sizes = [8, 128], strides = [1, 1]} : vector<160x128xf32> to vector<8x128xf32>
    %170 = arith.addf %168, %169 : vector<8x128xf32>
    %171 = vector.extract_strided_slice %158 {offsets = [56, 0], sizes = [8, 128], strides = [1, 1]} : vector<160x128xf32> to vector<8x128xf32>
    %172 = arith.addf %170, %171 : vector<8x128xf32>
    %173 = vector.extract_strided_slice %158 {offsets = [64, 0], sizes = [8, 128], strides = [1, 1]} : vector<160x128xf32> to vector<8x128xf32>
    %174 = vector.extract_strided_slice %158 {offsets = [72, 0], sizes = [8, 128], strides = [1, 1]} : vector<160x128xf32> to vector<8x128xf32>
    %175 = arith.addf %173, %174 : vector<8x128xf32>
    %176 = vector.extract_strided_slice %158 {offsets = [80, 0], sizes = [8, 128], strides = [1, 1]} : vector<160x128xf32> to vector<8x128xf32>
    %177 = arith.addf %175, %176 : vector<8x128xf32>
    %178 = vector.extract_strided_slice %158 {offsets = [88, 0], sizes = [8, 128], strides = [1, 1]} : vector<160x128xf32> to vector<8x128xf32>
    %179 = arith.addf %177, %178 : vector<8x128xf32>
    %180 = vector.extract_strided_slice %158 {offsets = [96, 0], sizes = [8, 128], strides = [1, 1]} : vector<160x128xf32> to vector<8x128xf32>
    %181 = vector.extract_strided_slice %158 {offsets = [104, 0], sizes = [8, 128], strides = [1, 1]} : vector<160x128xf32> to vector<8x128xf32>
    %182 = arith.addf %180, %181 : vector<8x128xf32>
    %183 = vector.extract_strided_slice %158 {offsets = [112, 0], sizes = [8, 128], strides = [1, 1]} : vector<160x128xf32> to vector<8x128xf32>
    %184 = arith.addf %182, %183 : vector<8x128xf32>
    %185 = vector.extract_strided_slice %158 {offsets = [120, 0], sizes = [8, 128], strides = [1, 1]} : vector<160x128xf32> to vector<8x128xf32>
    %186 = arith.addf %184, %185 : vector<8x128xf32>
    %187 = vector.extract_strided_slice %158 {offsets = [128, 0], sizes = [8, 128], strides = [1, 1]} : vector<160x128xf32> to vector<8x128xf32>
    %188 = vector.extract_strided_slice %158 {offsets = [136, 0], sizes = [8, 128], strides = [1, 1]} : vector<160x128xf32> to vector<8x128xf32>
    %189 = arith.addf %187, %188 : vector<8x128xf32>
    %190 = vector.extract_strided_slice %158 {offsets = [144, 0], sizes = [8, 128], strides = [1, 1]} : vector<160x128xf32> to vector<8x128xf32>
    %191 = arith.addf %189, %190 : vector<8x128xf32>
    %192 = vector.extract_strided_slice %158 {offsets = [152, 0], sizes = [8, 128], strides = [1, 1]} : vector<160x128xf32> to vector<8x128xf32>
    %193 = arith.addf %191, %192 : vector<8x128xf32>
    %194 = tpu.concatenate %165, %172, %179, %186, %193 in 0 : vector<8x128xf32>, vector<8x128xf32>, vector<8x128xf32>, vector<8x128xf32>, vector<8x128xf32> -> vector<40x128xf32>
    %cst_49 = arith.constant 2.000000e-01 : f32
    %195 = vector.broadcast %cst_49 : f32 to vector<40x128xf32>
    %196 = arith.mulf %194, %195 : vector<40x128xf32>
    %197 = arith.truncf %196 : vector<40x128xf32> to vector<40x128xbf16>
    %c0_50 = arith.constant 0 : index
    %c0_51 = arith.constant 0 : index
    %198 = vector.load %arg14[%c0_50, %c0_51] : memref<128x128xbf16, #tpu.memory_space<vmem>>, vector<128x128xbf16>
    %cst_52 = arith.constant dense<0.000000e+00> : vector<40x128xf32>
    %199 = tpu.matmul %197, %198, %cst_52 {dimension_numbers = #tpu.dot_dimension_numbers<[1], [0], [0], [1], [0, 0, 1, 1], [], []>} : vector<40x128xbf16>, vector<128x128xbf16>, vector<40x128xf32> -> vector<40x128xf32>
    %c0_53 = arith.constant 0 : index
    %c0_54 = arith.constant 0 : index
    %200 = vector.load %arg15[%c0_53, %c0_54] : memref<1x128xf32, #tpu.memory_space<vmem>>, vector<1x128xf32>
    %201 = vector.broadcast %200 : vector<1x128xf32> to vector<40x128xf32>
    %202 = arith.addf %199, %201 : vector<40x128xf32>
    %cst_55 = arith.constant 0.000000e+00 : f32
    %203 = vector.broadcast %cst_55 : f32 to vector<40x128xf32>
    %204 = arith.cmpf ogt, %202, %203 : vector<40x128xf32>
    %205 = math.exp %202 : vector<40x128xf32>
    %cst_56 = arith.constant 1.000000e+00 : f32
    %206 = vector.broadcast %cst_56 : f32 to vector<40x128xf32>
    %207 = arith.subf %205, %206 : vector<40x128xf32>
    %208 = arith.select %204, %202, %207 : vector<40x128xi1>, vector<40x128xf32>
    %209 = arith.truncf %208 : vector<40x128xf32> to vector<40x128xbf16>
    %c0_57 = arith.constant 0 : index
    %c0_58 = arith.constant 0 : index
    %210 = vector.load %arg16[%c0_57, %c0_58] : memref<128x128xbf16, #tpu.memory_space<vmem>>, vector<128x128xbf16>
    %cst_59 = arith.constant dense<0.000000e+00> : vector<40x128xf32>
    %211 = tpu.matmul %209, %210, %cst_59 {dimension_numbers = #tpu.dot_dimension_numbers<[1], [0], [0], [1], [0, 0, 1, 1], [], []>} : vector<40x128xbf16>, vector<128x128xbf16>, vector<40x128xf32> -> vector<40x128xf32>
    %c0_60 = arith.constant 0 : index
    %c0_61 = arith.constant 0 : index
    %212 = vector.load %arg17[%c0_60, %c0_61] : memref<1x128xf32, #tpu.memory_space<vmem>>, vector<1x128xf32>
    %213 = vector.broadcast %212 : vector<1x128xf32> to vector<40x128xf32>
    %214 = arith.addf %211, %213 : vector<40x128xf32>
    %cst_62 = arith.constant 0.000000e+00 : f32
    %215 = vector.broadcast %cst_62 : f32 to vector<40x128xf32>
    %216 = arith.cmpf ogt, %214, %215 : vector<40x128xf32>
    %217 = math.exp %214 : vector<40x128xf32>
    %cst_63 = arith.constant 1.000000e+00 : f32
    %218 = vector.broadcast %cst_63 : f32 to vector<40x128xf32>
    %219 = arith.subf %217, %218 : vector<40x128xf32>
    %220 = arith.select %216, %214, %219 : vector<40x128xi1>, vector<40x128xf32>
    %c0_64 = arith.constant 0 : index
    %c0_65 = arith.constant 0 : index
    %221 = vector.load %arg18[%c0_64, %c0_65] : memref<1x128xf32, #tpu.memory_space<vmem>>, vector<1x128xf32>
    %c0_66 = arith.constant 0 : index
    %c0_67 = arith.constant 0 : index
    %222 = vector.load %arg19[%c0_66, %c0_67] : memref<1x128xf32, #tpu.memory_space<vmem>>, vector<1x128xf32>
    %cst_68 = arith.constant dense<0.000000e+00> : vector<128xf32>
    %223 = vector.multi_reduction <add>, %220, %cst_68 [0] : vector<40x128xf32> to vector<128xf32>
    %224 = vector.shape_cast %223 : vector<128xf32> to vector<1x128xf32>
    %cst_69 = arith.constant 4.000000e+01 : f32
    %225 = vector.broadcast %cst_69 : f32 to vector<1x128xf32>
    %226 = arith.divf %224, %225 : vector<1x128xf32>
    %227 = arith.mulf %220, %220 : vector<40x128xf32>
    %cst_70 = arith.constant dense<0.000000e+00> : vector<128xf32>
    %228 = vector.multi_reduction <add>, %227, %cst_70 [0] : vector<40x128xf32> to vector<128xf32>
    %229 = vector.shape_cast %228 : vector<128xf32> to vector<1x128xf32>
    %cst_71 = arith.constant 4.000000e+01 : f32
    %230 = vector.broadcast %cst_71 : f32 to vector<1x128xf32>
    %231 = arith.divf %229, %230 : vector<1x128xf32>
    %232 = arith.mulf %226, %226 : vector<1x128xf32>
    %233 = arith.subf %231, %232 : vector<1x128xf32>
    %cst_72 = arith.constant 9.99999974E-6 : f32
    %234 = vector.broadcast %cst_72 : f32 to vector<1x128xf32>
    %235 = arith.addf %233, %234 : vector<1x128xf32>
    %236 = math.rsqrt %235 : vector<1x128xf32>
    %237 = arith.mulf %221, %236 : vector<1x128xf32>
    %238 = arith.mulf %226, %237 : vector<1x128xf32>
    %239 = arith.subf %222, %238 : vector<1x128xf32>
    %240 = vector.broadcast %237 : vector<1x128xf32> to vector<40x128xf32>
    %241 = arith.mulf %220, %240 : vector<40x128xf32>
    %242 = vector.broadcast %239 : vector<1x128xf32> to vector<40x128xf32>
    %243 = arith.addf %241, %242 : vector<40x128xf32>
    %244 = arith.truncf %243 : vector<40x128xf32> to vector<40x128xbf16>
    %c0_73 = arith.constant 0 : index
    %c0_74 = arith.constant 0 : index
    %245 = vector.load %arg20[%c0_73, %c0_74] : memref<128x128xbf16, #tpu.memory_space<vmem>>, vector<128x128xbf16>
    %cst_75 = arith.constant dense<0.000000e+00> : vector<40x128xf32>
    %246 = tpu.matmul %244, %245, %cst_75 {dimension_numbers = #tpu.dot_dimension_numbers<[1], [0], [0], [1], [0, 0, 1, 1], [], []>} : vector<40x128xbf16>, vector<128x128xbf16>, vector<40x128xf32> -> vector<40x128xf32>
    %c0_76 = arith.constant 0 : index
    %c0_77 = arith.constant 0 : index
    %247 = vector.load %arg21[%c0_76, %c0_77] : memref<128x128xbf16, #tpu.memory_space<vmem>>, vector<128x128xbf16>
    %cst_78 = arith.constant dense<0.000000e+00> : vector<40x128xf32>
    %248 = tpu.matmul %244, %247, %cst_78 {dimension_numbers = #tpu.dot_dimension_numbers<[1], [0], [0], [1], [0, 0, 1, 1], [], []>} : vector<40x128xbf16>, vector<128x128xbf16>, vector<40x128xf32> -> vector<40x128xf32>
    %249 = arith.truncf %158 : vector<160x128xf32> to vector<160x128xbf16>
    %c0_79 = arith.constant 0 : index
    %c0_80 = arith.constant 0 : index
    %250 = vector.load %arg22[%c0_79, %c0_80] : memref<128x128xbf16, #tpu.memory_space<vmem>>, vector<128x128xbf16>
    %cst_81 = arith.constant dense<0.000000e+00> : vector<160x128xf32>
    %251 = tpu.matmul %249, %250, %cst_81 {dimension_numbers = #tpu.dot_dimension_numbers<[1], [0], [0], [1], [0, 0, 1, 1], [], []>} : vector<160x128xbf16>, vector<128x128xbf16>, vector<160x128xf32> -> vector<160x128xf32>
    %252 = vector.extract_strided_slice %246 {offsets = [0, 0], sizes = [8, 128], strides = [1, 1]} : vector<40x128xf32> to vector<8x128xf32>
    %253 = vector.extract_strided_slice %248 {offsets = [8, 0], sizes = [8, 128], strides = [1, 1]} : vector<40x128xf32> to vector<8x128xf32>
    %254 = arith.addf %252, %253 : vector<8x128xf32>
    %255 = vector.extract_strided_slice %246 {offsets = [0, 0], sizes = [8, 128], strides = [1, 1]} : vector<40x128xf32> to vector<8x128xf32>
    %256 = vector.extract_strided_slice %248 {offsets = [16, 0], sizes = [8, 128], strides = [1, 1]} : vector<40x128xf32> to vector<8x128xf32>
    %257 = arith.addf %255, %256 : vector<8x128xf32>
    %258 = vector.extract_strided_slice %246 {offsets = [0, 0], sizes = [8, 128], strides = [1, 1]} : vector<40x128xf32> to vector<8x128xf32>
    %259 = vector.extract_strided_slice %248 {offsets = [24, 0], sizes = [8, 128], strides = [1, 1]} : vector<40x128xf32> to vector<8x128xf32>
    %260 = arith.addf %258, %259 : vector<8x128xf32>
    %261 = vector.extract_strided_slice %246 {offsets = [0, 0], sizes = [8, 128], strides = [1, 1]} : vector<40x128xf32> to vector<8x128xf32>
    %262 = vector.extract_strided_slice %248 {offsets = [32, 0], sizes = [8, 128], strides = [1, 1]} : vector<40x128xf32> to vector<8x128xf32>
    %263 = arith.addf %261, %262 : vector<8x128xf32>
    %264 = vector.extract_strided_slice %246 {offsets = [8, 0], sizes = [8, 128], strides = [1, 1]} : vector<40x128xf32> to vector<8x128xf32>
    %265 = vector.extract_strided_slice %248 {offsets = [0, 0], sizes = [8, 128], strides = [1, 1]} : vector<40x128xf32> to vector<8x128xf32>
    %266 = arith.addf %264, %265 : vector<8x128xf32>
    %267 = vector.extract_strided_slice %246 {offsets = [8, 0], sizes = [8, 128], strides = [1, 1]} : vector<40x128xf32> to vector<8x128xf32>
    %268 = vector.extract_strided_slice %248 {offsets = [16, 0], sizes = [8, 128], strides = [1, 1]} : vector<40x128xf32> to vector<8x128xf32>
    %269 = arith.addf %267, %268 : vector<8x128xf32>
    %270 = vector.extract_strided_slice %246 {offsets = [8, 0], sizes = [8, 128], strides = [1, 1]} : vector<40x128xf32> to vector<8x128xf32>
    %271 = vector.extract_strided_slice %248 {offsets = [24, 0], sizes = [8, 128], strides = [1, 1]} : vector<40x128xf32> to vector<8x128xf32>
    %272 = arith.addf %270, %271 : vector<8x128xf32>
    %273 = vector.extract_strided_slice %246 {offsets = [8, 0], sizes = [8, 128], strides = [1, 1]} : vector<40x128xf32> to vector<8x128xf32>
    %274 = vector.extract_strided_slice %248 {offsets = [32, 0], sizes = [8, 128], strides = [1, 1]} : vector<40x128xf32> to vector<8x128xf32>
    %275 = arith.addf %273, %274 : vector<8x128xf32>
    %276 = vector.extract_strided_slice %246 {offsets = [16, 0], sizes = [8, 128], strides = [1, 1]} : vector<40x128xf32> to vector<8x128xf32>
    %277 = vector.extract_strided_slice %248 {offsets = [0, 0], sizes = [8, 128], strides = [1, 1]} : vector<40x128xf32> to vector<8x128xf32>
    %278 = arith.addf %276, %277 : vector<8x128xf32>
    %279 = vector.extract_strided_slice %246 {offsets = [16, 0], sizes = [8, 128], strides = [1, 1]} : vector<40x128xf32> to vector<8x128xf32>
    %280 = vector.extract_strided_slice %248 {offsets = [8, 0], sizes = [8, 128], strides = [1, 1]} : vector<40x128xf32> to vector<8x128xf32>
    %281 = arith.addf %279, %280 : vector<8x128xf32>
    %282 = vector.extract_strided_slice %246 {offsets = [16, 0], sizes = [8, 128], strides = [1, 1]} : vector<40x128xf32> to vector<8x128xf32>
    %283 = vector.extract_strided_slice %248 {offsets = [24, 0], sizes = [8, 128], strides = [1, 1]} : vector<40x128xf32> to vector<8x128xf32>
    %284 = arith.addf %282, %283 : vector<8x128xf32>
    %285 = vector.extract_strided_slice %246 {offsets = [16, 0], sizes = [8, 128], strides = [1, 1]} : vector<40x128xf32> to vector<8x128xf32>
    %286 = vector.extract_strided_slice %248 {offsets = [32, 0], sizes = [8, 128], strides = [1, 1]} : vector<40x128xf32> to vector<8x128xf32>
    %287 = arith.addf %285, %286 : vector<8x128xf32>
    %288 = vector.extract_strided_slice %246 {offsets = [24, 0], sizes = [8, 128], strides = [1, 1]} : vector<40x128xf32> to vector<8x128xf32>
    %289 = vector.extract_strided_slice %248 {offsets = [0, 0], sizes = [8, 128], strides = [1, 1]} : vector<40x128xf32> to vector<8x128xf32>
    %290 = arith.addf %288, %289 : vector<8x128xf32>
    %291 = vector.extract_strided_slice %246 {offsets = [24, 0], sizes = [8, 128], strides = [1, 1]} : vector<40x128xf32> to vector<8x128xf32>
    %292 = vector.extract_strided_slice %248 {offsets = [8, 0], sizes = [8, 128], strides = [1, 1]} : vector<40x128xf32> to vector<8x128xf32>
    %293 = arith.addf %291, %292 : vector<8x128xf32>
    %294 = vector.extract_strided_slice %246 {offsets = [24, 0], sizes = [8, 128], strides = [1, 1]} : vector<40x128xf32> to vector<8x128xf32>
    %295 = vector.extract_strided_slice %248 {offsets = [16, 0], sizes = [8, 128], strides = [1, 1]} : vector<40x128xf32> to vector<8x128xf32>
    %296 = arith.addf %294, %295 : vector<8x128xf32>
    %297 = vector.extract_strided_slice %246 {offsets = [24, 0], sizes = [8, 128], strides = [1, 1]} : vector<40x128xf32> to vector<8x128xf32>
    %298 = vector.extract_strided_slice %248 {offsets = [32, 0], sizes = [8, 128], strides = [1, 1]} : vector<40x128xf32> to vector<8x128xf32>
    %299 = arith.addf %297, %298 : vector<8x128xf32>
    %300 = vector.extract_strided_slice %246 {offsets = [32, 0], sizes = [8, 128], strides = [1, 1]} : vector<40x128xf32> to vector<8x128xf32>
    %301 = vector.extract_strided_slice %248 {offsets = [0, 0], sizes = [8, 128], strides = [1, 1]} : vector<40x128xf32> to vector<8x128xf32>
    %302 = arith.addf %300, %301 : vector<8x128xf32>
    %303 = vector.extract_strided_slice %246 {offsets = [32, 0], sizes = [8, 128], strides = [1, 1]} : vector<40x128xf32> to vector<8x128xf32>
    %304 = vector.extract_strided_slice %248 {offsets = [8, 0], sizes = [8, 128], strides = [1, 1]} : vector<40x128xf32> to vector<8x128xf32>
    %305 = arith.addf %303, %304 : vector<8x128xf32>
    %306 = vector.extract_strided_slice %246 {offsets = [32, 0], sizes = [8, 128], strides = [1, 1]} : vector<40x128xf32> to vector<8x128xf32>
    %307 = vector.extract_strided_slice %248 {offsets = [16, 0], sizes = [8, 128], strides = [1, 1]} : vector<40x128xf32> to vector<8x128xf32>
    %308 = arith.addf %306, %307 : vector<8x128xf32>
    %309 = vector.extract_strided_slice %246 {offsets = [32, 0], sizes = [8, 128], strides = [1, 1]} : vector<40x128xf32> to vector<8x128xf32>
    %310 = vector.extract_strided_slice %248 {offsets = [24, 0], sizes = [8, 128], strides = [1, 1]} : vector<40x128xf32> to vector<8x128xf32>
    %311 = arith.addf %309, %310 : vector<8x128xf32>
    %312 = tpu.concatenate %254, %257, %260, %263, %266, %269, %272, %275, %278, %281, %284, %287, %290, %293, %296, %299 in 0 : vector<8x128xf32>, vector<8x128xf32>, vector<8x128xf32>, vector<8x128xf32>, vector<8x128xf32>, vector<8x128xf32>, vector<8x128xf32>, vector<8x128xf32>, vector<8x128xf32>, vector<8x128xf32>, vector<8x128xf32>, vector<8x128xf32>, vector<8x128xf32>, vector<8x128xf32>, vector<8x128xf32>, vector<8x128xf32> -> vector<128x128xf32>
    %313 = tpu.concatenate %302, %305, %308, %311 in 0 : vector<8x128xf32>, vector<8x128xf32>, vector<8x128xf32>, vector<8x128xf32> -> vector<32x128xf32>
    %314 = tpu.concatenate %312, %313 in 0 : vector<128x128xf32>, vector<32x128xf32> -> vector<160x128xf32>
    %315 = arith.addf %314, %251 : vector<160x128xf32>
    %c0_82 = arith.constant 0 : index
    %c0_83 = arith.constant 0 : index
    %316 = vector.load %arg23[%c0_82, %c0_83] : memref<1x128xf32, #tpu.memory_space<vmem>>, vector<1x128xf32>
    %317 = vector.broadcast %316 : vector<1x128xf32> to vector<160x128xf32>
    %318 = arith.addf %315, %317 : vector<160x128xf32>
    %cst_84 = arith.constant 0.000000e+00 : f32
    %319 = vector.broadcast %cst_84 : f32 to vector<160x128xf32>
    %320 = arith.cmpf ogt, %318, %319 : vector<160x128xf32>
    %321 = math.exp %318 : vector<160x128xf32>
    %cst_85 = arith.constant 1.000000e+00 : f32
    %322 = vector.broadcast %cst_85 : f32 to vector<160x128xf32>
    %323 = arith.subf %321, %322 : vector<160x128xf32>
    %324 = arith.select %320, %318, %323 : vector<160x128xi1>, vector<160x128xf32>
    %325 = arith.truncf %324 : vector<160x128xf32> to vector<160x128xbf16>
    %c0_86 = arith.constant 0 : index
    %c0_87 = arith.constant 0 : index
    %326 = vector.load %arg24[%c0_86, %c0_87] : memref<128x128xbf16, #tpu.memory_space<vmem>>, vector<128x128xbf16>
    %cst_88 = arith.constant dense<0.000000e+00> : vector<160x128xf32>
    %327 = tpu.matmul %325, %326, %cst_88 {dimension_numbers = #tpu.dot_dimension_numbers<[1], [0], [0], [1], [0, 0, 1, 1], [], []>} : vector<160x128xbf16>, vector<128x128xbf16>, vector<160x128xf32> -> vector<160x128xf32>
    %c0_89 = arith.constant 0 : index
    %c0_90 = arith.constant 0 : index
    %328 = vector.load %arg25[%c0_89, %c0_90] : memref<1x128xf32, #tpu.memory_space<vmem>>, vector<1x128xf32>
    %329 = vector.broadcast %328 : vector<1x128xf32> to vector<160x128xf32>
    %330 = arith.addf %327, %329 : vector<160x128xf32>
    %cst_91 = arith.constant 0.000000e+00 : f32
    %331 = vector.broadcast %cst_91 : f32 to vector<160x128xf32>
    %332 = arith.cmpf ogt, %330, %331 : vector<160x128xf32>
    %333 = math.exp %330 : vector<160x128xf32>
    %cst_92 = arith.constant 1.000000e+00 : f32
    %334 = vector.broadcast %cst_92 : f32 to vector<160x128xf32>
    %335 = arith.subf %333, %334 : vector<160x128xf32>
    %336 = arith.select %332, %330, %335 : vector<160x128xi1>, vector<160x128xf32>
    %c0_93 = arith.constant 0 : index
    %c0_94 = arith.constant 0 : index
    %337 = vector.load %arg26[%c0_93, %c0_94] : memref<1x128xf32, #tpu.memory_space<vmem>>, vector<1x128xf32>
    %c0_95 = arith.constant 0 : index
    %c0_96 = arith.constant 0 : index
    %338 = vector.load %arg27[%c0_95, %c0_96] : memref<1x128xf32, #tpu.memory_space<vmem>>, vector<1x128xf32>
    %cst_97 = arith.constant dense<0.000000e+00> : vector<128xf32>
    %339 = vector.multi_reduction <add>, %336, %cst_97 [0] : vector<160x128xf32> to vector<128xf32>
    %340 = vector.shape_cast %339 : vector<128xf32> to vector<1x128xf32>
    %cst_98 = arith.constant 1.600000e+02 : f32
    %341 = vector.broadcast %cst_98 : f32 to vector<1x128xf32>
    %342 = arith.divf %340, %341 : vector<1x128xf32>
    %343 = arith.mulf %336, %336 : vector<160x128xf32>
    %cst_99 = arith.constant dense<0.000000e+00> : vector<128xf32>
    %344 = vector.multi_reduction <add>, %343, %cst_99 [0] : vector<160x128xf32> to vector<128xf32>
    %345 = vector.shape_cast %344 : vector<128xf32> to vector<1x128xf32>
    %cst_100 = arith.constant 1.600000e+02 : f32
    %346 = vector.broadcast %cst_100 : f32 to vector<1x128xf32>
    %347 = arith.divf %345, %346 : vector<1x128xf32>
    %348 = arith.mulf %342, %342 : vector<1x128xf32>
    %349 = arith.subf %347, %348 : vector<1x128xf32>
    %cst_101 = arith.constant 9.99999974E-6 : f32
    %350 = vector.broadcast %cst_101 : f32 to vector<1x128xf32>
    %351 = arith.addf %349, %350 : vector<1x128xf32>
    %352 = math.rsqrt %351 : vector<1x128xf32>
    %353 = arith.mulf %337, %352 : vector<1x128xf32>
    %354 = arith.mulf %342, %353 : vector<1x128xf32>
    %355 = arith.subf %338, %354 : vector<1x128xf32>
    %356 = vector.broadcast %353 : vector<1x128xf32> to vector<160x128xf32>
    %357 = arith.mulf %336, %356 : vector<160x128xf32>
    %358 = vector.broadcast %355 : vector<1x128xf32> to vector<160x128xf32>
    %359 = arith.addf %357, %358 : vector<160x128xf32>
    %360 = arith.truncf %359 : vector<160x128xf32> to vector<160x128xbf16>
    %c0_102 = arith.constant 0 : index
    %c0_103 = arith.constant 0 : index
    %361 = vector.load %arg28[%c0_102, %c0_103] : memref<128x128xbf16, #tpu.memory_space<vmem>>, vector<128x128xbf16>
    %cst_104 = arith.constant dense<0.000000e+00> : vector<160x128xf32>
    %362 = tpu.matmul %360, %361, %cst_104 {dimension_numbers = #tpu.dot_dimension_numbers<[1], [0], [0], [1], [0, 0, 1, 1], [], []>} : vector<160x128xbf16>, vector<128x128xbf16>, vector<160x128xf32> -> vector<160x128xf32>
    %c0_105 = arith.constant 0 : index
    %c0_106 = arith.constant 0 : index
    %363 = vector.load %arg29[%c0_105, %c0_106] : memref<1x128xf32, #tpu.memory_space<vmem>>, vector<1x128xf32>
    %364 = vector.broadcast %363 : vector<1x128xf32> to vector<160x128xf32>
    %365 = arith.addf %362, %364 : vector<160x128xf32>
    %c0_107 = arith.constant 0 : index
    %c0_108 = arith.constant 0 : index
    %366 = vector.load %arg30[%c0_107, %c0_108] : memref<160x128xf32, #tpu.memory_space<vmem>>, vector<160x128xf32>
    tpu.vector_store %arg30[%c0_107, %c0_108], %365 {strides = array<i32>} : memref<160x128xf32, #tpu.memory_space<vmem>>, vector<160x128xf32>,
    return
  }
}

</mosaic_0001>

<bundles_post_ra>
// kernel: forward.1
= control target key start
LH: loop header
LB: loop body
LE: loop exit
PB: predicated region body
PF: predicated region fallthrough
CT: control target
= control target key end

     0   :  { %v4015_v0 = vmov 0.0   ;;  %s4016_s3 = smov 1   ;;  %vm4017_vm0 = vmmov 0   ;;  %s4018_s10 = smov 3   ;;  %vm168_vm1 = vcmask 261120   ;;  %s5187_s0 = inlined_call_operand.smem [shape: u32[31], index: -1, kind: input, shape index: {}] }
   0x1   :  { %3310 = vmatprep.subr.bf16.mxu0 %v4015_v0  ;;  %s2921_s6 = sld [smem:[%s5187_s0 + %s4016_s3]]   ;;  %3314 = vmatprep.mubr.msk.bf16.mxu0 %vm4017_vm0, %v4015_v0  ;;  %s4019_s14 = smov 2  }
   0x2   :  { %3326 = vmatprep.subr.bf16.mxu1 %v4015_v0  ;;  %3342 = vmatprep.mubr.msk.bf16.mxu1 %vm4017_vm0, %v4015_v0  ;;  %s1_s9 = sld [smem:[%s5187_s0]]   ;;  %s4020_s18 = smov 7  }
   0x3   :  { %s4067_s13 = sld [smem:[%s5187_s0 + %s4018_s10]]   ;;  %s4021_s22 = smov 8  }
   0x4   :  { %s2922_s17 = sld [smem:[%s5187_s0 + %s4019_s14]]   ;;  %s4022_s26 = smov 4  }
   0x5   :  { %s4105_s21 = sld [smem:[%s5187_s0 + %s4020_s18]]   ;;  %s4023_s30 = smov 5  }
   0x6   :  { %s4110_s25 = sld [smem:[%s5187_s0 + %s4021_s22]]   ;;  %s4024_s4 = smov 6  }
   0x7   :  { %v3714_v1 = vld [vmem:[%s2921_s6] sm:$0xff]   ;;  %v3715_v2 = vld [vmem:[%s2921_s6 + $0x8] sm:$0xff]   ;;  %s2924_s29 = sld [smem:[%s5187_s0 + %s4022_s26]]   ;;  %s4025_s8 = smov 10  }
   0x8   :  { %3311 = vmatpush3.bf16.msra.mxu0 %v3714_v1  ;;  %v3716_v3 = vld [vmem:[%s1_s9] sm:$0xff]   ;;  %v3717_v6 = vld [vmem:[%s1_s9 + $0x8] sm:$0xff]   ;;  %v3718_v7 = vld [vmem:[%s1_s9 + $0x10] ss:$0 sps:$4 sm:$0xff]   ;;  %s2925_s3 = sld [smem:[%s5187_s0 + %s4023_s30]]   ;;  %s4026_s12 = smov 9  }
   0x9   :  { %3312 = vmatprep.subr.bf16.mxu0 %v4015_v0  ;;  %v3719_v4 = vld [vmem:[%s4067_s13] sm:$0xff]   ;;  %v3720_v5 = vld [vmem:[%s4067_s13 + $0x8] sm:$0xff]   ;;  %v3721_v8 = vld [vmem:[%s4067_s13 + $0x10] sm:$0xff]   ;;  %s2926_s7 = sld [smem:[%s5187_s0 + %s4024_s4]]   ;;  %s4027_s16 = smov 14  }
   0xa   :  { %3327 = vmatpush3.bf16.msra.mxu1 %v3719_v4  ;;  %v3722_v9 = vld [vmem:[%s4067_s13 + $0x18] sm:$0xff]   ;;  %v3723_v10 = vld [vmem:[%s4067_s13 + $0x20] sm:$0xff]   ;;  %v3724_v11 = vld [vmem:[%s4067_s13 + $0x28] sm:$0xff]   ;;  %s2930_s11 = sld [smem:[%s5187_s0 + %s4025_s8]]   ;;  %s4028_s20 = smov 11  }
   0xb   :  { %3328 = vmatprep.subr.bf16.mxu1 %v4015_v0  ;;  %v3725_v12 = vld [vmem:[%s4067_s13 + $0x30] sm:$0xff]   ;;  %v3726_v13 = vld [vmem:[%s4067_s13 + $0x38] sm:$0xff]   ;;  %v2951_v14 = vld [vmem:[%s2922_s17] ss:$0 sm:$0xff]  ;;  %s2929_s15 = sld [smem:[%s5187_s0 + %s4026_s12]]   ;;  %s4029_s24 = smov 16  }
   0xc   :  { %3313 = vmatpush3.bf16.msra.mxu0 %v3715_v2  ;;  %v3727_v55 = vld [vmem:[%s4105_s21] sm:$0xff]   ;;  %v3729_v57 = vld [vmem:[%s4105_s21 + $0x8] sm:$0xff]   ;;  %v3731_v59 = vld [vmem:[%s4105_s21 + $0x10] sm:$0xff]   ;;  %s2934_s19 = sld [smem:[%s5187_s0 + %s4027_s16]]   ;;  %s4030_s28 = smov 12  }
   0xd   :  { %3354 = vmatprep.subr.bf16.mxu0 %v4015_v0  ;;  %v3728_v56 = vld [vmem:[%s4110_s25] sm:$0xff]   ;;  %v3730_v58 = vld [vmem:[%s4110_s25 + $0x8] sm:$0xff]   ;;  %v3732_v60 = vld [vmem:[%s4110_s25 + $0x10] sm:$0xff]   ;;  %s2931_s23 = sld [smem:[%s5187_s0 + %s4028_s20]]   ;;  %s4031_s2 = smov 13  }
   0xe   :  { %3329 = vmatpush3.bf16.msra.mxu1 %v3720_v5  ;;  %v3733_v61 = vld [vmem:[%s4105_s21 + $0x18] sm:$0xff]   ;;  %v3735_v63 = vld [vmem:[%s4105_s21 + $0x20] sm:$0xff]   ;;  %v3737_v2 = vld [vmem:[%s4105_s21 + $0x28] sm:$0xff]   ;;  %s4335_s27 = sld [smem:[%s5187_s0 + %s4029_s24]]   ;;  %s4032_s6 = smov 15  }
   0xf   :  { %3315 = vmatmul.mubr.msk.bf16.vlgmr.msra.gmra.mrb[0].mxu0 %vm168_vm1, %v3716_v3  ;;  %3330 = vmatprep.subr.bf16.mxu1 %v4015_v0  ;;  %v3734_v62 = vld [vmem:[%s4110_s25 + $0x18] sm:$0xff]   ;;  %v3736_v1 = vld [vmem:[%s4110_s25 + $0x20] sm:$0xff]   ;;  %v3738_v3 = vld [vmem:[%s4110_s25 + $0x28] sm:$0xff]   ;;  %s2932_s1 = sld [smem:[%s5187_s0 + %s4030_s28]]   ;;  %s4033_s10 = smov 20  }
  0x10   :  { %3318 = vmatprep.mubr.msk.bf16.mxu0 %vm4017_vm0, %v4015_v0  ;;  %3355 = vmatpush3.bf16.msra.mxu0 %v3727_v55  ;;  %v3739_v4 = vld [vmem:[%s4105_s21 + $0x30] sm:$0xff]   ;;  %s2933_s5 = sld [smem:[%s5187_s0 + %s4031_s2]]   ;;  %s4034_s14 = smov 21  }
  0x11   :  { %3356 = vmatprep.subr.bf16.mxu0 %v4015_v0  ;;  %v3740_v5 = vld [vmem:[%s4110_s25 + $0x30] sm:$0xff]   ;;  %s2935_s9 = sld [smem:[%s5187_s0 + %s4032_s6]]   ;;  %s4035_s18 = smov 22  }
  0x12   :  { %3331 = vmatpush3.bf16.msra.mxu1 %v3721_v8  ;;  %v2965_v8 = vld [vmem:[%s2924_s29] ss:$0 sm:$0xff]  ;;  %s4673_s13 = sld [smem:[%s5187_s0 + %s4033_s10]]   ;;  %s4036_s22 = smov 17  }
  0x13   :  { %3332 = vmatprep.subr.bf16.mxu1 %v4015_v0  ;;  %s4678_s17 = sld [smem:[%s5187_s0 + %s4034_s14]]   ;;  %s4037_s26 = smov 18  }
  0x14   :  { %3357 = vmatpush3.bf16.msra.mxu0 %v3729_v57  ;;  %s2938_s29 = sld [smem:[%s5187_s0 + %s4037_s26]]   ;;  %s4038_s30 = smov 19  }
  0x15   :  { %3358 = vmatprep.subr.bf16.mxu0 %v4015_v0  ;;  %s4039_s4 = smov 24   ;;  %s4040_s8 = smov 23  }
  0x16   :  { %3333 = vmatpush3.bf16.msra.mxu1 %v3722_v9  ;;  %s4041_s12 = smov 28   ;;  %s4042_s16 = smov 25  }
  0x17   :  { %3319 = vmatmul.mubr.msk.bf16.gmra.mrb[4].mxu0 %vm168_vm1, %v3717_v6  ;;  %3334 = vmatprep.subr.bf16.mxu1 %v4015_v0  ;;  %v3741_v6 = vld [vmem:[%s4105_s21 + $0x38] sm:$0xff]   ;;  %s4704_s21 = sld [smem:[%s5187_s0 + %s4035_s18]]   ;;  %s4043_s20 = smov 26  }
  0x18   :  { %3322 = vmatprep.mubr.msk.bf16.mxu0 %vm4017_vm0, %v4015_v0  ;;  %3359 = vmatpush3.bf16.msra.mxu0 %v3731_v59  ;;  %s4044_s24 = smov 27   ;;  %s4045_s28 = smov 29  }
  0x19   :  { %3360 = vmatprep.subr.bf16.mxu0 %v4015_v0  ;;  %s4046_s2 = smov 30  }
  0x1a   :  { %3335 = vmatpush3.bf16.msra.mxu1 %v3723_v10 }
  0x1b   :  { %3336 = vmatprep.subr.bf16.mxu1 %v4015_v0 }
  0x1c   :  { %3361 = vmatpush3.bf16.msra.mxu0 %v3733_v61 }
  0x1d   :  { %3362 = vmatprep.subr.bf16.mxu0 %v4015_v0 }
  0x1e   :  { %3337 = vmatpush3.bf16.msra.mxu1 %v3724_v11 }
  0x1f   :  { %3323 = vmatmul.mubr.msk.bf16.gmra.mrb[8].mxu0 %vm168_vm1, %v3718_v7  ;;  %3338 = vmatprep.subr.bf16.mxu1 %v4015_v0  ;;  %v3742_v7 = vld [vmem:[%s4110_s25 + $0x38] sm:$0xff]   ;;  %s2937_s25 = sld [smem:[%s5187_s0 + %s4036_s22]]  }
  0x20   :  { %3370 = vmatprep.mubr.msk.bf16.mxu0 %vm4017_vm0, %v4015_v0  ;;  %3363 = vmatpush3.bf16.msra.mxu0 %v3735_v63 }
  0x21   :  { %3364 = vmatprep.subr.bf16.mxu0 %v4015_v0 }
  0x22   :  { %3339 = vmatpush3.bf16.msra.mxu1 %v3725_v12 }
  0x23   :  { %3340 = vmatprep.subr.bf16.mxu1 %v4015_v0 }
  0x24   :  { %3365 = vmatpush3.bf16.msra.mxu0 %v3737_v2 }
  0x25   :  { %3366 = vmatprep.subr.bf16.mxu0 %v4015_v0 }
  0x26   :  { %3341 = vmatpush3.bf16.msra.mxu1 %v3726_v13 }
  0x27   :  { %3382 = vmatprep.subr.bf16.mxu1 %v4015_v0 }
  0x28   :  { %3367 = vmatpush3.bf16.msra.mxu0 %v3739_v4 }
  0x29   :  { %3368 = vmatprep.subr.bf16.mxu0 %v4015_v0 }
  0x2c   :  { %3369 = vmatpush3.bf16.msra.mxu0 %v3741_v6 }
  0xe2   :  { %v212_v15 = vpop.f32.mrb[0].mxu0 }
  0xe3   :  { %v213_v16 = vadd.f32 %v2951_v14, %v212_v15  ;;  %v3316_v17 = vpop.f32.mrb[1].mxu0 }
  0xe4   :  { %v215_v18 = vpop.f32.mrb[2].mxu0 }
  0xe5   :  { %v239_v19 = vmul.f32 1.442695, %v213_v16  ;;  %v216_v20 = vadd.f32 %v2951_v14, %v215_v18  ;;  %v3317_v21 = vpop.f32.mrb[3].mxu0  ;;  %vm234_vm2 = vcmp.gt.f32.partialorder %v213_v16, 0.0 }
  0xe7   :  { %3807 = vpow2.f32 %v239_v19  ;;  %v241_v22 = vmul.f32 1.442695, %v216_v20  ;;  %vm235_vm3 = vcmp.gt.f32.partialorder %v216_v20, 0.0 }
  0xe9   :  { %3809 = vpow2.f32 %v241_v22 }
  0xea   :  { %v220_v23 = vpop.f32.mrb[4].mxu0 }
  0xeb   :  { %v221_v24 = vadd.f32 %v2951_v14, %v220_v23  ;;  %v3320_v25 = vpop.f32.mrb[5].mxu0 }
  0xec   :  { %v223_v26 = vpop.f32.mrb[6].mxu0 }
  0xed   :  { %v243_v27 = vmul.f32 1.442695, %v221_v24  ;;  %v224_v28 = vadd.f32 %v2951_v14, %v223_v26  ;;  %v3321_v29 = vpop.f32.mrb[7].mxu0  ;;  %vm236_vm4 = vcmp.gt.f32.partialorder %v221_v24, 0.0 }
  0xef   :  { %3811 = vpow2.f32 %v243_v27  ;;  %v245_v30 = vmul.f32 1.442695, %v224_v28  ;;  %vm237_vm5 = vcmp.gt.f32.partialorder %v224_v28, 0.0 }
  0xf1   :  { %v3808_v31 = vpop.eup %3807  ;;  %3813 = vpow2.f32 %v245_v30 }
  0xf2   :  { %v2960_v32 = vadd.f32 -1.0, %v3808_v31  ;;  %v228_v33 = vpop.f32.mrb[8].mxu0 }
  0xf3   :  { %v3810_v34 = vpop.eup %3809  ;;  %v229_v35 = vadd.f32 %v2951_v14, %v228_v33  ;;  %v3324_v36 = vpop.f32.mrb[9].mxu0 }
  0xf4   :  { %v2961_v37 = vadd.f32 -1.0, %v3810_v34  ;;  %v231_v38 = vpop.f32.mrb[10].mxu0  ;;  %v254_v41 = vsel %vm234_vm2, %v213_v16, %v2960_v32 }
  0xf5   :  { %v247_v39 = vmul.f32 1.442695, %v229_v35  ;;  %v3325_v40 = vpop.f32.mrb[11].mxu0  ;;  %vm238_vm6 = vcmp.gt.f32.partialorder %v229_v35, 0.0 }
  0xf6   :  { %v255_v42 = vsel %vm235_vm3, %v216_v20, %v2961_v37 }
  0xf7   :  { %3815 = vpow2.f32 %v247_v39  ;;  %v259_v43 = vpack.c.bf16 %v255_v42, %v254_v41 }
  0xf9   :  { %v3812_v44 = vpop.eup %3811  ;;  %3343 = vmatmul.mubr.bf16.vlgmr.msra.gmra.mrb[0].mxu1 %v259_v43 }
  0xfa   :  { %v2962_v45 = vadd.f32 -1.0, %v3812_v44  ;;  %3346 = vmatprep.mubr.msk.bf16.mxu1 %vm4017_vm0, %v4015_v0  ;;  %3383 = vmatpush3.bf16.msra.mxu1 %v3728_v56 }
  0xfb   :  { %v3814_v46 = vpop.eup %3813  ;;  %3384 = vmatprep.subr.bf16.mxu1 %v4015_v0 }
  0xfc   :  { %v2963_v47 = vadd.f32 -1.0, %v3814_v46  ;;  %v256_v48 = vsel %vm236_vm4, %v221_v24, %v2962_v45 }
  0xfe   :  { %v257_v49 = vsel %vm237_vm5, %v224_v28, %v2963_v47  ;;  %3385 = vmatpush3.bf16.msra.mxu1 %v3730_v58 }
  0xff   :  { %v260_v50 = vpack.c.bf16 %v257_v49, %v256_v48  ;;  %3386 = vmatprep.subr.bf16.mxu1 %v4015_v0 }
 0x101   :  { %v3816_v51 = vpop.eup %3815  ;;  %3347 = vmatmul.mubr.bf16.gmra.mrb[4].mxu1 %v260_v50 }
 0x102   :  { %v2964_v52 = vadd.f32 -1.0, %v3816_v51  ;;  %3350 = vmatprep.mubr.msk.bf16.mxu1 %vm4017_vm0, %v4015_v0  ;;  %3387 = vmatpush3.bf16.msra.mxu1 %v3732_v60 }
 0x103   :  { %3388 = vmatprep.subr.bf16.mxu1 %v4015_v0 }
 0x104   :  { %v258_v53 = vsel %vm238_vm6, %v229_v35, %v2964_v52 }
 0x105   :  { %v261_v54 = vpack.c.bf16 %v258_v53, %v258_v53 }
 0x106   :  { %3389 = vmatpush3.bf16.msra.mxu1 %v3734_v62 }
 0x107   :  { %3390 = vmatprep.subr.bf16.mxu1 %v4015_v0 }
 0x109   :  { %3351 = vmatmul.mubr.bf16.gmra.mrb[8].mxu1 %v261_v54 }
 0x10a   :  { %3398 = vmatprep.mubr.msk.bf16.mxu1 %vm4017_vm0, %v4015_v0  ;;  %3391 = vmatpush3.bf16.msra.mxu1 %v3736_v1 }
 0x10b   :  { %3392 = vmatprep.subr.bf16.mxu1 %v4015_v0 }
 0x10e   :  { %3393 = vmatpush3.bf16.msra.mxu1 %v3738_v3 }
 0x10f   :  { %3394 = vmatprep.subr.bf16.mxu1 %v4015_v0 }
 0x112   :  { %3395 = vmatpush3.bf16.msra.mxu1 %v3740_v5 }
 0x113   :  { %3396 = vmatprep.subr.bf16.mxu1 %v4015_v0 }
 0x116   :  { %3397 = vmatpush3.bf16.msra.mxu1 %v3742_v7 }
 0x117   :  { %3446 = vmatprep.subr.bf16.mxu1 %v4015_v0 }
 0x1cc   :  { %v367_v9 = vpop.f32.mrb[0].mxu1 }
 0x1cd   :  { %v368_v10 = vadd.f32 %v2965_v8, %v367_v9  ;;  %v3344_v11 = vpop.f32.mrb[1].mxu1 }
 0x1ce   :  { %v370_v12 = vpop.f32.mrb[2].mxu1 }
 0x1cf   :  { %v394_v13 = vmul.f32 1.442695, %v368_v10  ;;  %v371_v14 = vadd.f32 %v2965_v8, %v370_v12  ;;  %v3345_v15 = vpop.f32.mrb[3].mxu1  ;;  %vm389_vm7 = vcmp.gt.f32.partialorder %v368_v10, 0.0 }
 0x1d0   :  { %v414_v15 = vld [vmem:[%s2925_s3] sm:$0x1]  ;;  %s2939_s3 = sld [smem:[%s5187_s0 + %s4038_s30]]  }
 0x1d1   :  { %3817 = vpow2.f32 %v394_v13  ;;  %v396_v16 = vmul.f32 1.442695, %v371_v14  ;;  %vm390_vm8 = vcmp.gt.f32.partialorder %v371_v14, 0.0  ;;  %v452_v13 = vlaneseq }
 0x1d3   :  { %3819 = vpow2.f32 %v396_v16 }
 0x1d4   :  { %v375_v17 = vpop.f32.mrb[4].mxu1 }
 0x1d5   :  { %v376_v18 = vadd.f32 %v2965_v8, %v375_v17  ;;  %v3348_v19 = vpop.f32.mrb[5].mxu1 }
 0x1d6   :  { %v378_v20 = vpop.f32.mrb[6].mxu1  ;;  %v415_v19 = vld [vmem:[%s2926_s7] sm:$0x1]  ;;  %s2944_s7 = sld [smem:[%s5187_s0 + %s4039_s4]]  }
 0x1d7   :  { %v398_v21 = vmul.f32 1.442695, %v376_v18  ;;  %v379_v22 = vadd.f32 %v2965_v8, %v378_v20  ;;  %v3349_v23 = vpop.f32.mrb[7].mxu1  ;;  %vm391_vm9 = vcmp.gt.f32.partialorder %v376_v18, 0.0 }
 0x1d9   :  { %3821 = vpow2.f32 %v398_v21  ;;  %v400_v24 = vmul.f32 1.442695, %v379_v22  ;;  %vm392_vm10 = vcmp.gt.f32.partialorder %v379_v22, 0.0 }
 0x1db   :  { %v3818_v25 = vpop.eup %3817  ;;  %3823 = vpow2.f32 %v400_v24 }
 0x1dc   :  { %v2974_v26 = vadd.f32 -1.0, %v3818_v25  ;;  %v383_v27 = vpop.f32.mrb[8].mxu1 }
 0x1dd   :  { %v3820_v28 = vpop.eup %3819  ;;  %v384_v29 = vadd.f32 %v2965_v8, %v383_v27  ;;  %v3352_v30 = vpop.f32.mrb[9].mxu1 }
 0x1de   :  { %v4146_v31 = vsel %vm389_vm7, %v368_v10, %v2974_v26  ;;  %v2975_v32 = vadd.f32 -1.0, %v3820_v28  ;;  %v386_v33 = vpop.f32.mrb[10].mxu1 }
 0x1df   :  { %v402_v34 = vmul.f32 1.442695, %v384_v29  ;;  %v3353_v35 = vpop.f32.mrb[11].mxu1  ;;  %v428_v37 = vmul.f32 %v4146_v31, %v4146_v31  ;;  %vm393_vm11 = vcmp.gt.f32.partialorder %v384_v29, 0.0 }
 0x1e0   :  { %v410_v36 = vsel %vm390_vm8, %v371_v14, %v2975_v32  ;;  %v453_v14 = vshrl.u32 %v452_v13, 7 }
 0x1e1   :  { %v416_v38 = vadd.f32 %v410_v36, %v4146_v31  ;;  %v429_v39 = vmul.f32 %v410_v36, %v410_v36  ;;  %3825 = vpow2.f32 %v402_v34 }
 0x1e2   :  { %v4157_v16 = vsub.s32 0, %v453_v14 }
 0x1e3   :  { %v3822_v40 = vpop.eup %3821  ;;  %v433_v41 = vadd.f32 %v429_v39, %v428_v37  ;;  %v3745_v39 = vld [vmem:[%s2930_s11 + $0x10] sm:$0xff]  }
 0x1e4   :  { %v2976_v42 = vadd.f32 -1.0, %v3822_v40  ;;  %v3746_v40 = vld [vmem:[%s2930_s11 + $0x18] sm:$0xff]  }
 0x1e5   :  { %v3824_v43 = vpop.eup %3823 }
 0x1e6   :  { %v411_v44 = vsel %vm391_vm9, %v376_v18, %v2976_v42  ;;  %v2977_v45 = vadd.f32 -1.0, %v3824_v43  ;;  %v3748_v42 = vld [vmem:[%s2930_s11 + $0x28] sm:$0xff]   ;;  %v3749_v43 = vld [vmem:[%s2930_s11 + $0x30] sm:$0xff]  }
 0x1e7   :  { %v417_v46 = vadd.f32 %v416_v38, %v411_v44  ;;  %v430_v47 = vmul.f32 %v411_v44, %v411_v44  ;;  %v3744_v38 = vld [vmem:[%s2930_s11 + $0x8] sm:$0xff]  }
 0x1e8   :  { %v412_v48 = vsel %vm392_vm10, %v379_v22, %v2977_v45 }
 0x1e9   :  { %v434_v49 = vadd.f32 %v433_v41, %v430_v47  ;;  %v418_v50 = vadd.f32 %v417_v46, %v412_v48  ;;  %v431_v51 = vmul.f32 %v412_v48, %v412_v48  ;;  %v3747_v41 = vld [vmem:[%s2930_s11 + $0x20] sm:$0xff]  }
 0x1eb   :  { %v3826_v52 = vpop.eup %3825  ;;  %v435_v53 = vadd.f32 %v434_v49, %v431_v51 }
 0x1ec   :  { %v2978_v54 = vadd.f32 -1.0, %v3826_v52 }
 0x1ee   :  { %v413_v55 = vsel %vm393_vm11, %v384_v29, %v2978_v54 }
 0x1ef   :  { %v419_v56 = vadd.f32 %v418_v50, %v413_v55  ;;  %v432_v57 = vmul.f32 %v413_v55, %v413_v55  ;;  %v4179_v50 = vld [vmem:[%s2929_s15] ss:$0 sm:$0xff]  ;;  %s4922_s15 = sld [smem:[%s5187_s0 + %s4041_s12]]  }
 0x1f1   :  { %v420_v58 = vrot.slane %v419_v56, 4  ;;  %v436_v59 = vadd.f32 %v435_v53, %v432_v57 }
 0x1f3   :  { %v421_v60 = vadd.f32 %v420_v58, %v419_v56  ;;  %v437_v61 = vrot.slane %v436_v59, 4 }
 0x1f5   :  { %v422_v62 = vrot.slane %v421_v60, 2  ;;  %v438_v63 = vadd.f32 %v437_v61, %v436_v59 }
 0x1f7   :  { %v423_v1 = vadd.f32 %v422_v62, %v421_v60  ;;  %v439_v2 = vrot.slane %v438_v63, 2 }
 0x1f9   :  { %v424_v3 = vrot.slane %v423_v1, 1  ;;  %v440_v4 = vadd.f32 %v439_v2, %v438_v63 }
 0x1fb   :  { %v425_v5 = vadd.f32 %v424_v3, %v423_v1  ;;  %v441_v6 = vrot.slane %v440_v4, 1 }
 0x1fd   :  { %v427_v7 = vmul.f32 0.025, %v425_v5  ;;  %v442_v8 = vadd.f32 %v441_v6, %v440_v4 }
 0x1ff   :  { %v443_v9 = vmul.f32 0.025, %v442_v8  ;;  %v444_v10 = vmul.f32 %v427_v7, %v427_v7 }
 0x201   :  { %v445_v11 = vsub.f32 %v443_v9, %v444_v10 }
 0x203   :  { %v446_v12 = vadd.f32 1e-05, %v445_v11 }
 0x205   :  { %3827 = vrsqrt.f32 %v446_v12 }
 0x20f   :  { %v3828_v17 = vpop.eup %3827 }
 0x210   :  { %v448_v18 = vmul.f32 %v3828_v17, %v414_v15 }
 0x212   :  { %v449_v20 = vmul.f32 %v448_v18, %v427_v7  ;;  %v455_v21 = vrot.slane %v448_v18, %v4157_v16 }
 0x214   :  { %v450_v22 = vsub.f32 %v415_v19, %v449_v20  ;;  %v457_v23 = vmul.f32 %v455_v21, %v4146_v31  ;;  %v458_v24 = vmul.f32 %v455_v21, %v410_v36  ;;  %v459_v25 = vmul.f32 %v455_v21, %v411_v44  ;;  %v3743_v36 = vld [vmem:[%s2930_s11] sm:$0xff]   ;;  %v3750_v44 = vld [vmem:[%s2930_s11 + $0x38] sm:$0xff]   ;;  %s2943_s11 = sld [smem:[%s5187_s0 + %s4040_s8]]  }
 0x215   :  { %v460_v26 = vmul.f32 %v455_v21, %v412_v48  ;;  %v461_v27 = vmul.f32 %v455_v21, %v413_v55  ;;  %3410 = vmatprep.subr.bf16.mxu0 %v3743_v36 }
 0x216   :  { %v466_v28 = vrot.slane %v450_v22, %v4157_v16 }
 0x218   :  { %v468_v29 = vadd.f32 %v466_v28, %v457_v23  ;;  %v469_v30 = vadd.f32 %v466_v28, %v458_v24  ;;  %v470_v32 = vadd.f32 %v466_v28, %v459_v25  ;;  %v471_v33 = vadd.f32 %v466_v28, %v460_v26 }
 0x219   :  { %v472_v34 = vadd.f32 %v466_v28, %v461_v27 }
 0x21a   :  { %v473_v35 = vpack.c.bf16 %v469_v30, %v468_v29  ;;  %v474_v37 = vpack.c.bf16 %v471_v33, %v470_v32 }
 0x21b   :  { %v475_v31 = vpack.c.bf16 %v472_v34, %v472_v34 }
 0x21c   :  { %3371 = vmatmul.mubr.bf16.vlgmr.msra.gmra.mrb[12].mxu0 %v473_v35  ;;  %3399 = vmatmul.mubr.bf16.vlgmr.msra.gmra.mrb[12].mxu1 %v473_v35 }
 0x21d   :  { %3374 = vmatprep.mubr.msk.bf16.mxu0 %vm4017_vm0, %v4015_v0  ;;  %3402 = vmatprep.mubr.msk.bf16.mxu1 %vm4017_vm0, %v4015_v0 }
 0x21e   :  { %3411 = vmatpush3.bf16.msra.mxu0 %v3743_v36 }
 0x21f   :  { %3412 = vmatprep.subr.bf16.mxu0 %v3744_v38 }
 0x222   :  { %3413 = vmatpush3.bf16.msra.mxu0 %v3744_v38 }
 0x223   :  { %3414 = vmatprep.subr.bf16.mxu0 %v3745_v39 }
 0x224   :  { %3375 = vmatmul.mubr.bf16.gmra.mrb[16].mxu0 %v474_v37  ;;  %3403 = vmatmul.mubr.bf16.gmra.mrb[16].mxu1 %v474_v37 }
 0x225   :  { %3378 = vmatprep.mubr.msk.bf16.mxu0 %vm4017_vm0, %v4015_v0  ;;  %3406 = vmatprep.mubr.msk.bf16.mxu1 %vm4017_vm0, %v4015_v0 }
 0x226   :  { %3415 = vmatpush3.bf16.msra.mxu0 %v3745_v39 }
 0x227   :  { %3416 = vmatprep.subr.bf16.mxu0 %v3746_v40 }
 0x22a   :  { %3417 = vmatpush3.bf16.msra.mxu0 %v3746_v40 }
 0x22b   :  { %3418 = vmatprep.subr.bf16.mxu0 %v3747_v41 }
 0x22c   :  { %3379 = vmatmul.mubr.bf16.gmra.mrb[20].mxu0 %v475_v31  ;;  %3407 = vmatmul.mubr.bf16.gmra.mrb[20].mxu1 %v475_v31 }
 0x22d   :  { %3462 = vmatprep.mubr.msk.bf16.mxu1 %vm4017_vm0, %v4015_v0 }
 0x22e   :  { %3419 = vmatpush3.bf16.msra.mxu0 %v3747_v41 }
 0x22f   :  { %3420 = vmatprep.subr.bf16.mxu0 %v3748_v42 }
 0x232   :  { %3421 = vmatpush3.bf16.msra.mxu0 %v3748_v42 }
 0x233   :  { %3422 = vmatprep.subr.bf16.mxu0 %v3749_v43 }
 0x236   :  { %3423 = vmatpush3.bf16.msra.mxu0 %v3749_v43 }
 0x237   :  { %3424 = vmatprep.subr.bf16.mxu0 %v3750_v44 }
 0x23a   :  { %3425 = vmatpush3.bf16.msra.mxu0 %v3750_v44 }
 0x23b   :  { %3474 = vmatprep.subr.bf16.mxu0 %v4015_v0 }
 0x2ef   :  { %v574_v45 = vpop.f32.mrb[12].mxu0  ;;  %v694_v46 = vpop.f32.mrb[12].mxu1 }
 0x2f0   :  { %v3372_v47 = vpop.f32.mrb[13].mxu0  ;;  %v3400_v48 = vpop.f32.mrb[13].mxu1 }
 0x2f1   :  { %v577_v49 = vpop.f32.mrb[14].mxu0  ;;  %v697_v51 = vpop.f32.mrb[14].mxu1 }
 0x2f2   :  { %v720_v52 = vadd.f32 %v694_v46, %v577_v49  ;;  %v716_v53 = vadd.f32 %v697_v51, %v574_v45  ;;  %v3373_v54 = vpop.f32.mrb[15].mxu0  ;;  %v3401_v55 = vpop.f32.mrb[15].mxu1 }
 0x2f4   :  { %v4182_v56 = vadd.f32 %v4179_v50, %v716_v53  ;;  %v4189_v12 = vadd.f32 %v4179_v50, %v720_v52 }
 0x2f6   :  { %v783_v57 = vmul.f32 1.442695, %v4182_v56  ;;  %v791_v19 = vmul.f32 1.442695, %v4189_v12  ;;  %vm763_vm12 = vcmp.gt.f32.partialorder %v4182_v56, 0.0  ;;  %vm767_vm14 = vcmp.gt.f32.partialorder %v4189_v12, 0.0 }
 0x2f7   :  { %v582_v58 = vpop.f32.mrb[16].mxu0  ;;  %v702_v59 = vpop.f32.mrb[16].mxu1 }
 0x2f8   :  { %v724_v60 = vadd.f32 %v694_v46, %v582_v58  ;;  %v725_v61 = vadd.f32 %v697_v51, %v582_v58  ;;  %v717_v62 = vadd.f32 %v702_v59, %v574_v45  ;;  %v721_v63 = vadd.f32 %v702_v59, %v577_v49  ;;  %v3376_v1 = vpop.f32.mrb[17].mxu0  ;;  %v3404_v2 = vpop.f32.mrb[17].mxu1 }
 0x2f9   :  { %v585_v3 = vpop.f32.mrb[18].mxu0  ;;  %v705_v4 = vpop.f32.mrb[18].mxu1  ;;  %3829 = vpow2.f32 %v783_v57 }
 0x2fa   :  { %v4186_v5 = vadd.f32 %v4179_v50, %v717_v62  ;;  %v3377_v6 = vpop.f32.mrb[19].mxu0  ;;  %v3405_v7 = vpop.f32.mrb[19].mxu1  ;;  %v728_v8 = vadd.f32 %v694_v46, %v585_v3  ;;  %v729_v9 = vadd.f32 %v697_v51, %v585_v3  ;;  %v730_v10 = vadd.f32 %v702_v59, %v585_v3 }
 0x2fb   :  { %v718_v11 = vadd.f32 %v705_v4, %v574_v45  ;;  %v722_v14 = vadd.f32 %v705_v4, %v577_v49  ;;  %v726_v15 = vadd.f32 %v705_v4, %v582_v58  ;;  %v4196_v18 = vadd.f32 %v4179_v50, %v721_v63 }
 0x2fc   :  { %v785_v13 = vmul.f32 1.442695, %v4186_v5  ;;  %v4204_v34 = vadd.f32 %v4179_v50, %v724_v60  ;;  %v4214_v43 = vadd.f32 %v4179_v50, %v725_v61  ;;  %v4232_v55 = vadd.f32 %v4179_v50, %v729_v9 }
 0x2fd   :  { %v4193_v17 = vadd.f32 %v4179_v50, %v718_v11  ;;  %v4201_v28 = vadd.f32 %v4179_v50, %v722_v14  ;;  %v793_v35 = vmul.f32 1.442695, %v4196_v18  ;;  %v4217_v44 = vadd.f32 %v4179_v50, %v726_v15 }
 0x2fe   :  { %3831 = vpow2.f32 %v785_v13  ;;  %v801_v54 = vmul.f32 1.442695, %v4214_v43  ;;  %v4235_v57 = vadd.f32 %v4179_v50, %v730_v10  ;;  %vm764_vm13 = vcmp.gt.f32.partialorder %v4186_v5, 0.0 }
 0x2ff   :  { %v787_v20 = vmul.f32 1.442695, %v4193_v17  ;;  %v590_v21 = vpop.f32.mrb[20].mxu0  ;;  %v710_v26 = vpop.f32.mrb[20].mxu1  ;;  %vm765_vm15 = vcmp.gt.f32.partialorder %v4193_v17, 0.0  ;;  %vm768_vm2 = vcmp.gt.f32.partialorder %v4196_v18, 0.0 }
 0x300   :  { %v732_v22 = vadd.f32 %v694_v46, %v590_v21  ;;  %v733_v23 = vadd.f32 %v697_v51, %v590_v21  ;;  %v734_v24 = vadd.f32 %v702_v59, %v590_v21  ;;  %v735_v25 = vadd.f32 %v705_v4, %v590_v21  ;;  %v3380_v27 = vpop.f32.mrb[21].mxu0  ;;  %v3408_v32 = vpop.f32.mrb[21].mxu1 }
 0x301   :  { %v719_v29 = vadd.f32 %v710_v26, %v574_v45  ;;  %v723_v30 = vadd.f32 %v710_v26, %v577_v49  ;;  %v593_v33 = vpop.f32.mrb[22].mxu0  ;;  %3833 = vpow2.f32 %v787_v20  ;;  %v713_v37 = vpop.f32.mrb[22].mxu1  ;;  %v727_v38 = vadd.f32 %v710_v26, %v582_v58 }
 0x302   :  { %v3381_v31 = vpop.f32.mrb[23].mxu0  ;;  %v731_v39 = vadd.f32 %v710_v26, %v585_v3  ;;  %v3409_v42 = vpop.f32.mrb[23].mxu1  ;;  %3835 = vpow2.f32 %v791_v19  ;;  %v795_v45 = vmul.f32 1.442695, %v4201_v28  ;;  %v4221_v46 = vadd.f32 %v4179_v50, %v728_v8 }
 0x303   :  { %v3830_v36 = vpop.eup %3829  ;;  %v4208_v40 = vadd.f32 %v4179_v50, %v719_v29  ;;  %v4211_v41 = vadd.f32 %v4179_v50, %v723_v30  ;;  %v4224_v47 = vadd.f32 %v4179_v50, %v727_v38  ;;  %v799_v51 = vmul.f32 1.442695, %v4204_v34 }
 0x304   :  { %v2996_v52 = vadd.f32 -1.0, %v3830_v36  ;;  %3837 = vpow2.f32 %v793_v35  ;;  %v803_v58 = vmul.f32 1.442695, %v4217_v44  ;;  %v807_v60 = vmul.f32 1.442695, %v4221_v46 }
 0x305   :  { %v789_v48 = vmul.f32 1.442695, %v4208_v40  ;;  %v797_v49 = vmul.f32 1.442695, %v4211_v41  ;;  %v4241_v61 = vadd.f32 %v4179_v50, %v731_v39  ;;  %v805_v62 = vmul.f32 1.442695, %v4224_v47 }
 0x306   :  { %v4245_v63 = vadd.f32 %v4179_v50, %v732_v22  ;;  %v843_v1 = vsel %vm763_vm12, %v4182_v56, %v2996_v52  ;;  %v809_v4 = vmul.f32 1.442695, %v4232_v55  ;;  %v4253_v6 = vadd.f32 %v4179_v50, %v733_v23 }
 0x307   :  { %3839 = vpow2.f32 %v789_v48  ;;  %v811_v8 = vmul.f32 1.442695, %v4235_v57  ;;  %v4257_v9 = vadd.f32 %v4179_v50, %v734_v24  ;;  %v4260_v10 = vadd.f32 %v4179_v50, %v735_v25 }
 0x308   :  { %v3832_v53 = vpop.eup %3831  ;;  %3841 = vpow2.f32 %v795_v45  ;;  %v815_v13 = vmul.f32 1.442695, %v4245_v63  ;;  %v817_v14 = vmul.f32 1.442695, %v4253_v6  ;;  %vm766_vm1 = vcmp.gt.f32.partialorder %v4208_v40, 0.0 }
 0x309   :  { %v2997_v59 = vadd.f32 -1.0, %v3832_v53  ;;  %3843 = vpow2.f32 %v797_v49  ;;  %v819_v50 = vmul.f32 1.442695, %v4257_v9  ;;  %v821_v20 = vmul.f32 1.442695, %v4260_v10 }
 0x30a   :  { %3845 = vpow2.f32 %v799_v51  ;;  %vm769_vm3 = vcmp.gt.f32.partialorder %v4201_v28, 0.0  ;;  %vm770_vm4 = vcmp.gt.f32.partialorder %v4211_v41, 0.0  ;;  %vm771_vm5 = vcmp.gt.f32.partialorder %v4204_v34, 0.0 }
 0x30b   :  { %v844_v2 = vsel %vm764_vm13, %v4186_v5, %v2997_v59  ;;  %v3834_v3 = vpop.eup %3833  ;;  %3847 = vpow2.f32 %v801_v54  ;;  %v813_v5 = vmul.f32 1.442695, %v4241_v61  ;;  %vm772_vm6 = vcmp.gt.f32.partialorder %v4214_v43, 0.0 }
 0x30c   :  { %v863_v7 = vpack.c.bf16 %v844_v2, %v843_v1  ;;  %3849 = vpow2.f32 %v803_v58  ;;  %v3836_v56 = vpop.eup %3835  ;;  %v2998_v11 = vadd.f32 -1.0, %v3834_v3  ;;  %vm773_vm7 = vcmp.gt.f32.partialorder %v4217_v44, 0.0 }
 0x30d   :  { %3851 = vpow2.f32 %v805_v62  ;;  %v3000_v15 = vadd.f32 -1.0, %v3836_v56  ;;  %vm774_vm8 = vcmp.gt.f32.partialorder %v4224_v47, 0.0  ;;  %vm775_vm9 = vcmp.gt.f32.partialorder %v4221_v46, 0.0 }
 0x30e   :  { %3426 = vmatprep.mubr.bf16.mxu0 %v863_v7  ;;  %3853 = vpow2.f32 %v807_v60  ;;  %v3838_v19 = vpop.eup %3837  ;;  %v845_v24 = vsel %vm765_vm15, %v4193_v17, %v2998_v11  ;;  %vm776_vm10 = vcmp.gt.f32.partialorder %v4232_v55, 0.0  ;;  %vm777_vm11 = vcmp.gt.f32.partialorder %v4235_v57, 0.0 }
 0x30f   :  { %3855 = vpow2.f32 %v809_v4  ;;  %v3001_v22 = vadd.f32 -1.0, %v3838_v19  ;;  %v847_v27 = vsel %vm767_vm14, %v4189_v12, %v3000_v15  ;;  %vm778_vm12 = vcmp.gt.f32.partialorder %v4241_v61, 0.0 }
 0x310   :  { %3857 = vpow2.f32 %v811_v8  ;;  %vm779_vm13 = vcmp.gt.f32.partialorder %v4245_v63, 0.0  ;;  %vm780_vm14 = vcmp.gt.f32.partialorder %v4253_v6, 0.0  ;;  %vm781_vm15 = vcmp.gt.f32.partialorder %v4257_v9, 0.0 }
 0x311   :  { %v3840_v21 = vpop.eup %3839  ;;  %3859 = vpow2.f32 %v813_v5  ;;  %v848_v29 = vsel %vm768_vm2, %v4196_v18, %v3001_v22  ;;  %v3756_v22 = vld [vmem:[%s2934_s19 + $0x28] sm:$0xff]  }
 0x312   :  { %v3842_v23 = vpop.eup %3841  ;;  %v2999_v25 = vadd.f32 -1.0, %v3840_v21  ;;  %3861 = vpow2.f32 %v815_v13  ;;  %v865_v35 = vpack.c.bf16 %v848_v29, %v847_v27  ;;  %v3755_v21 = vld [vmem:[%s2934_s19 + $0x20] sm:$0xff]  }
 0x313   :  { %v3844_v26 = vpop.eup %3843  ;;  %v3002_v30 = vadd.f32 -1.0, %v3842_v23  ;;  %3863 = vpow2.f32 %v817_v14  ;;  %v3757_v23 = vld [vmem:[%s2934_s19 + $0x30] sm:$0xff]  }
 0x314   :  { %v3846_v32 = vpop.eup %3845  ;;  %v846_v33 = vsel %vm766_vm1, %v4208_v40, %v2999_v25  ;;  %v3003_v37 = vadd.f32 -1.0, %v3844_v26  ;;  %3865 = vpow2.f32 %v819_v50  ;;  %vm782_vm1 = vcmp.gt.f32.partialorder %v4260_v10, 0.0  ;;  %v4323_v25 = vld [vmem:[%s2931_s23] ss:$0 sm:$0xff]  ;;  %s2946_s23 = sld [smem:[%s5187_s0 + %s4043_s20]]  }
 0x315   :  { %v3848_v17 = vpop.eup %3847  ;;  %v864_v31 = vpack.c.bf16 %v846_v33, %v845_v24  ;;  %v3004_v36 = vadd.f32 -1.0, %v3846_v32  ;;  %3867 = vpow2.f32 %v821_v20  ;;  %v849_v12 = vsel %vm769_vm3, %v4201_v28, %v3002_v30  ;;  %v3758_v24 = vld [vmem:[%s2934_s19 + $0x38] sm:$0xff]  }
 0x316   :  { %v3850_v38 = vpop.eup %3849  ;;  %v850_v18 = vsel %vm770_vm4, %v4211_v41, %v3003_v37  ;;  %v3005_v39 = vadd.f32 -1.0, %v3848_v17 }
 0x317   :  { %v3852_v40 = vpop.eup %3851  ;;  %3427 = vmatmul.mubr.bf16.vlgmr.msra.gmra.mrb[24].mxu0 %v864_v31  ;;  %v866_v42 = vpack.c.bf16 %v850_v18, %v849_v12  ;;  %v851_v45 = vsel %vm771_vm5, %v4204_v34, %v3004_v36  ;;  %v3006_v48 = vadd.f32 -1.0, %v3850_v38 }
 0x318   :  { %v3854_v49 = vpop.eup %3853  ;;  %3430 = vmatprep.mubr.bf16.mxu0 %v865_v35  ;;  %v852_v51 = vsel %vm772_vm6, %v4214_v43, %v3005_v39  ;;  %v3007_v52 = vadd.f32 -1.0, %v3852_v40 }
 0x319   :  { %v3856_v53 = vpop.eup %3855  ;;  %v867_v28 = vpack.c.bf16 %v852_v51, %v851_v45  ;;  %v3008_v41 = vadd.f32 -1.0, %v3854_v49  ;;  %v853_v58 = vsel %vm773_vm7, %v4217_v44, %v3006_v48 }
 0x31a   :  { %v3858_v54 = vpop.eup %3857  ;;  %v854_v59 = vsel %vm774_vm8, %v4224_v47, %v3007_v52  ;;  %v3009_v34 = vadd.f32 -1.0, %v3856_v53  ;;  %v3759_v53 = vld [vmem:[%s4335_s27] sm:$0xff]  }
 0x31b   :  { %v3860_v60 = vpop.eup %3859  ;;  %v868_v62 = vpack.c.bf16 %v854_v59, %v853_v58  ;;  %v855_v43 = vsel %vm775_vm9, %v4221_v46, %v3008_v41  ;;  %v3010_v1 = vadd.f32 -1.0, %v3858_v54  ;;  %3475 = vmatpush3.bf16.msra.mxu0 %v3759_v53  ;;  %v3760_v54 = vld [vmem:[%s4335_s27 + $0x8] sm:$0xff]  }
 0x31c   :  { %v3862_v2 = vpop.eup %3861  ;;  %v856_v3 = vsel %vm776_vm10, %v4232_v55, %v3009_v34  ;;  %v3011_v4 = vadd.f32 -1.0, %v3860_v60  ;;  %3476 = vmatprep.subr.bf16.mxu0 %v4015_v0 }
 0x31d   :  { %v3864_v7 = vpop.eup %3863  ;;  %v869_v8 = vpack.c.bf16 %v856_v3, %v855_v43  ;;  %v3012_v44 = vadd.f32 -1.0, %v3862_v2  ;;  %v857_v56 = vsel %vm777_vm11, %v4235_v57, %v3010_v1 }
 0x31e   :  { %v3866_v47 = vpop.eup %3865  ;;  %v858_v5 = vsel %vm778_vm12, %v4241_v61, %v3011_v4  ;;  %v3013_v46 = vadd.f32 -1.0, %v3864_v7 }
 0x31f   :  { %v3868_v11 = vpop.eup %3867  ;;  %3431 = vmatmul.mubr.bf16.gmra.mrb[28].mxu0 %v866_v42  ;;  %v870_v13 = vpack.c.bf16 %v858_v5, %v857_v56  ;;  %v859_v55 = vsel %vm779_vm13, %v4245_v63, %v3012_v44  ;;  %v3014_v14 = vadd.f32 -1.0, %v3866_v47  ;;  %v3751_v63 = vld [vmem:[%s2934_s19] sm:$0xff]  }
 0x320   :  { %3434 = vmatprep.mubr.bf16.mxu0 %v867_v28  ;;  %v860_v15 = vsel %vm780_vm14, %v4253_v6, %v3013_v46  ;;  %v3015_v19 = vadd.f32 -1.0, %v3868_v11  ;;  %3447 = vmatpush3.bf16.msra.mxu1 %v3751_v63  ;;  %v3752_v6 = vld [vmem:[%s2934_s19 + $0x8] sm:$0xff]  }
 0x321   :  { %v871_v57 = vpack.c.bf16 %v860_v15, %v859_v55  ;;  %v861_v61 = vsel %vm781_vm15, %v4257_v9, %v3014_v14  ;;  %3448 = vmatprep.subr.bf16.mxu1 %v4015_v0  ;;  %v3753_v9 = vld [vmem:[%s2934_s19 + $0x10] sm:$0xff]   ;;  %3477 = vmatpush3.bf16.msra.mxu0 %v3760_v54 }
 0x322   :  { %v862_v50 = vsel %vm782_vm1, %v4260_v10, %v3015_v19  ;;  %v3754_v10 = vld [vmem:[%s2934_s19 + $0x18] sm:$0xff]   ;;  %3478 = vmatprep.subr.bf16.mxu0 %v4015_v0  ;;  %s2945_s19 = sld [smem:[%s5187_s0 + %s4042_s16]]  }
 0x323   :  { %v872_v20 = vpack.c.bf16 %v862_v50, %v861_v61  ;;  %v3762_v50 = vld [vmem:[%s4335_s27 + $0x18] sm:$0xff]  }
 0x324   :  { %3449 = vmatpush3.bf16.msra.mxu1 %v3752_v6 }
 0x325   :  { %3450 = vmatprep.subr.bf16.mxu1 %v4015_v0 }
 0x327   :  { %3435 = vmatmul.mubr.bf16.gmra.mrb[32].mxu0 %v868_v62 }
 0x328   :  { %3438 = vmatprep.mubr.bf16.mxu0 %v869_v8  ;;  %3451 = vmatpush3.bf16.msra.mxu1 %v3753_v9  ;;  %v3761_v8 = vld [vmem:[%s4335_s27 + $0x10] sm:$0xff]  }
 0x329   :  { %3452 = vmatprep.subr.bf16.mxu1 %v4015_v0  ;;  %3479 = vmatpush3.bf16.msra.mxu0 %v3761_v8 }
 0x32a   :  { %3480 = vmatprep.subr.bf16.mxu0 %v4015_v0 }
 0x32c   :  { %3453 = vmatpush3.bf16.msra.mxu1 %v3754_v10 }
 0x32d   :  { %3454 = vmatprep.subr.bf16.mxu1 %v4015_v0  ;;  %3481 = vmatpush3.bf16.msra.mxu0 %v3762_v50 }
 0x32e   :  { %3482 = vmatprep.subr.bf16.mxu0 %v4015_v0 }
 0x32f   :  { %3439 = vmatmul.mubr.bf16.gmra.mrb[36].mxu0 %v870_v13 }
 0x330   :  { %3442 = vmatprep.mubr.bf16.mxu0 %v871_v57  ;;  %3455 = vmatpush3.bf16.msra.mxu1 %v3755_v21 }
 0x331   :  { %3456 = vmatprep.subr.bf16.mxu1 %v4015_v0 }
 0x334   :  { %3457 = vmatpush3.bf16.msra.mxu1 %v3756_v22 }
 0x335   :  { %3458 = vmatprep.subr.bf16.mxu1 %v4015_v0 }
 0x337   :  { %3443 = vmatmul.mubr.bf16.gmra.mrb[40].mxu0 %v872_v20 }
 0x338   :  { %3490 = vmatprep.mubr.msk.bf16.mxu0 %vm4017_vm0, %v4015_v0  ;;  %3459 = vmatpush3.bf16.msra.mxu1 %v3757_v23 }
 0x339   :  { %3460 = vmatprep.subr.bf16.mxu1 %v4015_v0 }
 0x33c   :  { %3461 = vmatpush3.bf16.msra.mxu1 %v3758_v24 }
 0x33d   :  { %3502 = vmatprep.subr.bf16.mxu1 %v4015_v0 }
 0x3ea   :  { %v3428_v26 = vpop.f32.mrb[24].mxu0 }
 0x3eb   :  { %v987_v27 = vadd.f32 %v3428_v26, %v4323_v25  ;;  %v978_v29 = vpop.f32.mrb[25].mxu0 }
 0x3ec   :  { %v979_v30 = vadd.f32 %v4323_v25, %v978_v29  ;;  %v3429_v32 = vpop.f32.mrb[26].mxu0 }
 0x3ed   :  { %v1081_v33 = vmul.f32 1.442695, %v987_v27  ;;  %v4328_v35 = vadd.f32 %v3429_v32, %v4323_v25  ;;  %v981_v37 = vpop.f32.mrb[27].mxu0  ;;  %vm1059_vm2 = vcmp.gt.f32.partialorder %v987_v27, 0.0 }
 0x3ee   :  { %v1077_v17 = vmul.f32 1.442695, %v979_v30  ;;  %v982_v31 = vadd.f32 %v4323_v25, %v981_v37  ;;  %vm1057_vm3 = vcmp.gt.f32.partialorder %v979_v30, 0.0 }
 0x3ef   :  { %3869 = vpow2.f32 %v1081_v33  ;;  %v1083_v36 = vmul.f32 1.442695, %v4328_v35  ;;  %vm1060_vm4 = vcmp.gt.f32.partialorder %v4328_v35, 0.0 }
 0x3f0   :  { %3871 = vpow2.f32 %v1077_v17  ;;  %v1079_v38 = vmul.f32 1.442695, %v982_v31  ;;  %vm1058_vm5 = vcmp.gt.f32.partialorder %v982_v31, 0.0 }
 0x3f1   :  { %3873 = vpow2.f32 %v1083_v36 }
 0x3f2   :  { %3875 = vpow2.f32 %v1079_v38  ;;  %v3432_v12 = vpop.f32.mrb[28].mxu0 }
 0x3f3   :  { %v4338_v18 = vadd.f32 %v3432_v12, %v4323_v25  ;;  %v994_v39 = vpop.f32.mrb[29].mxu0 }
 0x3f4   :  { %v4341_v40 = vadd.f32 %v4323_v25, %v994_v39  ;;  %v3433_v42 = vpop.f32.mrb[30].mxu0 }
 0x3f5   :  { %v1089_v45 = vmul.f32 1.442695, %v4338_v18  ;;  %v4345_v48 = vadd.f32 %v3433_v42, %v4323_v25  ;;  %v997_v49 = vpop.f32.mrb[31].mxu0  ;;  %vm1063_vm6 = vcmp.gt.f32.partialorder %v4338_v18, 0.0 }
 0x3f6   :  { %v1085_v51 = vmul.f32 1.442695, %v4341_v40  ;;  %v4349_v52 = vadd.f32 %v4323_v25, %v997_v49  ;;  %vm1061_vm7 = vcmp.gt.f32.partialorder %v4341_v40, 0.0 }
 0x3f7   :  { %3877 = vpow2.f32 %v1089_v45  ;;  %v1091_v28 = vmul.f32 1.442695, %v4345_v48  ;;  %vm1064_vm8 = vcmp.gt.f32.partialorder %v4345_v48, 0.0 }
 0x3f8   :  { %3879 = vpow2.f32 %v1085_v51  ;;  %v1087_v41 = vmul.f32 1.442695, %v4349_v52  ;;  %vm1062_vm9 = vcmp.gt.f32.partialorder %v4349_v52, 0.0 }
 0x3f9   :  { %v3870_v58 = vpop.eup %3869  ;;  %3881 = vpow2.f32 %v1091_v28 }
 0x3fa   :  { %v3872_v59 = vpop.eup %3871  ;;  %v3027_v34 = vadd.f32 -1.0, %v3870_v58  ;;  %3883 = vpow2.f32 %v1087_v41  ;;  %v3436_v60 = vpop.f32.mrb[32].mxu0 }
 0x3fb   :  { %v3874_v62 = vpop.eup %3873  ;;  %v3025_v43 = vadd.f32 -1.0, %v3872_v59  ;;  %v4357_v1 = vadd.f32 %v3436_v60, %v4323_v25  ;;  %v1010_v2 = vpop.f32.mrb[33].mxu0 }
 0x3fc   :  { %v3876_v3 = vpop.eup %3875  ;;  %v4360_v4 = vadd.f32 %v4323_v25, %v1010_v2  ;;  %v3437_v7 = vpop.f32.mrb[34].mxu0  ;;  %v3028_v47 = vadd.f32 -1.0, %v3874_v62  ;;  %v4368_v46 = vsel %vm1059_vm2, %v987_v27, %v3027_v34 }
 0x3fd   :  { %v4363_v44 = vsel %vm1057_vm3, %v979_v30, %v3025_v43  ;;  %v3026_v56 = vadd.f32 -1.0, %v3876_v3  ;;  %v1013_v5 = vpop.f32.mrb[35].mxu0  ;;  %v1097_v11 = vmul.f32 1.442695, %v4357_v1  ;;  %v4378_v15 = vadd.f32 %v3437_v7, %v4323_v25 }
 0x3fe   :  { %v1186_v13 = vmul.f32 %v4363_v44, %v4363_v44  ;;  %v1093_v14 = vmul.f32 1.442695, %v4360_v4  ;;  %v4385_v61 = vadd.f32 %v4323_v25, %v1013_v5  ;;  %v4391_v63 = vsel %vm1060_vm4, %v4328_v35, %v3028_v47 }
 0x3ff   :  { %v4374_v55 = vsel %vm1058_vm5, %v982_v31, %v3026_v56  ;;  %3885 = vpow2.f32 %v1097_v11  ;;  %v1099_v6 = vmul.f32 1.442695, %v4378_v15  ;;  %v1188_v10 = vmul.f32 %v4368_v46, %v4368_v46 }
 0x400   :  { %v1159_v19 = vadd.f32 %v4374_v55, %v4363_v44  ;;  %v1187_v57 = vmul.f32 %v4374_v55, %v4374_v55  ;;  %3887 = vpow2.f32 %v1093_v14  ;;  %v1095_v29 = vmul.f32 1.442695, %v4385_v61 }
 0x401   :  { %v3878_v20 = vpop.eup %3877  ;;  %3889 = vpow2.f32 %v1099_v6  ;;  %v1189_v35 = vmul.f32 %v4391_v63, %v4391_v63  ;;  %vm1065_vm10 = vcmp.gt.f32.partialorder %v4360_v4, 0.0  ;;  %vm1067_vm11 = vcmp.gt.f32.partialorder %v4357_v1, 0.0 }
 0x402   :  { %v3880_v9 = vpop.eup %3879  ;;  %v1160_v21 = vadd.f32 %v1159_v19, %v4368_v46  ;;  %v1206_v22 = vadd.f32 %v1187_v57, %v1186_v13  ;;  %v3031_v23 = vadd.f32 -1.0, %v3878_v20  ;;  %v3440_v24 = vpop.f32.mrb[36].mxu0  ;;  %3891 = vpow2.f32 %v1095_v29 }
 0x403   :  { %v3882_v26 = vpop.eup %3881  ;;  %v3029_v27 = vadd.f32 -1.0, %v3880_v9  ;;  %v4401_v30 = vadd.f32 %v3440_v24, %v4323_v25  ;;  %v1026_v32 = vpop.f32.mrb[37].mxu0  ;;  %vm1066_vm12 = vcmp.gt.f32.partialorder %v4385_v61, 0.0  ;;  %vm1068_vm13 = vcmp.gt.f32.partialorder %v4378_v15, 0.0 }
 0x404   :  { %v3884_v33 = vpop.eup %3883  ;;  %v1207_v37 = vadd.f32 %v1206_v22, %v1188_v10  ;;  %v1161_v17 = vadd.f32 %v1160_v21, %v4391_v63  ;;  %v3032_v31 = vadd.f32 -1.0, %v3882_v26  ;;  %v3441_v36 = vpop.f32.mrb[38].mxu0  ;;  %v4433_v59 = vadd.f32 %v4323_v25, %v1026_v32 }
 0x405   :  { %v4409_v38 = vsel %vm1061_vm7, %v4341_v40, %v3029_v27  ;;  %v3030_v12 = vadd.f32 -1.0, %v3884_v33  ;;  %v1029_v39 = vpop.f32.mrb[39].mxu0  ;;  %v4420_v40 = vsel %vm1063_vm6, %v4338_v18, %v3031_v23  ;;  %v1105_v28 = vmul.f32 1.442695, %v4401_v30 }
 0x406   :  { %v1162_v42 = vadd.f32 %v1161_v17, %v4409_v38  ;;  %v1190_v45 = vmul.f32 %v4409_v38, %v4409_v38  ;;  %v1208_v49 = vadd.f32 %v1207_v37, %v1189_v35  ;;  %v4423_v51 = vsel %vm1064_vm8, %v4345_v48, %v3032_v31 }
 0x407   :  { %v4426_v53 = vsel %vm1062_vm9, %v4349_v52, %v3030_v12  ;;  %v4436_v18 = vadd.f32 %v3441_v36, %v4323_v25  ;;  %v4439_v48 = vadd.f32 %v4323_v25, %v1029_v39  ;;  %v1192_v52 = vmul.f32 %v4420_v40, %v4420_v40 }
 0x408   :  { %v1209_v41 = vadd.f32 %v1208_v49, %v1190_v45  ;;  %v1163_v54 = vadd.f32 %v1162_v42, %v4426_v53  ;;  %v1191_v58 = vmul.f32 %v4426_v53, %v4426_v53  ;;  %v1101_v43 = vmul.f32 1.442695, %v4433_v59 }
 0x409   :  { %v3886_v34 = vpop.eup %3885  ;;  %v1193_v7 = vmul.f32 %v4423_v51, %v4423_v51  ;;  %3893 = vpow2.f32 %v1105_v28  ;;  %v1107_v8 = vmul.f32 1.442695, %v4436_v18  ;;  %v1103_v19 = vmul.f32 1.442695, %v4439_v48 }
 0x40a   :  { %v1164_v60 = vadd.f32 %v1163_v54, %v4420_v40  ;;  %v1210_v62 = vadd.f32 %v1209_v41, %v1191_v58  ;;  %v3444_v2 = vpop.f32.mrb[40].mxu0  ;;  %v3888_v3 = vpop.eup %3887  ;;  %3895 = vpow2.f32 %v1101_v43  ;;  %v3035_v20 = vadd.f32 -1.0, %v3886_v34 }
 0x40b   :  { %v1042_v47 = vpop.f32.mrb[41].mxu0  ;;  %v3033_v5 = vadd.f32 -1.0, %v3888_v3  ;;  %v3890_v14 = vpop.eup %3889  ;;  %3897 = vpow2.f32 %v1107_v8  ;;  %v4452_v57 = vadd.f32 %v3444_v2, %v4323_v25  ;;  %vm1069_vm14 = vcmp.gt.f32.partialorder %v4433_v59, 0.0 }
 0x40c   :  { %v1211_v56 = vadd.f32 %v1210_v62, %v1192_v52  ;;  %v1165_v11 = vadd.f32 %v1164_v60, %v4423_v51  ;;  %v3445_v13 = vpop.f32.mrb[42].mxu0  ;;  %v3892_v10 = vpop.eup %3891  ;;  %3899 = vpow2.f32 %v1103_v19  ;;  %v3036_v23 = vadd.f32 -1.0, %v3890_v14 }
 0x40d   :  { %v1045_v50 = vpop.f32.mrb[43].mxu0  ;;  %v4455_v6 = vsel %vm1065_vm10, %v4360_v4, %v3033_v5  ;;  %v3034_v24 = vadd.f32 -1.0, %v3892_v10  ;;  %v1113_v26 = vmul.f32 1.442695, %v4452_v57  ;;  %v1043_v27 = vadd.f32 %v4323_v25, %v1042_v47 }
 0x40e   :  { %v1212_v9 = vadd.f32 %v1211_v56, %v1193_v7  ;;  %v1166_v21 = vadd.f32 %v1165_v11, %v4455_v6  ;;  %v1194_v22 = vmul.f32 %v4455_v6, %v4455_v6  ;;  %v4465_v4 = vadd.f32 %v3445_v13, %v4323_v25 }
 0x40f   :  { %v4468_v32 = vadd.f32 %v4323_v25, %v1045_v50  ;;  %v4471_v33 = vsel %vm1067_vm11, %v4357_v1, %v3035_v20  ;;  %v4475_v35 = vsel %vm1066_vm12, %v4385_v61, %v3034_v24  ;;  %v1109_v37 = vmul.f32 1.442695, %v1043_v27 }
 0x410   :  { %v1213_v29 = vadd.f32 %v1212_v9, %v1194_v22  ;;  %v1167_v17 = vadd.f32 %v1166_v21, %v4475_v35  ;;  %v1195_v31 = vmul.f32 %v4475_v35, %v4475_v35  ;;  %3901 = vpow2.f32 %v1113_v26 }
 0x411   :  { %v1115_v36 = vmul.f32 1.442695, %v4465_v4  ;;  %v4482_v25 = vsel %vm1068_vm13, %v4378_v15, %v3036_v23  ;;  %3903 = vpow2.f32 %v1109_v37  ;;  %v1111_v1 = vmul.f32 1.442695, %v4468_v32 }
 0x412   :  { %v1196_v61 = vmul.f32 %v4471_v33, %v4471_v33  ;;  %v1168_v39 = vadd.f32 %v1167_v17, %v4471_v33  ;;  %v1214_v42 = vadd.f32 %v1213_v29, %v1195_v31  ;;  %v1197_v28 = vmul.f32 %v4482_v25, %v4482_v25 }
 0x413   :  { %v3894_v12 = vpop.eup %3893  ;;  %3905 = vpow2.f32 %v1115_v36  ;;  %vm1071_vm15 = vcmp.gt.f32.partialorder %v4401_v30, 0.0  ;;  %vm1070_vm1 = vcmp.gt.f32.partialorder %v4439_v48, 0.0  ;;  %vm1072_vm2 = vcmp.gt.f32.partialorder %v4436_v18, 0.0 }
 0x414   :  { %v3896_v45 = vpop.eup %3895  ;;  %3907 = vpow2.f32 %v1111_v1  ;;  %v1215_v41 = vadd.f32 %v1214_v42, %v1196_v61  ;;  %v1169_v54 = vadd.f32 %v1168_v39, %v4482_v25  ;;  %v3039_v58 = vadd.f32 -1.0, %v3894_v12 }
 0x415   :  { %v3898_v49 = vpop.eup %3897  ;;  %v3037_v15 = vadd.f32 -1.0, %v3896_v45  ;;  %vm1073_vm3 = vcmp.gt.f32.partialorder %v1043_v27, 0.0  ;;  %vm1074_vm4 = vcmp.gt.f32.partialorder %v4468_v32, 0.0  ;;  %vm1075_vm5 = vcmp.gt.f32.partialorder %v4452_v57, 0.0 }
 0x416   :  { %v3900_v34 = vpop.eup %3899  ;;  %v1216_v60 = vadd.f32 %v1215_v41, %v1197_v28  ;;  %v3040_v62 = vadd.f32 -1.0, %v3898_v49  ;;  %v4501_v7 = vsel %vm1071_vm15, %v4401_v30, %v3039_v58  ;;  %vm1076_vm6 = vcmp.gt.f32.partialorder %v4465_v4, 0.0 }
 0x417   :  { %v4493_v52 = vsel %vm1069_vm14, %v4433_v59, %v3037_v15  ;;  %v3038_v3 = vadd.f32 -1.0, %v3900_v34  ;;  %v1200_v30 = vmul.f32 %v4501_v7, %v4501_v7 }
 0x418   :  { %v1170_v43 = vadd.f32 %v1169_v54, %v4493_v52  ;;  %v1198_v2 = vmul.f32 %v4493_v52, %v4493_v52  ;;  %v4508_v56 = vsel %vm1072_vm2, %v4436_v18, %v3040_v62 }
 0x419   :  { %v4505_v59 = vsel %vm1070_vm1, %v4439_v48, %v3038_v3  ;;  %v1201_v9 = vmul.f32 %v4508_v56, %v4508_v56 }
 0x41a   :  { %v1217_v8 = vadd.f32 %v1216_v60, %v1198_v2  ;;  %v3902_v47 = vpop.eup %3901  ;;  %v1171_v5 = vadd.f32 %v1170_v43, %v4505_v59  ;;  %v1199_v11 = vmul.f32 %v4505_v59, %v4505_v59 }
 0x41b   :  { %v3904_v13 = vpop.eup %3903  ;;  %v3043_v18 = vadd.f32 -1.0, %v3902_v47 }
 0x41c   :  { %v1172_v19 = vadd.f32 %v1171_v5, %v4501_v7  ;;  %v1218_v50 = vadd.f32 %v1217_v8, %v1199_v11  ;;  %v3041_v20 = vadd.f32 -1.0, %v3904_v13 }
 0x41d   :  { %v3906_v14 = vpop.eup %3905  ;;  %v4528_v31 = vsel %vm1075_vm5, %v4452_v57, %v3043_v18 }
 0x41e   :  { %v3908_v48 = vpop.eup %3907  ;;  %v1219_v10 = vadd.f32 %v1218_v50, %v1200_v30  ;;  %v4518_v21 = vsel %vm1073_vm3, %v1043_v27, %v3041_v20  ;;  %v1173_v22 = vadd.f32 %v1172_v19, %v4508_v56  ;;  %v3044_v26 = vadd.f32 -1.0, %v3906_v14  ;;  %v1157_v14 = vld [vmem:[%s2932_s1] sm:$0x1]  ;;  %s2949_s1 = sld [smem:[%s5187_s0 + %s4045_s28]]  }
 0x41f   :  { %v3042_v23 = vadd.f32 -1.0, %v3908_v48  ;;  %v1202_v24 = vmul.f32 %v4518_v21, %v4518_v21  ;;  %v1204_v61 = vmul.f32 %v4528_v31, %v4528_v31  ;;  %v1158_v50 = vld [vmem:[%s2933_s5] sm:$0x1]  ;;  %s5165_s5 = sld [smem:[%s5187_s0 + %s4046_s2]]  }
 0x420   :  { %v1174_v29 = vadd.f32 %v1173_v22, %v4518_v21  ;;  %v1220_v37 = vadd.f32 %v1219_v10, %v1201_v9  ;;  %v4532_v12 = vsel %vm1076_vm6, %v4465_v4, %v3044_v26 }
 0x421   :  { %v1154_v17 = vsel %vm1074_vm4, %v4468_v32, %v3042_v23  ;;  %v1205_v32 = vmul.f32 %v4532_v12, %v4532_v12 }
 0x422   :  { %v1203_v27 = vmul.f32 %v1154_v17, %v1154_v17  ;;  %v1221_v36 = vadd.f32 %v1220_v37, %v1202_v24  ;;  %v1175_v1 = vadd.f32 %v1174_v29, %v1154_v17 }
 0x424   :  { %v1176_v39 = vadd.f32 %v1175_v1, %v4528_v31  ;;  %v1222_v42 = vadd.f32 %v1221_v36, %v1203_v27 }
 0x426   :  { %v1177_v57 = vadd.f32 %v1176_v39, %v4532_v12  ;;  %v1223_v45 = vadd.f32 %v1222_v42, %v1204_v61 }
 0x428   :  { %v1178_v49 = vrot.slane %v1177_v57, 4  ;;  %v1224_v28 = vadd.f32 %v1223_v45, %v1205_v32 }
 0x42a   :  { %v1179_v41 = vadd.f32 %v1178_v49, %v1177_v57  ;;  %v1225_v15 = vrot.slane %v1224_v28, 4 }
 0x42c   :  { %v1180_v54 = vrot.slane %v1179_v41, 2  ;;  %v1226_v58 = vadd.f32 %v1225_v15, %v1224_v28 }
 0x42e   :  { %v1181_v4 = vadd.f32 %v1180_v54, %v1179_v41  ;;  %v1227_v34 = vrot.slane %v1226_v58, 2 }
 0x430   :  { %v1182_v60 = vrot.slane %v1181_v4, 1  ;;  %v1228_v62 = vadd.f32 %v1227_v34, %v1226_v58 }
 0x432   :  { %v1183_v43 = vadd.f32 %v1182_v60, %v1181_v4  ;;  %v1229_v2 = vrot.slane %v1228_v62, 1 }
 0x434   :  { %v1185_v3 = vmul.f32 0.00625, %v1183_v43  ;;  %v1230_v8 = vadd.f32 %v1229_v2, %v1228_v62 }
 0x436   :  { %v1231_v47 = vmul.f32 0.00625, %v1230_v8  ;;  %v1232_v5 = vmul.f32 %v1185_v3, %v1185_v3 }
 0x438   :  { %v1233_v11 = vsub.f32 %v1231_v47, %v1232_v5 }
 0x43a   :  { %v1234_v13 = vadd.f32 1e-05, %v1233_v11 }
 0x43c   :  { %3909 = vrsqrt.f32 %v1234_v13 }
 0x446   :  { %v3910_v30 = vpop.eup %3909 }
 0x447   :  { %v1236_v19 = vmul.f32 %v3910_v30, %v1157_v14 }
 0x449   :  { %v1237_v20 = vmul.f32 %v1236_v19, %v1185_v3  ;;  %v1243_v48 = vrot.slane %v1236_v19, %v4157_v16 }
 0x44b   :  { %v1238_v9 = vsub.f32 %v1158_v50, %v1237_v20  ;;  %v1262_v18 = vmul.f32 %v1243_v48, %v1154_v17  ;;  %v1245_v10 = vmul.f32 %v1243_v48, %v4363_v44  ;;  %v1246_v22 = vmul.f32 %v1243_v48, %v4374_v55 }
 0x44c   :  { %v1247_v23 = vmul.f32 %v1243_v48, %v4368_v46  ;;  %v1248_v24 = vmul.f32 %v1243_v48, %v4391_v63  ;;  %v1249_v26 = vmul.f32 %v1243_v48, %v4409_v38  ;;  %v1250_v29 = vmul.f32 %v1243_v48, %v4426_v53 }
 0x44d   :  { %v1269_v37 = vrot.slane %v1238_v9, %v4157_v16  ;;  %v1251_v27 = vmul.f32 %v1243_v48, %v4420_v40  ;;  %v1252_v36 = vmul.f32 %v1243_v48, %v4423_v51  ;;  %v1253_v17 = vmul.f32 %v1243_v48, %v4455_v6 }
 0x44e   :  { %v1254_v44 = vmul.f32 %v1243_v48, %v4475_v35  ;;  %v1255_v55 = vmul.f32 %v1243_v48, %v4471_v33  ;;  %v1256_v46 = vmul.f32 %v1243_v48, %v4482_v25  ;;  %v1257_v63 = vmul.f32 %v1243_v48, %v4493_v52 }
 0x44f   :  { %v4561_v1 = vadd.f32 %v1269_v37, %v1262_v18  ;;  %v4563_v38 = vadd.f32 %v1269_v37, %v1245_v10  ;;  %v4565_v53 = vadd.f32 %v1269_v37, %v1246_v22  ;;  %v4567_v61 = vadd.f32 %v1269_v37, %v1247_v23 }
 0x450   :  { %v4569_v40 = vadd.f32 %v1269_v37, %v1248_v24  ;;  %v4571_v51 = vadd.f32 %v1269_v37, %v1249_v26  ;;  %v4573_v6 = vadd.f32 %v1269_v37, %v1250_v29  ;;  %v4575_v35 = vadd.f32 %v1269_v37, %v1251_v27 }
 0x451   :  { %v4577_v33 = vadd.f32 %v1269_v37, %v1252_v36  ;;  %v1291_v25 = vadd.f32 %v4565_v53, %v4563_v38  ;;  %v1258_v52 = vmul.f32 %v1243_v48, %v4505_v59  ;;  %v1259_v39 = vmul.f32 %v1243_v48, %v4501_v7 }
 0x452   :  { %v1294_v42 = vadd.f32 %v4573_v6, %v4571_v51  ;;  %v1260_v32 = vmul.f32 %v1243_v48, %v4508_v56  ;;  %v4586_v57 = vadd.f32 %v1269_v37, %v1253_v17  ;;  %v4588_v45 = vadd.f32 %v1269_v37, %v1254_v44 }
 0x453   :  { %v1292_v49 = vadd.f32 %v1291_v25, %v4567_v61  ;;  %v4591_v28 = vadd.f32 %v1269_v37, %v1255_v55  ;;  %v4593_v41 = vadd.f32 %v1269_v37, %v1256_v46  ;;  %v4595_v15 = vadd.f32 %v1269_v37, %v1257_v63  ;;  %v3763_v55 = vld [vmem:[%s4335_s27 + $0x20] sm:$0xff]   ;;  %v3764_v46 = vld [vmem:[%s4335_s27 + $0x28] sm:$0xff]   ;;  %v3765_v63 = vld [vmem:[%s4335_s27 + $0x30] sm:$0xff]  }
 0x454   :  { %v1295_v59 = vadd.f32 %v1294_v42, %v4575_v35  ;;  %v4598_v7 = vadd.f32 %v1269_v37, %v1258_v52  ;;  %v4600_v54 = vadd.f32 %v1269_v37, %v1259_v39  ;;  %v4602_v58 = vadd.f32 %v1269_v37, %v1260_v32  ;;  %3483 = vmatpush3.bf16.msra.mxu0 %v3763_v55  ;;  %v3766_v25 = vld [vmem:[%s4335_s27 + $0x38] sm:$0xff]   ;;  %v3045_v52 = vld [vmem:[%s2935_s9] ss:$0 sm:$0xff]  ;;  %s2947_s27 = sld [smem:[%s5187_s0 + %s4044_s24]]  }
 0x455   :  { %v1293_v56 = vadd.f32 %v1292_v49, %v4569_v40  ;;  %v1297_v4 = vadd.f32 %v4588_v45, %v4586_v57  ;;  %v1261_v34 = vmul.f32 %v1243_v48, %v4518_v21  ;;  %v1263_v60 = vmul.f32 %v1243_v48, %v4528_v31  ;;  %3484 = vmatprep.subr.bf16.mxu0 %v4015_v0 }
 0x456   :  { %v1296_v62 = vadd.f32 %v1295_v59, %v4577_v33  ;;  %v1300_v43 = vadd.f32 %v4598_v7, %v4595_v15  ;;  %v1264_v2 = vmul.f32 %v1243_v48, %v4532_v12  ;;  %v1922_v3 = vpack.c.bf16 %v4565_v53, %v4563_v38  ;;  %v3792_v38 = vld [vmem:[%s2944_s7 + $0x8] sm:$0xff]   ;;  %v3793_v53 = vld [vmem:[%s2944_s7 + $0x10] sm:$0xff]  }
 0x457   :  { %v1306_v8 = vmul.f32 0.2, %v1293_v56  ;;  %v1298_v47 = vadd.f32 %v1297_v4, %v4591_v28  ;;  %v4616_v5 = vadd.f32 %v1269_v37, %v1261_v34  ;;  %v4618_v11 = vadd.f32 %v1269_v37, %v1263_v60 }
 0x458   :  { %v1307_v21 = vmul.f32 0.2, %v1296_v62  ;;  %v1301_v31 = vadd.f32 %v1300_v43, %v4600_v54  ;;  %v4621_v13 = vadd.f32 %v1269_v37, %v1264_v2  ;;  %v1923_v14 = vpack.c.bf16 %v4569_v40, %v4567_v61  ;;  %3485 = vmatpush3.bf16.msra.mxu0 %v3764_v46  ;;  %v3795_v61 = vld [vmem:[%s2944_s7 + $0x20] sm:$0xff]   ;;  %v3796_v40 = vld [vmem:[%s2944_s7 + $0x28] sm:$0xff]  }
 0x459   :  { %v1299_v12 = vadd.f32 %v1298_v47, %v4593_v41  ;;  %v1303_v30 = vadd.f32 %v4561_v1, %v4616_v5  ;;  %v1924_v19 = vpack.c.bf16 %v4573_v6, %v4571_v51  ;;  %v1925_v50 = vpack.c.bf16 %v4577_v33, %v4575_v35  ;;  %3486 = vmatprep.subr.bf16.mxu0 %v4015_v0  ;;  %v3797_v51 = vld [vmem:[%s2944_s7 + $0x30] sm:$0xff]   ;;  %v3798_v6 = vld [vmem:[%s2944_s7 + $0x38] sm:$0xff]  }
 0x45a   :  { %v1311_v20 = vpack.c.bf16 %v1307_v21, %v1306_v8  ;;  %v1302_v48 = vadd.f32 %v1301_v31, %v4602_v58  ;;  %v1926_v9 = vpack.c.bf16 %v4588_v45, %v4586_v57  ;;  %v1927_v18 = vpack.c.bf16 %v4593_v41, %v4591_v28 }
 0x45b   :  { %v1308_v10 = vmul.f32 0.2, %v1299_v12  ;;  %v1304_v22 = vadd.f32 %v1303_v30, %v4618_v11  ;;  %v1928_v23 = vpack.c.bf16 %v4598_v7, %v4595_v15  ;;  %v1929_v24 = vpack.c.bf16 %v4602_v58, %v4600_v54 }
 0x45c   :  { %3463 = vmatmul.mubr.bf16.vlgmr.msra.gmra.mrb[24].mxu1 %v1311_v20  ;;  %v1309_v26 = vmul.f32 0.2, %v1302_v48  ;;  %v1930_v29 = vpack.c.bf16 %v4561_v1, %v4616_v5  ;;  %v1931_v37 = vpack.c.bf16 %v4621_v13, %v4618_v11  ;;  %3487 = vmatpush3.bf16.msra.mxu0 %v3765_v63  ;;  %v3794_v1 = vld [vmem:[%s2944_s7 + $0x18] sm:$0xff]  }
 0x45d   :  { %3466 = vmatprep.mubr.msk.bf16.mxu1 %vm4017_vm0, %v4015_v0  ;;  %v1305_v27 = vadd.f32 %v1304_v22, %v4621_v13  ;;  %3488 = vmatprep.subr.bf16.mxu0 %v4015_v0 }
 0x45e   :  { %v1312_v36 = vpack.c.bf16 %v1309_v26, %v1308_v10 }
 0x45f   :  { %v1310_v17 = vmul.f32 0.2, %v1305_v27 }
 0x460   :  { %3489 = vmatpush3.bf16.msra.mxu0 %v3766_v25 }
 0x461   :  { %v1313_v44 = vpack.c.bf16 %v1310_v17, %v1310_v17  ;;  %3530 = vmatprep.subr.bf16.mxu0 %v4015_v0 }
 0x464   :  { %3467 = vmatmul.mubr.bf16.gmra.mrb[28].mxu1 %v1312_v36 }
 0x465   :  { %3470 = vmatprep.mubr.msk.bf16.mxu1 %vm4017_vm0, %v4015_v0 }
 0x46c   :  { %3471 = vmatmul.mubr.bf16.gmra.mrb[32].mxu1 %v1313_v44 }
 0x46d   :  { %3518 = vmatprep.mubr.msk.bf16.mxu1 %vm4017_vm0, %v4015_v0 }
 0x52f   :  { %v1419_v39 = vpop.f32.mrb[24].mxu1 }
 0x530   :  { %v1420_v42 = vadd.f32 %v3045_v52, %v1419_v39  ;;  %v3464_v32 = vpop.f32.mrb[25].mxu1 }
 0x531   :  { %v1422_v49 = vpop.f32.mrb[26].mxu1 }
 0x532   :  { %v1446_v59 = vmul.f32 1.442695, %v1420_v42  ;;  %v1423_v56 = vadd.f32 %v3045_v52, %v1422_v49  ;;  %v3465_v4 = vpop.f32.mrb[27].mxu1  ;;  %vm1441_vm7 = vcmp.gt.f32.partialorder %v1420_v42, 0.0 }
 0x534   :  { %3911 = vpow2.f32 %v1446_v59  ;;  %v1448_v34 = vmul.f32 1.442695, %v1423_v56  ;;  %vm1442_vm8 = vcmp.gt.f32.partialorder %v1423_v56, 0.0 }
 0x536   :  { %3913 = vpow2.f32 %v1448_v34 }
 0x537   :  { %v1427_v60 = vpop.f32.mrb[28].mxu1 }
 0x538   :  { %v1428_v62 = vadd.f32 %v3045_v52, %v1427_v60  ;;  %v3468_v43 = vpop.f32.mrb[29].mxu1  ;;  %v3767_v60 = vld [vmem:[%s4673_s13] sm:$0xff]  }
 0x539   :  { %v1430_v2 = vpop.f32.mrb[30].mxu1  ;;  %3503 = vmatpush3.bf16.msra.mxu1 %v3767_v60  ;;  %v3769_v43 = vld [vmem:[%s4673_s13 + $0x8] sm:$0xff]  }
 0x53a   :  { %v1450_v8 = vmul.f32 1.442695, %v1428_v62  ;;  %v1431_v47 = vadd.f32 %v3045_v52, %v1430_v2  ;;  %v3469_v21 = vpop.f32.mrb[31].mxu1  ;;  %vm1443_vm9 = vcmp.gt.f32.partialorder %v1428_v62, 0.0  ;;  %3504 = vmatprep.subr.bf16.mxu1 %v4015_v0  ;;  %v3770_v2 = vld [vmem:[%s4678_s17 + $0x8] sm:$0xff]  }
 0x53b   :  { %v3773_v21 = vld [vmem:[%s4673_s13 + $0x18] sm:$0xff]  }
 0x53c   :  { %3915 = vpow2.f32 %v1450_v8  ;;  %v1452_v31 = vmul.f32 1.442695, %v1431_v47  ;;  %vm1444_vm10 = vcmp.gt.f32.partialorder %v1431_v47, 0.0  ;;  %v3771_v8 = vld [vmem:[%s4673_s13 + $0x10] sm:$0xff]  }
 0x53d   :  { %3505 = vmatpush3.bf16.msra.mxu1 %v3769_v43 }
 0x53e   :  { %v3912_v12 = vpop.eup %3911  ;;  %3917 = vpow2.f32 %v1452_v31  ;;  %3506 = vmatprep.subr.bf16.mxu1 %v4015_v0  ;;  %v3774_v31 = vld [vmem:[%s4678_s17 + $0x18] sm:$0xff]  }
 0x53f   :  { %v3054_v30 = vadd.f32 -1.0, %v3912_v12  ;;  %v1435_v20 = vpop.f32.mrb[32].mxu1  ;;  %v3775_v12 = vld [vmem:[%s4673_s13 + $0x20] sm:$0xff]  }
 0x540   :  { %v3914_v48 = vpop.eup %3913  ;;  %v1436_v10 = vadd.f32 %v3045_v52, %v1435_v20  ;;  %v3472_v22 = vpop.f32.mrb[33].mxu1  ;;  %v3777_v20 = vld [vmem:[%s4673_s13 + $0x28] sm:$0xff]  }
 0x541   :  { %v3055_v26 = vadd.f32 -1.0, %v3914_v48  ;;  %v1438_v27 = vpop.f32.mrb[34].mxu1  ;;  %v1461_v44 = vsel %vm1441_vm7, %v1420_v42, %v3054_v30  ;;  %3507 = vmatpush3.bf16.msra.mxu1 %v3771_v8  ;;  %v3776_v30 = vld [vmem:[%s4678_s17 + $0x20] sm:$0xff]   ;;  %v3778_v48 = vld [vmem:[%s4678_s17 + $0x28] sm:$0xff]   ;;  %v3780_v22 = vld [vmem:[%s4678_s17 + $0x30] sm:$0xff]  }
 0x542   :  { %v1454_v36 = vmul.f32 1.442695, %v1436_v10  ;;  %v3473_v17 = vpop.f32.mrb[35].mxu1  ;;  %vm1445_vm11 = vcmp.gt.f32.partialorder %v1436_v10, 0.0  ;;  %3508 = vmatprep.subr.bf16.mxu1 %v4015_v0  ;;  %v3782_v27 = vld [vmem:[%s4678_s17 + $0x38] sm:$0xff]  }
 0x543   :  { %v1462_v55 = vsel %vm1442_vm8, %v1423_v56, %v3055_v26  ;;  %v3781_v26 = vld [vmem:[%s4673_s13 + $0x38] sm:$0xff]   ;;  %v3059_v17 = vld [vmem:[%s2937_s25] ss:$0 sm:$0xff] }
 0x544   :  { %v1466_v46 = vpack.c.bf16 %v1462_v55, %v1461_v44  ;;  %3919 = vpow2.f32 %v1454_v36  ;;  %v4714_v36 = vld [vmem:[%s4704_s21] sm:$0xff]  }
 0x545   :  { %3509 = vmatpush3.bf16.msra.mxu1 %v3773_v21 }
 0x546   :  { %v3916_v63 = vpop.eup %3915  ;;  %3491 = vmatmul.mubr.bf16.vlgmr.msra.gmra.mrb[44].mxu0 %v1466_v46  ;;  %3510 = vmatprep.subr.bf16.mxu1 %v4015_v0 }
 0x547   :  { %v3056_v25 = vadd.f32 -1.0, %v3916_v63  ;;  %3494 = vmatprep.mubr.msk.bf16.mxu0 %vm4017_vm0, %v4015_v0 }
 0x548   :  { %v3918_v39 = vpop.eup %3917 }
 0x549   :  { %v3057_v32 = vadd.f32 -1.0, %v3918_v39  ;;  %v1463_v52 = vsel %vm1443_vm9, %v1428_v62, %v3056_v25  ;;  %v3768_v62 = vld [vmem:[%s4678_s17] sm:$0xff]   ;;  %3511 = vmatpush3.bf16.msra.mxu1 %v3775_v12 }
 0x54a   :  { %3531 = vmatpush3.bf16.msra.mxu0 %v3768_v62  ;;  %3512 = vmatprep.subr.bf16.mxu1 %v4015_v0 }
 0x54b   :  { %v1464_v49 = vsel %vm1444_vm10, %v1431_v47, %v3057_v32  ;;  %3532 = vmatprep.subr.bf16.mxu0 %v4015_v0  ;;  %v3772_v47 = vld [vmem:[%s4678_s17 + $0x10] sm:$0xff]  }
 0x54c   :  { %v1467_v59 = vpack.c.bf16 %v1464_v49, %v1463_v52 }
 0x54d   :  { %3513 = vmatpush3.bf16.msra.mxu1 %v3777_v20 }
 0x54e   :  { %v3920_v4 = vpop.eup %3919  ;;  %3495 = vmatmul.mubr.bf16.gmra.mrb[48].mxu0 %v1467_v59  ;;  %3514 = vmatprep.subr.bf16.mxu1 %v4015_v0 }
 0x54f   :  { %v3058_v34 = vadd.f32 -1.0, %v3920_v4  ;;  %3498 = vmatprep.mubr.msk.bf16.mxu0 %vm4017_vm0, %v4015_v0  ;;  %3533 = vmatpush3.bf16.msra.mxu0 %v3770_v2 }
 0x550   :  { %3534 = vmatprep.subr.bf16.mxu0 %v4015_v0 }
 0x551   :  { %v1465_v42 = vsel %vm1445_vm11, %v1436_v10, %v3058_v34  ;;  %v3779_v10 = vld [vmem:[%s4673_s13 + $0x30] sm:$0xff]  }
 0x552   :  { %v1468_v56 = vpack.c.bf16 %v1465_v42, %v1465_v42  ;;  %3515 = vmatpush3.bf16.msra.mxu1 %v3779_v10 }
 0x553   :  { %3535 = vmatpush3.bf16.msra.mxu0 %v3772_v47  ;;  %3516 = vmatprep.subr.bf16.mxu1 %v4015_v0 }
 0x554   :  { %3536 = vmatprep.subr.bf16.mxu0 %v4015_v0 }
 0x556   :  { %3499 = vmatmul.mubr.bf16.gmra.mrb[52].mxu0 %v1468_v56  ;;  %3517 = vmatpush3.bf16.msra.mxu1 %v3781_v26 }
 0x557   :  { %3546 = vmatprep.mubr.msk.bf16.mxu0 %vm4017_vm0, %v4015_v0  ;;  %3537 = vmatpush3.bf16.msra.mxu0 %v3774_v31 }
 0x558   :  { %3538 = vmatprep.subr.bf16.mxu0 %v4015_v0  ;;  %3558 = vmatprep.subr.bf16.mxu1 %v4714_v36 }
 0x55b   :  { %3539 = vmatpush3.bf16.msra.mxu0 %v3776_v30 }
 0x55c   :  { %3540 = vmatprep.subr.bf16.mxu0 %v4015_v0 }
 0x55f   :  { %3541 = vmatpush3.bf16.msra.mxu0 %v3778_v48 }
 0x560   :  { %3542 = vmatprep.subr.bf16.mxu0 %v4015_v0 }
 0x563   :  { %3543 = vmatpush3.bf16.msra.mxu0 %v3780_v22 }
 0x564   :  { %3544 = vmatprep.subr.bf16.mxu0 %v4015_v0 }
 0x567   :  { %3545 = vmatpush3.bf16.msra.mxu0 %v3782_v27 }
 0x619   :  { %v1574_v44 = vpop.f32.mrb[44].mxu0 }
 0x61a   :  { %v1575_v55 = vadd.f32 %v3059_v17, %v1574_v44  ;;  %v3492_v46 = vpop.f32.mrb[45].mxu0 }
 0x61b   :  { %v1577_v63 = vpop.f32.mrb[46].mxu0 }
 0x61c   :  { %v1601_v25 = vmul.f32 1.442695, %v1575_v55  ;;  %v1578_v39 = vadd.f32 %v3059_v17, %v1577_v63  ;;  %v3493_v32 = vpop.f32.mrb[47].mxu0  ;;  %vm1596_vm12 = vcmp.gt.f32.partialorder %v1575_v55, 0.0 }
 0x61e   :  { %3921 = vpow2.f32 %v1601_v25  ;;  %v1603_v52 = vmul.f32 1.442695, %v1578_v39  ;;  %vm1597_vm13 = vcmp.gt.f32.partialorder %v1578_v39, 0.0 }
 0x620   :  { %3923 = vpow2.f32 %v1603_v52 }
 0x621   :  { %v1582_v49 = vpop.f32.mrb[48].mxu0 }
 0x622   :  { %v1583_v59 = vadd.f32 %v3059_v17, %v1582_v49  ;;  %v3496_v4 = vpop.f32.mrb[49].mxu0 }
 0x623   :  { %v1585_v34 = vpop.f32.mrb[50].mxu0 }
 0x624   :  { %v1605_v42 = vmul.f32 1.442695, %v1583_v59  ;;  %v1586_v56 = vadd.f32 %v3059_v17, %v1585_v34  ;;  %v3497_v60 = vpop.f32.mrb[51].mxu0  ;;  %vm1598_vm14 = vcmp.gt.f32.partialorder %v1583_v59, 0.0 }
 0x626   :  { %3925 = vpow2.f32 %v1605_v42  ;;  %v1607_v62 = vmul.f32 1.442695, %v1586_v56  ;;  %vm1599_vm15 = vcmp.gt.f32.partialorder %v1586_v56, 0.0 }
 0x628   :  { %v3922_v43 = vpop.eup %3921  ;;  %3927 = vpow2.f32 %v1607_v62 }
 0x629   :  { %v3068_v2 = vadd.f32 -1.0, %v3922_v43  ;;  %v1590_v8 = vpop.f32.mrb[52].mxu0 }
 0x62a   :  { %v3924_v47 = vpop.eup %3923  ;;  %v1591_v21 = vadd.f32 %v3059_v17, %v1590_v8  ;;  %v3500_v31 = vpop.f32.mrb[53].mxu0 }
 0x62b   :  { %v1616_v12 = vsel %vm1596_vm12, %v1575_v55, %v3068_v2  ;;  %v3069_v30 = vadd.f32 -1.0, %v3924_v47  ;;  %v1593_v20 = vpop.f32.mrb[54].mxu0 }
 0x62c   :  { %v1609_v48 = vmul.f32 1.442695, %v1591_v21  ;;  %v3501_v10 = vpop.f32.mrb[55].mxu0  ;;  %v1634_v26 = vmul.f32 %v1616_v12, %v1616_v12  ;;  %vm1600_vm1 = vcmp.gt.f32.partialorder %v1591_v21, 0.0 }
 0x62d   :  { %v1617_v22 = vsel %vm1597_vm13, %v1578_v39, %v3069_v30 }
 0x62e   :  { %v1623_v27 = vadd.f32 %v1617_v22, %v1616_v12  ;;  %v1635_v44 = vmul.f32 %v1617_v22, %v1617_v22  ;;  %3929 = vpow2.f32 %v1609_v48 }
 0x630   :  { %v3926_v46 = vpop.eup %3925  ;;  %v1639_v63 = vadd.f32 %v1635_v44, %v1634_v26 }
 0x631   :  { %v3070_v25 = vadd.f32 -1.0, %v3926_v46 }
 0x632   :  { %v3928_v32 = vpop.eup %3927 }
 0x633   :  { %v1618_v52 = vsel %vm1598_vm14, %v1583_v59, %v3070_v25  ;;  %v3071_v49 = vadd.f32 -1.0, %v3928_v32 }
 0x634   :  { %v1624_v17 = vadd.f32 %v1623_v27, %v1618_v52  ;;  %v1636_v4 = vmul.f32 %v1618_v52, %v1618_v52 }
 0x635   :  { %v1619_v55 = vsel %vm1599_vm15, %v1586_v56, %v3071_v49 }
 0x636   :  { %v1640_v34 = vadd.f32 %v1639_v63, %v1636_v4  ;;  %v1625_v42 = vadd.f32 %v1624_v17, %v1619_v55  ;;  %v1637_v60 = vmul.f32 %v1619_v55, %v1619_v55 }
 0x638   :  { %v3930_v62 = vpop.eup %3929  ;;  %v1641_v39 = vadd.f32 %v1640_v34, %v1637_v60  ;;  %v1621_v34 = vld [vmem:[%s2938_s29] sm:$0x1] }
 0x639   :  { %v3072_v43 = vadd.f32 -1.0, %v3930_v62  ;;  %v1622_v62 = vld [vmem:[%s2939_s3] sm:$0x1] }
 0x63b   :  { %v1620_v2 = vsel %vm1600_vm1, %v1591_v21, %v3072_v43 }
 0x63c   :  { %v1626_v8 = vadd.f32 %v1625_v42, %v1620_v2  ;;  %v1638_v47 = vmul.f32 %v1620_v2, %v1620_v2 }
 0x63e   :  { %v1627_v31 = vrot.slane %v1626_v8, 4  ;;  %v1642_v30 = vadd.f32 %v1641_v39, %v1638_v47 }
 0x640   :  { %v1628_v20 = vadd.f32 %v1627_v31, %v1626_v8  ;;  %v1643_v48 = vrot.slane %v1642_v30, 4 }
 0x642   :  { %v1629_v59 = vrot.slane %v1628_v20, 2  ;;  %v1644_v10 = vadd.f32 %v1643_v48, %v1642_v30 }
 0x644   :  { %v1630_v26 = vadd.f32 %v1629_v59, %v1628_v20  ;;  %v1645_v27 = vrot.slane %v1644_v10, 2 }
 0x646   :  { %v1631_v44 = vrot.slane %v1630_v26, 1  ;;  %v1646_v56 = vadd.f32 %v1645_v27, %v1644_v10 }
 0x648   :  { %v1632_v46 = vadd.f32 %v1631_v44, %v1630_v26  ;;  %v1647_v63 = vrot.slane %v1646_v56, 1 }
 0x64a   :  { %v1633_v25 = vmul.f32 0.025, %v1632_v46  ;;  %v1648_v32 = vadd.f32 %v1647_v63, %v1646_v56  ;;  %v3784_v63 = vld [vmem:[%s4704_s21 + $0x8] sm:$0xff]  }
 0x64c   :  { %v1649_v49 = vmul.f32 0.025, %v1648_v32  ;;  %v1650_v17 = vmul.f32 %v1633_v25, %v1633_v25  ;;  %v3790_v32 = vld [vmem:[%s4704_s21 + $0x38] sm:$0xff]  }
 0x64e   :  { %v1651_v4 = vsub.f32 %v1649_v49, %v1650_v17 }
 0x650   :  { %v1652_v21 = vadd.f32 1e-05, %v1651_v4 }
 0x652   :  { %3931 = vrsqrt.f32 %v1652_v21 }
 0x65c   :  { %v3932_v42 = vpop.eup %3931 }
 0x65d   :  { %v1654_v60 = vmul.f32 %v3932_v42, %v1621_v34 }
 0x65f   :  { %v1655_v39 = vmul.f32 %v1654_v60, %v1633_v25  ;;  %v1661_v43 = vrot.slane %v1654_v60, %v4157_v16 }
 0x661   :  { %v1656_v8 = vsub.f32 %v1622_v62, %v1655_v39  ;;  %v1663_v47 = vmul.f32 %v1661_v43, %v1616_v12  ;;  %v1664_v31 = vmul.f32 %v1661_v43, %v1617_v22  ;;  %v1665_v30 = vmul.f32 %v1661_v43, %v1618_v52  ;;  %v3785_v12 = vld [vmem:[%s4704_s21 + $0x10] sm:$0xff]   ;;  %v3786_v22 = vld [vmem:[%s4704_s21 + $0x18] sm:$0xff]  }
 0x662   :  { %v1666_v20 = vmul.f32 %v1661_v43, %v1619_v55  ;;  %v1667_v48 = vmul.f32 %v1661_v43, %v1620_v2  ;;  %v3788_v55 = vld [vmem:[%s4704_s21 + $0x28] sm:$0xff]   ;;  %v3789_v2 = vld [vmem:[%s4704_s21 + $0x30] sm:$0xff]  }
 0x663   :  { %v1672_v59 = vrot.slane %v1656_v8, %v4157_v16 }
 0x665   :  { %v1674_v10 = vadd.f32 %v1672_v59, %v1663_v47  ;;  %v1675_v26 = vadd.f32 %v1672_v59, %v1664_v31  ;;  %v1676_v27 = vadd.f32 %v1672_v59, %v1665_v30  ;;  %v1677_v44 = vadd.f32 %v1672_v59, %v1666_v20 }
 0x666   :  { %v1678_v56 = vadd.f32 %v1672_v59, %v1667_v48 }
 0x667   :  { %v1679_v46 = vpack.c.bf16 %v1675_v26, %v1674_v10  ;;  %v1680_v25 = vpack.c.bf16 %v1677_v44, %v1676_v27 }
 0x668   :  { %v1681_v52 = vpack.c.bf16 %v1678_v56, %v1678_v56 }
 0x669   :  { %3519 = vmatmul.mubr.bf16.vlgmr.msra.gmra.mrb[36].mxu1 %v1679_v46  ;;  %3547 = vmatmul.mubr.bf16.vlgmr.msra.gmra.mrb[56].mxu0 %v1679_v46  ;;  %v4806_v46 = vld [vmem:[%s2943_s11] ss:$0 sm:$0xff] }
 0x66a   :  { %3559 = vmatpush3.bf16.msra.mxu1 %v4714_v36  ;;  %3522 = vmatprep.mubr.msk.bf16.mxu1 %vm4017_vm0, %v4015_v0  ;;  %v3787_v36 = vld [vmem:[%s4704_s21 + $0x20] sm:$0xff]  }
 0x66b   :  { %3560 = vmatprep.subr.bf16.mxu1 %v3784_v63  ;;  %3550 = vmatprep.mubr.msk.bf16.mxu0 %vm4017_vm0, %v4015_v0 }
 0x66e   :  { %3561 = vmatpush3.bf16.msra.mxu1 %v3784_v63 }
 0x66f   :  { %3562 = vmatprep.subr.bf16.mxu1 %v3785_v12 }
 0x671   :  { %3523 = vmatmul.mubr.bf16.gmra.mrb[40].mxu1 %v1680_v25  ;;  %3551 = vmatmul.mubr.bf16.gmra.mrb[60].mxu0 %v1680_v25 }
 0x672   :  { %3563 = vmatpush3.bf16.msra.mxu1 %v3785_v12  ;;  %3526 = vmatprep.mubr.msk.bf16.mxu1 %vm4017_vm0, %v4015_v0 }
 0x673   :  { %3564 = vmatprep.subr.bf16.mxu1 %v3786_v22  ;;  %3554 = vmatprep.mubr.msk.bf16.mxu0 %vm4017_vm0, %v4015_v0  ;;  %v3791_v0 = vld [vmem:[%s2944_s7] sm:$0xff]  }
 0x674   :  { %3594 = vmatprep.subr.bf16.mxu0 %v3791_v0 }
 0x675   :  { %3595 = vmatpush3.bf16.msra.mxu0 %v3791_v0 }
 0x676   :  { %3565 = vmatpush3.bf16.msra.mxu1 %v3786_v22  ;;  %3596 = vmatprep.subr.bf16.mxu0 %v3792_v38 }
 0x677   :  { %3566 = vmatprep.subr.bf16.mxu1 %v3787_v36 }
 0x679   :  { %3527 = vmatmul.mubr.bf16.gmra.mrb[44].mxu1 %v1681_v52  ;;  %3555 = vmatmul.mubr.bf16.gmra.mrb[64].mxu0 %v1681_v52 }
 0x67a   :  { %3567 = vmatpush3.bf16.msra.mxu1 %v3787_v36  ;;  %3574 = vmatprep.mubr.bf16.mxu1 %v1922_v3 }
 0x67b   :  { %3568 = vmatprep.subr.bf16.mxu1 %v3788_v55  ;;  %3597 = vmatpush3.bf16.msra.mxu0 %v3792_v38 }
 0x67c   :  { %3598 = vmatprep.subr.bf16.mxu0 %v3793_v53 }
 0x67e   :  { %3569 = vmatpush3.bf16.msra.mxu1 %v3788_v55 }
 0x67f   :  { %3570 = vmatprep.subr.bf16.mxu1 %v3789_v2  ;;  %3599 = vmatpush3.bf16.msra.mxu0 %v3793_v53 }
 0x680   :  { %3600 = vmatprep.subr.bf16.mxu0 %v3794_v1 }
 0x682   :  { %3571 = vmatpush3.bf16.msra.mxu1 %v3789_v2 }
 0x683   :  { %3572 = vmatprep.subr.bf16.mxu1 %v3790_v32  ;;  %3601 = vmatpush3.bf16.msra.mxu0 %v3794_v1 }
 0x684   :  { %3602 = vmatprep.subr.bf16.mxu0 %v3795_v61 }
 0x686   :  { %3573 = vmatpush3.bf16.msra.mxu1 %v3790_v32 }
 0x687   :  { %3603 = vmatpush3.bf16.msra.mxu0 %v3795_v61 }
 0x688   :  { %3604 = vmatprep.subr.bf16.mxu0 %v3796_v40 }
 0x689   :  { %3575 = vmatmul.mubr.bf16.vlgmr.msra.gmra.mrb[48].mxu1 %v1923_v14 }
 0x68a   :  { %3578 = vmatprep.mubr.bf16.mxu1 %v1924_v19 }
 0x68b   :  { %3605 = vmatpush3.bf16.msra.mxu0 %v3796_v40 }
 0x68c   :  { %3606 = vmatprep.subr.bf16.mxu0 %v3797_v51 }
 0x68f   :  { %3607 = vmatpush3.bf16.msra.mxu0 %v3797_v51 }
 0x690   :  { %3608 = vmatprep.subr.bf16.mxu0 %v3798_v6 }
 0x691   :  { %3579 = vmatmul.mubr.bf16.gmra.mrb[52].mxu1 %v1925_v50 }
 0x692   :  { %3582 = vmatprep.mubr.bf16.mxu1 %v1926_v9 }
 0x693   :  { %3609 = vmatpush3.bf16.msra.mxu0 %v3798_v6 }
 0x699   :  { %3583 = vmatmul.mubr.bf16.gmra.mrb[56].mxu1 %v1927_v18 }
 0x69a   :  { %3586 = vmatprep.mubr.bf16.mxu1 %v1928_v23 }
 0x6a1   :  { %3587 = vmatmul.mubr.bf16.gmra.mrb[60].mxu1 %v1929_v24 }
 0x6a2   :  { %3590 = vmatprep.mubr.bf16.mxu1 %v1930_v29 }
 0x6a9   :  { %3591 = vmatmul.mubr.bf16.gmra.mrb[64].mxu1 %v1931_v37 }
 0x73c   :  { %v1780_v35 = vpop.f32.mrb[36].mxu1  ;;  %v1900_v33 = vpop.f32.mrb[56].mxu0 }
 0x73d   :  { %v3520_v57 = vpop.f32.mrb[37].mxu1  ;;  %v3548_v45 = vpop.f32.mrb[57].mxu0 }
 0x73e   :  { %v1783_v28 = vpop.f32.mrb[38].mxu1  ;;  %v1903_v41 = vpop.f32.mrb[58].mxu0 }
 0x73f   :  { %v3521_v15 = vpop.f32.mrb[39].mxu1  ;;  %v3549_v7 = vpop.f32.mrb[59].mxu0  ;;  %v2109_v54 = vadd.f32 %v1903_v41, %v1780_v35  ;;  %v2113_v58 = vadd.f32 %v1900_v33, %v1783_v28 }
 0x744   :  { %v1788_v3 = vpop.f32.mrb[40].mxu1  ;;  %v1908_v5 = vpop.f32.mrb[60].mxu0 }
 0x745   :  { %v3524_v11 = vpop.f32.mrb[41].mxu1  ;;  %v3552_v13 = vpop.f32.mrb[61].mxu0  ;;  %v2110_v14 = vadd.f32 %v1908_v5, %v1780_v35  ;;  %v2114_v19 = vadd.f32 %v1908_v5, %v1783_v28  ;;  %v4779_v50 = vadd.f32 %v1900_v33, %v1788_v3  ;;  %v4781_v9 = vadd.f32 %v1903_v41, %v1788_v3 }
 0x746   :  { %v1791_v18 = vpop.f32.mrb[42].mxu1  ;;  %v1911_v23 = vpop.f32.mrb[62].mxu0 }
 0x747   :  { %v3525_v24 = vpop.f32.mrb[43].mxu1  ;;  %v3553_v29 = vpop.f32.mrb[63].mxu0  ;;  %v2111_v37 = vadd.f32 %v1911_v23, %v1780_v35  ;;  %v2115_v49 = vadd.f32 %v1911_v23, %v1783_v28  ;;  %v4783_v17 = vadd.f32 %v1911_v23, %v1788_v3  ;;  %v4785_v4 = vadd.f32 %v1908_v5, %v1791_v18 }
 0x748   :  { %v4787_v21 = vadd.f32 %v1900_v33, %v1791_v18  ;;  %v4789_v34 = vadd.f32 %v1903_v41, %v1791_v18 }
 0x74c   :  { %v1796_v42 = vpop.f32.mrb[44].mxu1  ;;  %v1916_v60 = vpop.f32.mrb[64].mxu0 }
 0x74d   :  { %v3528_v62 = vpop.f32.mrb[45].mxu1  ;;  %v3556_v39 = vpop.f32.mrb[65].mxu0  ;;  %v2112_v43 = vadd.f32 %v1916_v60, %v1780_v35  ;;  %v2116_v8 = vadd.f32 %v1916_v60, %v1783_v28  ;;  %v4791_v47 = vadd.f32 %v1916_v60, %v1788_v3  ;;  %v4793_v31 = vadd.f32 %v1916_v60, %v1791_v18 }
 0x74e   :  { %v1799_v30 = vpop.f32.mrb[46].mxu1  ;;  %v1919_v20 = vpop.f32.mrb[66].mxu0  ;;  %v4795_v48 = vadd.f32 %v1908_v5, %v1796_v42  ;;  %v4797_v59 = vadd.f32 %v1900_v33, %v1796_v42  ;;  %v4799_v10 = vadd.f32 %v1911_v23, %v1796_v42  ;;  %v4801_v26 = vadd.f32 %v1903_v41, %v1796_v42 }
 0x74f   :  { %v3529_v27 = vpop.f32.mrb[47].mxu1  ;;  %v3557_v44 = vpop.f32.mrb[67].mxu0 }
 0x75c   :  { %v3576_v56 = vpop.f32.mrb[48].mxu1 }
 0x75d   :  { %v2131_v63 = vadd.f32 %v3576_v56, %v2111_v37  ;;  %v2030_v25 = vpop.f32.mrb[49].mxu1 }
 0x75e   :  { %v2129_v12 = vadd.f32 %v2109_v54, %v2030_v25  ;;  %v3577_v22 = vpop.f32.mrb[50].mxu1 }
 0x75f   :  { %v2158_v36 = vadd.f32 %v4806_v46, %v2131_v63  ;;  %v2132_v52 = vadd.f32 %v3577_v22, %v2112_v43  ;;  %v2033_v55 = vpop.f32.mrb[51].mxu1 }
 0x760   :  { %v4810_v2 = vadd.f32 %v4806_v46, %v2129_v12  ;;  %v2130_v32 = vadd.f32 %v2110_v14, %v2033_v55 }
 0x761   :  { %v2200_v0 = vmul.f32 1.442695, %v2158_v36  ;;  %v2159_v38 = vadd.f32 %v4806_v46, %v2132_v52  ;;  %vm2178_vm0 = vcmp.gt.f32.partialorder %v2158_v36, 0.0 }
 0x762   :  { %v2196_v53 = vmul.f32 1.442695, %v4810_v2  ;;  %v4815_v1 = vadd.f32 %v4806_v46, %v2130_v32  ;;  %vm2176_vm3 = vcmp.gt.f32.partialorder %v4810_v2, 0.0 }
 0x763   :  { %3933 = vpow2.f32 %v2200_v0  ;;  %v2202_v61 = vmul.f32 1.442695, %v2159_v38  ;;  %vm2179_vm2 = vcmp.gt.f32.partialorder %v2159_v38, 0.0 }
 0x764   :  { %3935 = vpow2.f32 %v2196_v53  ;;  %v2198_v40 = vmul.f32 1.442695, %v4815_v1  ;;  %v3580_v51 = vpop.f32.mrb[52].mxu1  ;;  %vm2177_vm4 = vcmp.gt.f32.partialorder %v4815_v1, 0.0 }
 0x765   :  { %3937 = vpow2.f32 %v2202_v61  ;;  %v2135_v6 = vadd.f32 %v3580_v51, %v2115_v49  ;;  %v2046_v35 = vpop.f32.mrb[53].mxu1 }
 0x766   :  { %3939 = vpow2.f32 %v2198_v40  ;;  %v2133_v33 = vadd.f32 %v2113_v58, %v2046_v35  ;;  %v3581_v57 = vpop.f32.mrb[54].mxu1 }
 0x767   :  { %v4819_v45 = vadd.f32 %v4806_v46, %v2135_v6  ;;  %v2136_v28 = vadd.f32 %v3581_v57, %v2116_v8  ;;  %v2049_v41 = vpop.f32.mrb[55].mxu1 }
 0x768   :  { %v4822_v15 = vadd.f32 %v4806_v46, %v2133_v33  ;;  %v2134_v7 = vadd.f32 %v2114_v19, %v2049_v41 }
 0x769   :  { %v2208_v54 = vmul.f32 1.442695, %v4819_v45  ;;  %v4826_v3 = vadd.f32 %v4806_v46, %v2136_v28  ;;  %vm2182_vm5 = vcmp.gt.f32.partialorder %v4819_v45, 0.0 }
 0x76a   :  { %v2204_v5 = vmul.f32 1.442695, %v4822_v15  ;;  %v4830_v11 = vadd.f32 %v4806_v46, %v2134_v7  ;;  %vm2180_vm6 = vcmp.gt.f32.partialorder %v4822_v15, 0.0 }
 0x76b   :  { %3941 = vpow2.f32 %v2208_v54  ;;  %v2210_v58 = vmul.f32 1.442695, %v4826_v3  ;;  %vm2183_vm8 = vcmp.gt.f32.partialorder %v4826_v3, 0.0 }
 0x76c   :  { %3943 = vpow2.f32 %v2204_v5  ;;  %v2206_v13 = vmul.f32 1.442695, %v4830_v11  ;;  %v3584_v14 = vpop.f32.mrb[56].mxu1  ;;  %vm2181_vm7 = vcmp.gt.f32.partialorder %v4830_v11, 0.0 }
 0x76d   :  { %v3934_v18 = vpop.eup %3933  ;;  %3945 = vpow2.f32 %v2210_v58  ;;  %v2139_v19 = vadd.f32 %v3584_v14, %v4783_v17  ;;  %v2062_v23 = vpop.f32.mrb[57].mxu1 }
 0x76e   :  { %v3936_v24 = vpop.eup %3935  ;;  %v3100_v29 = vadd.f32 -1.0, %v3934_v18  ;;  %3947 = vpow2.f32 %v2206_v13  ;;  %v2137_v37 = vadd.f32 %v4779_v50, %v2062_v23  ;;  %v3585_v49 = vpop.f32.mrb[58].mxu1 }
 0x76f   :  { %v3938_v42 = vpop.eup %3937  ;;  %v4837_v60 = vadd.f32 %v4806_v46, %v2139_v19  ;;  %v2140_v62 = vadd.f32 %v3585_v49, %v4791_v47  ;;  %v2065_v39 = vpop.f32.mrb[59].mxu1  ;;  %v3098_v27 = vadd.f32 -1.0, %v3936_v24 }
 0x770   :  { %v3940_v43 = vpop.eup %3939  ;;  %v3101_v8 = vadd.f32 -1.0, %v3938_v42  ;;  %v4841_v17 = vadd.f32 %v4806_v46, %v2137_v37  ;;  %v2138_v30 = vadd.f32 %v4781_v9, %v2065_v39  ;;  %v2258_v56 = vsel %vm2178_vm0, %v2158_v36, %v3100_v29 }
 0x771   :  { %v2216_v20 = vmul.f32 1.442695, %v4837_v60  ;;  %v4846_v50 = vadd.f32 %v4806_v46, %v2140_v62  ;;  %v3099_v44 = vadd.f32 -1.0, %v3940_v43  ;;  %v2256_v0 = vsel %vm2176_vm3, %v4810_v2, %v3098_v27 }
 0x772   :  { %v2259_v63 = vsel %vm2179_vm2, %v2159_v38, %v3101_v8  ;;  %v2212_v47 = vmul.f32 1.442695, %v4841_v17  ;;  %v4850_v25 = vadd.f32 %v4806_v46, %v2138_v30  ;;  %vm2186_vm9 = vcmp.gt.f32.partialorder %v4837_v60, 0.0 }
 0x773   :  { %v2277_v12 = vpack.c.bf16 %v2259_v63, %v2258_v56  ;;  %3949 = vpow2.f32 %v2216_v20  ;;  %v2218_v22 = vmul.f32 1.442695, %v4846_v50  ;;  %v2257_v38 = vsel %vm2177_vm4, %v4815_v1, %v3099_v44 }
 0x774   :  { %3951 = vpow2.f32 %v2212_v47  ;;  %v2214_v9 = vmul.f32 1.442695, %v4850_v25  ;;  %v3588_v52 = vpop.f32.mrb[60].mxu1  ;;  %v2276_v51 = vpack.c.bf16 %v2257_v38, %v2256_v0  ;;  %vm2184_vm10 = vcmp.gt.f32.partialorder %v4841_v17, 0.0 }
 0x775   :  { %v3942_v55 = vpop.eup %3941  ;;  %3953 = vpow2.f32 %v2218_v22  ;;  %v2143_v36 = vadd.f32 %v3588_v52, %v4785_v4  ;;  %v2078_v32 = vpop.f32.mrb[61].mxu1  ;;  %vm2185_vm11 = vcmp.gt.f32.partialorder %v4850_v25, 0.0  ;;  %vm2187_vm12 = vcmp.gt.f32.partialorder %v4846_v50, 0.0 }
 0x776   :  { %v3944_v53 = vpop.eup %3943  ;;  %3955 = vpow2.f32 %v2214_v9  ;;  %v2141_v61 = vadd.f32 %v4787_v21, %v2078_v32  ;;  %v3589_v40 = vpop.f32.mrb[62].mxu1  ;;  %3610 = vmatprep.mubr.bf16.mxu0 %v2276_v51  ;;  %v3104_v21 = vadd.f32 -1.0, %v3942_v55 }
 0x777   :  { %v3946_v6 = vpop.eup %3945  ;;  %v4861_v35 = vadd.f32 %v4806_v46, %v2143_v36  ;;  %v2144_v33 = vadd.f32 %v3589_v40, %v4793_v31  ;;  %v2081_v57 = vpop.f32.mrb[63].mxu1  ;;  %v3102_v28 = vadd.f32 -1.0, %v3944_v53  ;;  %3611 = vmatmul.mubr.bf16.vlgmr.msra.gmra.mrb[68].mxu0 %v2277_v12 }
 0x778   :  { %v3948_v4 = vpop.eup %3947  ;;  %v4866_v2 = vadd.f32 %v4806_v46, %v2141_v61  ;;  %v2142_v1 = vadd.f32 %v4789_v34, %v2081_v57  ;;  %v3105_v31 = vadd.f32 -1.0, %v3946_v6  ;;  %v2262_v49 = vsel %vm2182_vm5, %v4819_v45, %v3104_v21 }
 0x779   :  { %v2224_v41 = vmul.f32 1.442695, %v4861_v35  ;;  %v4871_v7 = vadd.f32 %v4806_v46, %v2144_v33  ;;  %v3103_v54 = vadd.f32 -1.0, %v3948_v4  ;;  %v2260_v13 = vsel %vm2180_vm6, %v4822_v15, %v3102_v28 }
 0x77a   :  { %v2220_v5 = vmul.f32 1.442695, %v4866_v2  ;;  %v4877_v58 = vadd.f32 %v4806_v46, %v2142_v1  ;;  %v2263_v15 = vsel %vm2183_vm8, %v4826_v3, %v3105_v31  ;;  %vm2190_vm13 = vcmp.gt.f32.partialorder %v4861_v35, 0.0 }
 0x77b   :  { %3957 = vpow2.f32 %v2224_v41  ;;  %v2226_v34 = vmul.f32 1.442695, %v4871_v7  ;;  %v2261_v14 = vsel %vm2181_vm7, %v4830_v11, %v3103_v54  ;;  %v2279_v39 = vpack.c.bf16 %v2263_v15, %v2262_v49  ;;  %v3805_v49 = vld [vmem:[%s4922_s15 + $0x30] sm:$0xff]   ;;  %v3806_v15 = vld [vmem:[%s4922_s15 + $0x38] sm:$0xff]  }
 0x77c   :  { %3959 = vpow2.f32 %v2220_v5  ;;  %v2222_v18 = vmul.f32 1.442695, %v4877_v58  ;;  %v3592_v19 = vpop.f32.mrb[64].mxu1  ;;  %v2278_v23 = vpack.c.bf16 %v2261_v14, %v2260_v13  ;;  %vm2191_vm14 = vcmp.gt.f32.partialorder %v4871_v7, 0.0 }
 0x77d   :  { %v3950_v24 = vpop.eup %3949  ;;  %3961 = vpow2.f32 %v2226_v34  ;;  %v2147_v29 = vadd.f32 %v3592_v19, %v4795_v48  ;;  %v2094_v37 = vpop.f32.mrb[65].mxu1  ;;  %vm2188_vm15 = vcmp.gt.f32.partialorder %v4866_v2, 0.0  ;;  %vm2189_vm1 = vcmp.gt.f32.partialorder %v4877_v58, 0.0  ;;  %v3800_v19 = vld [vmem:[%s4922_s15 + $0x8] sm:$0xff]  }
 0x77e   :  { %v3952_v42 = vpop.eup %3951  ;;  %3963 = vpow2.f32 %v2222_v18  ;;  %v2145_v11 = vadd.f32 %v4797_v59, %v2094_v37  ;;  %v3593_v62 = vpop.f32.mrb[66].mxu1  ;;  %3614 = vmatprep.mubr.bf16.mxu0 %v2278_v23  ;;  %v3108_v44 = vadd.f32 -1.0, %v3950_v24  ;;  %v3799_v18 = vld [vmem:[%s4922_s15] sm:$0xff]   ;;  %v3801_v23 = vld [vmem:[%s4922_s15 + $0x10] sm:$0xff]   ;;  %v3802_v24 = vld [vmem:[%s4922_s15 + $0x18] sm:$0xff]  }
 0x77f   :  { %v3954_v43 = vpop.eup %3953  ;;  %v4891_v8 = vadd.f32 %v4806_v46, %v2147_v29  ;;  %v2148_v48 = vadd.f32 %v3593_v62, %v4799_v10  ;;  %v2097_v30 = vpop.f32.mrb[67].mxu1  ;;  %v3106_v20 = vadd.f32 -1.0, %v3952_v42  ;;  %3615 = vmatmul.mubr.bf16.gmra.mrb[72].mxu0 %v2279_v39  ;;  %3666 = vmatprep.subr.bf16.mxu1 %v3799_v18  ;;  %v3803_v29 = vld [vmem:[%s4922_s15 + $0x20] sm:$0xff]   ;;  %v3804_v37 = vld [vmem:[%s4922_s15 + $0x28] sm:$0xff]  }
 0x780   :  { %v3956_v27 = vpop.eup %3955  ;;  %v2172_v45 = vadd.f32 %v4806_v46, %v2145_v11  ;;  %v2146_v3 = vadd.f32 %v4801_v26, %v2097_v30  ;;  %v3109_v47 = vadd.f32 -1.0, %v3954_v43  ;;  %v2266_v32 = vsel %vm2186_vm9, %v4837_v60, %v3108_v44  ;;  %3630 = vmatprep.subr.bf16.mxu0 %v3799_v18  ;;  %3674 = vmatpush3.bf16.msra.mxu1 %v3799_v18  ;;  %v4935_v42 = vld [vmem:[%s2945_s19] ss:$0 sm:$0xff] }
 0x781   :  { %v2232_v59 = vmul.f32 1.442695, %v4891_v8  ;;  %v2175_v56 = vadd.f32 %v4806_v46, %v2148_v48  ;;  %v3107_v63 = vadd.f32 -1.0, %v3956_v27  ;;  %v2264_v9 = vsel %vm2184_vm10, %v4841_v17, %v3106_v20  ;;  %3631 = vmatpush3.bf16.msra.mxu0 %v3799_v18  ;;  %3667 = vmatprep.subr.bf16.mxu1 %v3800_v19 }
 0x782   :  { %v2228_v10 = vmul.f32 1.442695, %v2172_v45  ;;  %v2173_v12 = vadd.f32 %v4806_v46, %v2146_v3  ;;  %v2267_v0 = vsel %vm2187_vm12, %v4846_v50, %v3109_v47  ;;  %vm2194_vm0 = vcmp.gt.f32.partialorder %v4891_v8, 0.0  ;;  %3632 = vmatprep.subr.bf16.mxu0 %v3800_v19 }
 0x783   :  { %3965 = vpow2.f32 %v2232_v59  ;;  %v2234_v22 = vmul.f32 1.442695, %v2175_v56  ;;  %v2265_v26 = vsel %vm2185_vm11, %v4850_v25, %v3107_v63  ;;  %v2281_v38 = vpack.c.bf16 %v2267_v0, %v2266_v32 }
 0x784   :  { %3967 = vpow2.f32 %v2228_v10  ;;  %v2230_v52 = vmul.f32 1.442695, %v2173_v12  ;;  %v2280_v55 = vpack.c.bf16 %v2265_v26, %v2264_v9  ;;  %vm2195_vm2 = vcmp.gt.f32.partialorder %v2175_v56, 0.0  ;;  %3675 = vmatpush3.bf16.msra.mxu1 %v3800_v19 }
 0x785   :  { %v3958_v36 = vpop.eup %3957  ;;  %3969 = vpow2.f32 %v2234_v22  ;;  %vm2192_vm3 = vcmp.gt.f32.partialorder %v2172_v45, 0.0  ;;  %vm2193_vm4 = vcmp.gt.f32.partialorder %v2173_v12, 0.0  ;;  %3633 = vmatpush3.bf16.msra.mxu0 %v3800_v19  ;;  %3668 = vmatprep.subr.bf16.mxu1 %v3801_v23 }
 0x786   :  { %v3960_v46 = vpop.eup %3959  ;;  %3971 = vpow2.f32 %v2230_v52  ;;  %3618 = vmatprep.mubr.bf16.mxu0 %v2280_v55  ;;  %v3112_v17 = vadd.f32 -1.0, %v3958_v36  ;;  %3634 = vmatprep.subr.bf16.mxu0 %v3801_v23 }
 0x787   :  { %v3962_v53 = vpop.eup %3961  ;;  %v3110_v25 = vadd.f32 -1.0, %v3960_v46  ;;  %3619 = vmatmul.mubr.bf16.gmra.mrb[76].mxu0 %v2281_v38 }
 0x788   :  { %v3964_v61 = vpop.eup %3963  ;;  %v3113_v40 = vadd.f32 -1.0, %v3962_v53  ;;  %v2270_v60 = vsel %vm2190_vm13, %v4861_v35, %v3112_v17  ;;  %3676 = vmatpush3.bf16.msra.mxu1 %v3801_v23 }
 0x789   :  { %v3111_v51 = vadd.f32 -1.0, %v3964_v61  ;;  %v2268_v6 = vsel %vm2188_vm15, %v4866_v2, %v3110_v25  ;;  %3635 = vmatpush3.bf16.msra.mxu0 %v3801_v23  ;;  %3669 = vmatprep.subr.bf16.mxu1 %v3802_v24 }
 0x78a   :  { %v2271_v50 = vsel %vm2191_vm14, %v4871_v7, %v3113_v40  ;;  %3636 = vmatprep.subr.bf16.mxu0 %v3802_v24 }
 0x78b   :  { %v2269_v33 = vsel %vm2189_vm1, %v4877_v58, %v3111_v51  ;;  %v2283_v57 = vpack.c.bf16 %v2271_v50, %v2270_v60 }
 0x78c   :  { %v2282_v28 = vpack.c.bf16 %v2269_v33, %v2268_v6  ;;  %3677 = vmatpush3.bf16.msra.mxu1 %v3802_v24 }
 0x78d   :  { %v3966_v4 = vpop.eup %3965  ;;  %3637 = vmatpush3.bf16.msra.mxu0 %v3802_v24  ;;  %3670 = vmatprep.subr.bf16.mxu1 %v3803_v29 }
 0x78e   :  { %v3968_v1 = vpop.eup %3967  ;;  %3622 = vmatprep.mubr.bf16.mxu0 %v2282_v28  ;;  %v3116_v21 = vadd.f32 -1.0, %v3966_v4  ;;  %3638 = vmatprep.subr.bf16.mxu0 %v3803_v29 }
 0x78f   :  { %v3970_v41 = vpop.eup %3969  ;;  %v3114_v54 = vadd.f32 -1.0, %v3968_v1  ;;  %3623 = vmatmul.mubr.bf16.gmra.mrb[80].mxu0 %v2283_v57 }
 0x790   :  { %v3972_v31 = vpop.eup %3971  ;;  %v3117_v5 = vadd.f32 -1.0, %v3970_v41  ;;  %v2274_v2 = vsel %vm2194_vm0, %v4891_v8, %v3116_v21  ;;  %3678 = vmatpush3.bf16.msra.mxu1 %v3803_v29 }
 0x791   :  { %v3115_v35 = vadd.f32 -1.0, %v3972_v31  ;;  %v2272_v58 = vsel %vm2192_vm3, %v2172_v45, %v3114_v54  ;;  %3639 = vmatpush3.bf16.msra.mxu0 %v3803_v29  ;;  %3671 = vmatprep.subr.bf16.mxu1 %v3804_v37 }
 0x792   :  { %v2275_v7 = vsel %vm2195_vm2, %v2175_v56, %v3117_v5  ;;  %3640 = vmatprep.subr.bf16.mxu0 %v3804_v37 }
 0x793   :  { %v2273_v34 = vsel %vm2193_vm4, %v2173_v12, %v3115_v35  ;;  %v2285_v13 = vpack.c.bf16 %v2275_v7, %v2274_v2 }
 0x794   :  { %v2284_v14 = vpack.c.bf16 %v2273_v34, %v2272_v58  ;;  %3679 = vmatpush3.bf16.msra.mxu1 %v3804_v37 }
 0x795   :  { %3641 = vmatpush3.bf16.msra.mxu0 %v3804_v37  ;;  %3672 = vmatprep.subr.bf16.mxu1 %v3805_v49 }
 0x796   :  { %3626 = vmatprep.mubr.bf16.mxu0 %v2284_v14  ;;  %3642 = vmatprep.subr.bf16.mxu0 %v3805_v49 }
 0x797   :  { %3627 = vmatmul.mubr.bf16.gmra.mrb[84].mxu0 %v2285_v13 }
 0x798   :  { %3680 = vmatpush3.bf16.msra.mxu1 %v3805_v49 }
 0x799   :  { %3643 = vmatpush3.bf16.msra.mxu0 %v3805_v49  ;;  %3673 = vmatprep.subr.bf16.mxu1 %v3806_v15 }
 0x79a   :  { %3644 = vmatprep.subr.bf16.mxu0 %v3806_v15 }
 0x79c   :  { %3681 = vmatpush3.bf16.msra.mxu1 %v3806_v15 }
 0x79d   :  { %3645 = vmatpush3.bf16.msra.mxu0 %v3806_v15 }
 0x84a   :  { %v3612_v11 = vpop.f32.mrb[68].mxu0 }
 0x84b   :  { %v2400_v62 = vadd.f32 %v3612_v11, %v4935_v42  ;;  %v2391_v39 = vpop.f32.mrb[69].mxu0 }
 0x84c   :  { %v2392_v43 = vadd.f32 %v4935_v42, %v2391_v39  ;;  %v3613_v8 = vpop.f32.mrb[70].mxu0 }
 0x84d   :  { %v2494_v48 = vmul.f32 1.442695, %v2400_v62  ;;  %v2403_v30 = vadd.f32 %v3613_v8, %v4935_v42  ;;  %v2394_v20 = vpop.f32.mrb[71].mxu0  ;;  %vm2472_vm5 = vcmp.gt.f32.partialorder %v2400_v62, 0.0 }
 0x84e   :  { %v2490_v27 = vmul.f32 1.442695, %v2392_v43  ;;  %v2395_v45 = vadd.f32 %v4935_v42, %v2394_v20  ;;  %vm2470_vm6 = vcmp.gt.f32.partialorder %v2392_v43, 0.0 }
 0x84f   :  { %3973 = vpow2.f32 %v2494_v48  ;;  %v2496_v3 = vmul.f32 1.442695, %v2403_v30  ;;  %vm2473_vm7 = vcmp.gt.f32.partialorder %v2403_v30, 0.0 }
 0x850   :  { %3975 = vpow2.f32 %v2490_v27  ;;  %v2492_v44 = vmul.f32 1.442695, %v2395_v45  ;;  %vm2471_vm8 = vcmp.gt.f32.partialorder %v2395_v45, 0.0 }
 0x851   :  { %3977 = vpow2.f32 %v2496_v3 }
 0x852   :  { %3979 = vpow2.f32 %v2492_v44  ;;  %v3616_v59 = vpop.f32.mrb[72].mxu0 }
 0x853   :  { %v4942_v56 = vadd.f32 %v3616_v59, %v4935_v42  ;;  %v2407_v63 = vpop.f32.mrb[73].mxu0 }
 0x854   :  { %v4945_v47 = vadd.f32 %v4935_v42, %v2407_v63  ;;  %v3617_v10 = vpop.f32.mrb[74].mxu0 }
 0x855   :  { %v2502_v12 = vmul.f32 1.442695, %v4942_v56  ;;  %v4949_v22 = vadd.f32 %v3617_v10, %v4935_v42  ;;  %v2410_v9 = vpop.f32.mrb[75].mxu0  ;;  %vm2476_vm9 = vcmp.gt.f32.partialorder %v4942_v56, 0.0 }
 0x856   :  { %v2498_v26 = vmul.f32 1.442695, %v4945_v47  ;;  %v4953_v52 = vadd.f32 %v4935_v42, %v2410_v9  ;;  %vm2474_vm10 = vcmp.gt.f32.partialorder %v4945_v47, 0.0 }
 0x857   :  { %3981 = vpow2.f32 %v2502_v12  ;;  %v2504_v55 = vmul.f32 1.442695, %v4949_v22  ;;  %vm2477_vm11 = vcmp.gt.f32.partialorder %v4949_v22, 0.0 }
 0x858   :  { %3983 = vpow2.f32 %v2498_v26  ;;  %v2500_v36 = vmul.f32 1.442695, %v4953_v52  ;;  %vm2475_vm12 = vcmp.gt.f32.partialorder %v4953_v52, 0.0 }
 0x859   :  { %v3974_v32 = vpop.eup %3973  ;;  %3985 = vpow2.f32 %v2504_v55 }
 0x85a   :  { %v3976_v0 = vpop.eup %3975  ;;  %v3129_v46 = vadd.f32 -1.0, %v3974_v32  ;;  %3987 = vpow2.f32 %v2500_v36  ;;  %v3620_v38 = vpop.f32.mrb[76].mxu0 }
 0x85b   :  { %v3978_v17 = vpop.eup %3977  ;;  %v3127_v53 = vadd.f32 -1.0, %v3976_v0  ;;  %v4958_v25 = vadd.f32 %v3620_v38, %v4935_v42  ;;  %v2423_v61 = vpop.f32.mrb[77].mxu0 }
 0x85c   :  { %v3980_v40 = vpop.eup %3979  ;;  %v4961_v51 = vadd.f32 %v4935_v42, %v2423_v61  ;;  %v3621_v60 = vpop.f32.mrb[78].mxu0  ;;  %v3130_v6 = vadd.f32 -1.0, %v3978_v17  ;;  %v4965_v28 = vsel %vm2472_vm5, %v2400_v62, %v3129_v46 }
 0x85d   :  { %v4963_v50 = vsel %vm2470_vm6, %v2392_v43, %v3127_v53  ;;  %v3128_v33 = vadd.f32 -1.0, %v3980_v40  ;;  %v2426_v57 = vpop.f32.mrb[79].mxu0  ;;  %v2510_v4 = vmul.f32 1.442695, %v4958_v25  ;;  %v4975_v54 = vadd.f32 %v3621_v60, %v4935_v42 }
 0x85e   :  { %v2598_v1 = vmul.f32 %v4963_v50, %v4963_v50  ;;  %v2506_v41 = vmul.f32 1.442695, %v4961_v51  ;;  %v4982_v35 = vadd.f32 %v4935_v42, %v2426_v57  ;;  %v4985_v7 = vsel %vm2473_vm7, %v2403_v30, %v3130_v6 }
 0x85f   :  { %v4971_v21 = vsel %vm2471_vm8, %v2395_v45, %v3128_v33  ;;  %3989 = vpow2.f32 %v2510_v4  ;;  %v2512_v58 = vmul.f32 1.442695, %v4975_v54  ;;  %v2600_v13 = vmul.f32 %v4965_v28, %v4965_v28 }
 0x860   :  { %v2572_v31 = vadd.f32 %v4971_v21, %v4963_v50  ;;  %v2599_v5 = vmul.f32 %v4971_v21, %v4971_v21  ;;  %3991 = vpow2.f32 %v2506_v41  ;;  %v2508_v37 = vmul.f32 1.442695, %v4982_v35 }
 0x861   :  { %v3982_v2 = vpop.eup %3981  ;;  %3993 = vpow2.f32 %v2512_v58  ;;  %v2601_v62 = vmul.f32 %v4985_v7, %v4985_v7  ;;  %vm2478_vm13 = vcmp.gt.f32.partialorder %v4961_v51, 0.0  ;;  %vm2480_vm14 = vcmp.gt.f32.partialorder %v4958_v25, 0.0 }
 0x862   :  { %v3984_v34 = vpop.eup %3983  ;;  %v2573_v14 = vadd.f32 %v2572_v31, %v4965_v28  ;;  %v2618_v18 = vadd.f32 %v2599_v5, %v2598_v1  ;;  %v3133_v19 = vadd.f32 -1.0, %v3982_v2  ;;  %v3624_v23 = vpop.f32.mrb[80].mxu0  ;;  %3995 = vpow2.f32 %v2508_v37 }
 0x863   :  { %v3986_v24 = vpop.eup %3985  ;;  %v3131_v29 = vadd.f32 -1.0, %v3984_v34  ;;  %v4994_v49 = vadd.f32 %v3624_v23, %v4935_v42  ;;  %v2439_v15 = vpop.f32.mrb[81].mxu0  ;;  %vm2479_vm15 = vcmp.gt.f32.partialorder %v4982_v35, 0.0  ;;  %vm2481_vm1 = vcmp.gt.f32.partialorder %v4975_v54, 0.0 }
 0x864   :  { %v3988_v11 = vpop.eup %3987  ;;  %v2619_v39 = vadd.f32 %v2618_v18, %v2600_v13  ;;  %v2574_v43 = vadd.f32 %v2573_v14, %v4985_v7  ;;  %v3134_v8 = vadd.f32 -1.0, %v3986_v24  ;;  %v3625_v48 = vpop.f32.mrb[82].mxu0  ;;  %v5012_v59 = vsel %vm2476_vm9, %v4942_v56, %v3133_v19 }
 0x865   :  { %v5002_v30 = vsel %vm2474_vm10, %v4945_v47, %v3131_v29  ;;  %v3132_v20 = vadd.f32 -1.0, %v3988_v11  ;;  %v2442_v27 = vpop.f32.mrb[83].mxu0  ;;  %v2518_v10 = vmul.f32 1.442695, %v4994_v49  ;;  %v5025_v55 = vadd.f32 %v4935_v42, %v2439_v15 }
 0x866   :  { %v2575_v45 = vadd.f32 %v2574_v43, %v5002_v30  ;;  %v2602_v3 = vmul.f32 %v5002_v30, %v5002_v30  ;;  %v2620_v44 = vadd.f32 %v2619_v39, %v2601_v62  ;;  %v5015_v63 = vsel %vm2477_vm11, %v4949_v22, %v3134_v8 }
 0x867   :  { %v5018_v47 = vsel %vm2475_vm12, %v4953_v52, %v3132_v20  ;;  %v5028_v56 = vadd.f32 %v3625_v48, %v4935_v42  ;;  %v5031_v22 = vadd.f32 %v4935_v42, %v2442_v27  ;;  %v2604_v52 = vmul.f32 %v5012_v59, %v5012_v59 }
 0x868   :  { %v2621_v12 = vadd.f32 %v2620_v44, %v2602_v3  ;;  %v2576_v9 = vadd.f32 %v2575_v45, %v5018_v47  ;;  %v2603_v26 = vmul.f32 %v5018_v47, %v5018_v47  ;;  %v2514_v46 = vmul.f32 1.442695, %v5025_v55 }
 0x869   :  { %v3990_v36 = vpop.eup %3989  ;;  %v2605_v53 = vmul.f32 %v5015_v63, %v5015_v63  ;;  %3997 = vpow2.f32 %v2518_v10  ;;  %v2520_v61 = vmul.f32 1.442695, %v5028_v56  ;;  %v2516_v1 = vmul.f32 1.442695, %v5031_v22 }
 0x86a   :  { %v2577_v32 = vadd.f32 %v2576_v9, %v5012_v59  ;;  %v2622_v0 = vadd.f32 %v2621_v12, %v2603_v26  ;;  %v3628_v38 = vpop.f32.mrb[84].mxu0  ;;  %v3992_v17 = vpop.eup %3991  ;;  %3999 = vpow2.f32 %v2514_v46  ;;  %v3137_v5 = vadd.f32 -1.0, %v3990_v36 }
 0x86b   :  { %v2455_v40 = vpop.f32.mrb[85].mxu0  ;;  %v3135_v6 = vadd.f32 -1.0, %v3992_v17  ;;  %v3994_v4 = vpop.eup %3993  ;;  %4001 = vpow2.f32 %v2520_v61  ;;  %v5044_v41 = vadd.f32 %v3628_v38, %v4935_v42  ;;  %vm2482_vm0 = vcmp.gt.f32.partialorder %v5025_v55, 0.0 }
 0x86c   :  { %v2623_v60 = vadd.f32 %v2622_v0, %v2604_v52  ;;  %v2578_v33 = vadd.f32 %v2577_v32, %v5015_v63  ;;  %v3629_v57 = vpop.f32.mrb[86].mxu0  ;;  %v3996_v34 = vpop.eup %3995  ;;  %4003 = vpow2.f32 %v2516_v1  ;;  %v3138_v18 = vadd.f32 -1.0, %v3994_v4 }
 0x86d   :  { %v2458_v31 = vpop.f32.mrb[87].mxu0  ;;  %v5047_v2 = vsel %vm2478_vm13, %v4961_v51, %v3135_v6  ;;  %v3136_v19 = vadd.f32 -1.0, %v3996_v34  ;;  %v2526_v23 = vmul.f32 1.442695, %v5044_v41  ;;  %v2456_v24 = vadd.f32 %v4935_v42, %v2455_v40 }
 0x86e   :  { %v2624_v58 = vadd.f32 %v2623_v60, %v2605_v53  ;;  %v2579_v13 = vadd.f32 %v2578_v33, %v5047_v2  ;;  %v2606_v14 = vmul.f32 %v5047_v2, %v5047_v2  ;;  %v5057_v51 = vadd.f32 %v3629_v57, %v4935_v42 }
 0x86f   :  { %v5060_v37 = vadd.f32 %v4935_v42, %v2458_v31  ;;  %v5063_v15 = vsel %vm2480_vm14, %v4958_v25, %v3137_v5  ;;  %v5067_v11 = vsel %vm2479_vm15, %v4982_v35, %v3136_v19  ;;  %v2522_v62 = vmul.f32 1.442695, %v2456_v24 }
 0x870   :  { %v2625_v29 = vadd.f32 %v2624_v58, %v2606_v14  ;;  %v2580_v39 = vadd.f32 %v2579_v13, %v5067_v11  ;;  %v2607_v43 = vmul.f32 %v5067_v11, %v5067_v11  ;;  %4005 = vpow2.f32 %v2526_v23 }
 0x871   :  { %v2528_v8 = vmul.f32 1.442695, %v5057_v51  ;;  %v5074_v42 = vsel %vm2481_vm1, %v4975_v54, %v3138_v18  ;;  %4007 = vpow2.f32 %v2522_v62  ;;  %v2524_v25 = vmul.f32 1.442695, %v5060_v37 }
 0x872   :  { %v2608_v35 = vmul.f32 %v5063_v15, %v5063_v15  ;;  %v2581_v20 = vadd.f32 %v2580_v39, %v5063_v15  ;;  %v2626_v27 = vadd.f32 %v2625_v29, %v2607_v43  ;;  %v2609_v44 = vmul.f32 %v5074_v42, %v5074_v42 }
 0x873   :  { %v3998_v48 = vpop.eup %3997  ;;  %4009 = vpow2.f32 %v2528_v8  ;;  %vm2484_vm2 = vcmp.gt.f32.partialorder %v4994_v49, 0.0  ;;  %vm2483_vm3 = vcmp.gt.f32.partialorder %v5031_v22, 0.0  ;;  %vm2485_vm4 = vcmp.gt.f32.partialorder %v5028_v56, 0.0 }
 0x874   :  { %v4000_v45 = vpop.eup %3999  ;;  %4011 = vpow2.f32 %v2524_v25  ;;  %v2627_v10 = vadd.f32 %v2626_v27, %v2608_v35  ;;  %v2582_v12 = vadd.f32 %v2581_v20, %v5074_v42  ;;  %v3141_v9 = vadd.f32 -1.0, %v3998_v48 }
 0x875   :  { %v4002_v3 = vpop.eup %4001  ;;  %v3139_v54 = vadd.f32 -1.0, %v4000_v45  ;;  %vm2486_vm5 = vcmp.gt.f32.partialorder %v2456_v24, 0.0  ;;  %vm2487_vm6 = vcmp.gt.f32.partialorder %v5060_v37, 0.0  ;;  %vm2488_vm7 = vcmp.gt.f32.partialorder %v5044_v41, 0.0 }
 0x876   :  { %v4004_v26 = vpop.eup %4003  ;;  %v2628_v52 = vadd.f32 %v2627_v10, %v2609_v44  ;;  %v3142_v32 = vadd.f32 -1.0, %v4002_v3  ;;  %v5093_v17 = vsel %vm2484_vm2, %v4994_v49, %v3141_v9  ;;  %vm2489_vm8 = vcmp.gt.f32.partialorder %v5057_v51, 0.0 }
 0x877   :  { %v5085_v36 = vsel %vm2482_vm0, %v5025_v55, %v3139_v54  ;;  %v3140_v38 = vadd.f32 -1.0, %v4004_v26  ;;  %v2612_v49 = vmul.f32 %v5093_v17, %v5093_v17 }
 0x878   :  { %v2583_v0 = vadd.f32 %v2582_v12, %v5085_v36  ;;  %v2610_v46 = vmul.f32 %v5085_v36, %v5085_v36  ;;  %v5100_v40 = vsel %vm2485_vm4, %v5028_v56, %v3142_v32 }
 0x879   :  { %v5097_v55 = vsel %vm2483_vm3, %v5031_v22, %v3140_v38  ;;  %v2613_v5 = vmul.f32 %v5100_v40, %v5100_v40 }
 0x87a   :  { %v2629_v53 = vadd.f32 %v2628_v52, %v2610_v46  ;;  %v4006_v61 = vpop.eup %4005  ;;  %v2584_v60 = vadd.f32 %v2583_v0, %v5097_v55  ;;  %v2611_v6 = vmul.f32 %v5097_v55, %v5097_v55 }
 0x87b   :  { %v4008_v33 = vpop.eup %4007  ;;  %v3145_v56 = vadd.f32 -1.0, %v4006_v61 }
 0x87c   :  { %v2585_v4 = vadd.f32 %v2584_v60, %v5093_v17  ;;  %v2630_v1 = vadd.f32 %v2629_v53, %v2611_v6  ;;  %v3143_v31 = vadd.f32 -1.0, %v4008_v33  ;;  %v2570_v33 = vld [vmem:[%s2946_s23] sm:$0x1] }
 0x87d   :  { %v4010_v57 = vpop.eup %4009  ;;  %v5120_v39 = vsel %vm2488_vm7, %v5044_v41, %v3145_v56 }
 0x87e   :  { %v4012_v22 = vpop.eup %4011  ;;  %v2631_v58 = vadd.f32 %v2630_v1, %v2612_v49  ;;  %v5110_v34 = vsel %vm2486_vm5, %v2456_v24, %v3143_v31  ;;  %v2586_v13 = vadd.f32 %v2585_v4, %v5100_v40  ;;  %v3146_v19 = vadd.f32 -1.0, %v4010_v57  ;;  %v2571_v4 = vld [vmem:[%s2947_s27] sm:$0x1] }
 0x87f   :  { %v3144_v14 = vadd.f32 -1.0, %v4012_v22  ;;  %v2614_v18 = vmul.f32 %v5110_v34, %v5110_v34  ;;  %v2616_v48 = vmul.f32 %v5120_v39, %v5120_v39 }
 0x880   :  { %v2587_v23 = vadd.f32 %v2586_v13, %v5110_v34  ;;  %v2632_v29 = vadd.f32 %v2631_v58, %v2613_v5  ;;  %v5124_v25 = vsel %vm2489_vm8, %v5057_v51, %v3146_v19 }
 0x881   :  { %v2567_v62 = vsel %vm2487_vm6, %v5060_v37, %v3144_v14  ;;  %v2617_v37 = vmul.f32 %v5124_v25, %v5124_v25 }
 0x882   :  { %v2615_v24 = vmul.f32 %v2567_v62, %v2567_v62  ;;  %v2633_v43 = vadd.f32 %v2632_v29, %v2614_v18  ;;  %v2588_v8 = vadd.f32 %v2587_v23, %v2567_v62 }
 0x884   :  { %v2589_v35 = vadd.f32 %v2588_v8, %v5120_v39  ;;  %v2634_v20 = vadd.f32 %v2633_v43, %v2615_v24 }
 0x886   :  { %v2590_v41 = vadd.f32 %v2589_v35, %v5124_v25  ;;  %v2635_v27 = vadd.f32 %v2634_v20, %v2616_v48 }
 0x888   :  { %v2591_v45 = vrot.slane %v2590_v41, 4  ;;  %v2636_v3 = vadd.f32 %v2635_v27, %v2617_v37 }
 0x88a   :  { %v2592_v44 = vadd.f32 %v2591_v45, %v2590_v41  ;;  %v2637_v10 = vrot.slane %v2636_v3, 4 }
 0x88c   :  { %v2593_v54 = vrot.slane %v2592_v44, 2  ;;  %v2638_v12 = vadd.f32 %v2637_v10, %v2636_v3 }
 0x88e   :  { %v2594_v51 = vadd.f32 %v2593_v54, %v2592_v44  ;;  %v2639_v9 = vrot.slane %v2638_v12, 2 }
 0x890   :  { %v2595_v26 = vrot.slane %v2594_v51, 1  ;;  %v2640_v52 = vadd.f32 %v2639_v9, %v2638_v12 }
 0x892   :  { %v2596_v32 = vadd.f32 %v2595_v26, %v2594_v51  ;;  %v2641_v0 = vrot.slane %v2640_v52, 1 }
 0x894   :  { %v2597_v46 = vmul.f32 0.00625, %v2596_v32  ;;  %v2642_v38 = vadd.f32 %v2641_v0, %v2640_v52 }
 0x896   :  { %v2643_v53 = vmul.f32 0.00625, %v2642_v38  ;;  %v2644_v61 = vmul.f32 %v2597_v46, %v2597_v46 }
 0x898   :  { %v2645_v60 = vsub.f32 %v2643_v53, %v2644_v61 }
 0x89a   :  { %v2646_v6 = vadd.f32 1e-05, %v2645_v60 }
 0x89c   :  { %4013 = vrsqrt.f32 %v2646_v6 }
 0x8a6   :  { %v4014_v57 = vpop.eup %4013 }
 0x8a7   :  { %v2648_v49 = vmul.f32 %v4014_v57, %v2570_v33 }
 0x8a9   :  { %v2649_v1 = vmul.f32 %v2648_v49, %v2597_v46  ;;  %v2655_v31 = vrot.slane %v2648_v49, %v4157_v16 }
 0x8ab   :  { %v2650_v22 = vsub.f32 %v2571_v4, %v2649_v1  ;;  %v2674_v5 = vmul.f32 %v2655_v31, %v2567_v62  ;;  %v2657_v56 = vmul.f32 %v2655_v31, %v4963_v50  ;;  %v2658_v58 = vmul.f32 %v2655_v31, %v4971_v21 }
 0x8ac   :  { %v2661_v13 = vmul.f32 %v2655_v31, %v5002_v30  ;;  %v2662_v14 = vmul.f32 %v2655_v31, %v5018_v47  ;;  %v2659_v18 = vmul.f32 %v2655_v31, %v4965_v28  ;;  %v2660_v19 = vmul.f32 %v2655_v31, %v4985_v7 }
 0x8ad   :  { %v2681_v23 = vrot.slane %v2650_v22, %v4157_v16  ;;  %v2663_v29 = vmul.f32 %v2655_v31, %v5012_v59  ;;  %v2664_v24 = vmul.f32 %v2655_v31, %v5015_v63  ;;  %v2665_v62 = vmul.f32 %v2655_v31, %v5047_v2 }
 0x8ae   :  { %v2666_v50 = vmul.f32 %v2655_v31, %v5067_v11  ;;  %v2667_v21 = vmul.f32 %v2655_v31, %v5063_v15  ;;  %v2668_v30 = vmul.f32 %v2655_v31, %v5074_v42  ;;  %v2669_v47 = vmul.f32 %v2655_v31, %v5085_v36 }
 0x8af   :  { %v2683_v43 = vadd.f32 %v2681_v23, %v2657_v56  ;;  %v2684_v28 = vadd.f32 %v2681_v23, %v2658_v58  ;;  %v2687_v8 = vadd.f32 %v2681_v23, %v2661_v13  ;;  %v2688_v7 = vadd.f32 %v2681_v23, %v2662_v14 }
 0x8b0   :  { %v2685_v48 = vadd.f32 %v2681_v23, %v2659_v18  ;;  %v2686_v16 = vadd.f32 %v2681_v23, %v2660_v19  ;;  %v2689_v35 = vadd.f32 %v2681_v23, %v2663_v29  ;;  %v2690_v59 = vadd.f32 %v2681_v23, %v2664_v24 }
 0x8b1   :  { %v2703_v20 = vpack.c.bf16 %v2684_v28, %v2683_v43  ;;  %v2705_v63 = vpack.c.bf16 %v2688_v7, %v2687_v8  ;;  %v2691_v37 = vadd.f32 %v2681_v23, %v2665_v62  ;;  %v2692_v2 = vadd.f32 %v2681_v23, %v2666_v50 }
 0x8b2   :  { %v2704_v41 = vpack.c.bf16 %v2686_v16, %v2685_v48  ;;  %v2706_v11 = vpack.c.bf16 %v2690_v59, %v2689_v35  ;;  %v2693_v27 = vadd.f32 %v2681_v23, %v2667_v21  ;;  %v2694_v15 = vadd.f32 %v2681_v23, %v2668_v30 }
 0x8b3   :  { %3646 = vmatprep.mubr.bf16.mxu0 %v2703_v20  ;;  %3650 = vmatprep.mubr.bf16.mxu1 %v2705_v63  ;;  %v2707_v42 = vpack.c.bf16 %v2692_v2, %v2691_v37  ;;  %v2670_v36 = vmul.f32 %v2655_v31, %v5097_v55  ;;  %v2695_v45 = vadd.f32 %v2681_v23, %v2669_v47 }
 0x8b4   :  { %3647 = vmatmul.mubr.bf16.vlgmr.msra.gmra.mrb[88].mxu0 %v2704_v41  ;;  %3651 = vmatmul.mubr.bf16.vlgmr.msra.gmra.mrb[68].mxu1 %v2706_v11  ;;  %v2708_v3 = vpack.c.bf16 %v2694_v15, %v2693_v27  ;;  %v2671_v44 = vmul.f32 %v2655_v31, %v5093_v17  ;;  %v2672_v10 = vmul.f32 %v2655_v31, %v5100_v40  ;;  %v3147_v40 = vld [vmem:[%s2949_s1] ss:$0 sm:$0xff] }
 0x8b5   :  { %3654 = vmatprep.mubr.bf16.mxu1 %v2707_v42  ;;  %v2696_v54 = vadd.f32 %v2681_v23, %v2670_v36  ;;  %v2673_v12 = vmul.f32 %v2655_v31, %v5110_v34  ;;  %v2700_v51 = vadd.f32 %v2681_v23, %v2674_v5  ;;  %v2675_v9 = vmul.f32 %v2655_v31, %v5120_v39 }
 0x8b6   :  { %v2697_v26 = vadd.f32 %v2681_v23, %v2671_v44  ;;  %v2698_v52 = vadd.f32 %v2681_v23, %v2672_v10  ;;  %v2676_v32 = vmul.f32 %v2655_v31, %v5124_v25 }
 0x8b7   :  { %v2709_v55 = vpack.c.bf16 %v2696_v54, %v2695_v45  ;;  %v2699_v0 = vadd.f32 %v2681_v23, %v2673_v12  ;;  %v2701_v46 = vadd.f32 %v2681_v23, %v2675_v9 }
 0x8b8   :  { %v2710_v38 = vpack.c.bf16 %v2698_v52, %v2697_v26  ;;  %v2702_v53 = vadd.f32 %v2681_v23, %v2676_v32 }
 0x8b9   :  { %v2711_v61 = vpack.c.bf16 %v2700_v51, %v2699_v0 }
 0x8ba   :  { %v2712_v17 = vpack.c.bf16 %v2702_v53, %v2701_v46 }
 0x8bc   :  { %3655 = vmatmul.mubr.bf16.gmra.mrb[72].mxu1 %v2708_v3 }
 0x8bd   :  { %3658 = vmatprep.mubr.bf16.mxu1 %v2709_v55 }
 0x8c4   :  { %3659 = vmatmul.mubr.bf16.gmra.mrb[76].mxu1 %v2710_v38 }
 0x8c5   :  { %3662 = vmatprep.mubr.bf16.mxu1 %v2711_v61 }
 0x8cc   :  { %3663 = vmatmul.mubr.bf16.gmra.mrb[80].mxu1 %v2712_v17 }
 0x987   :  { %v3648_v34 = vpop.f32.mrb[88].mxu0  ;;  %v3652_v39 = vpop.f32.mrb[68].mxu1 }
 0x988   :  { %v2827_v25 = vadd.f32 %v3648_v34, %v3147_v40  ;;  %v2843_v60 = vadd.f32 %v3652_v39, %v3147_v40  ;;  %v2818_v6 = vpop.f32.mrb[89].mxu0  ;;  %v2834_v33 = vpop.f32.mrb[69].mxu1 }
 0x989   :  { %v2819_v57 = vadd.f32 %v3147_v40, %v2818_v6  ;;  %v2835_v49 = vadd.f32 %v3147_v40, %v2834_v33  ;;  %v3649_v4 = vpop.f32.mrb[90].mxu0  ;;  %v3653_v1 = vpop.f32.mrb[70].mxu1 }
 0x98a   :  { %2899 = vst [vmem:[%s5165_s5 + $0x10] sm:$0xff] %v2827_v25  ;;  %2903 = vst [vmem:[%s5165_s5 + $0x30] sm:$0xff] %v2843_v60  ;;  %v2830_v31 = vadd.f32 %v3649_v4, %v3147_v40  ;;  %v2846_v22 = vadd.f32 %v3653_v1, %v3147_v40  ;;  %v2821_v5 = vpop.f32.mrb[91].mxu0  ;;  %v2837_v56 = vpop.f32.mrb[71].mxu1 }
 0x98b   :  { %2897 = vst [vmem:[%s5165_s5] sm:$0xff] %v2819_v57  ;;  %2901 = vst [vmem:[%s5165_s5 + $0x20] sm:$0xff] %v2835_v49  ;;  %v2822_v58 = vadd.f32 %v3147_v40, %v2821_v5  ;;  %v2838_v13 = vadd.f32 %v3147_v40, %v2837_v56 }
 0x98c   :  { %2900 = vst [vmem:[%s5165_s5 + $0x18] sm:$0xff] %v2830_v31  ;;  %2904 = vst [vmem:[%s5165_s5 + $0x38] sm:$0xff] %v2846_v22 }
 0x98d   :  { %2898 = vst [vmem:[%s5165_s5 + $0x8] sm:$0xff] %v2822_v58  ;;  %2902 = vst [vmem:[%s5165_s5 + $0x28] sm:$0xff] %v2838_v13 }
 0x98f   :  { %v3656_v14 = vpop.f32.mrb[72].mxu1 }
 0x990   :  { %v2859_v18 = vadd.f32 %v3656_v14, %v3147_v40  ;;  %v2850_v19 = vpop.f32.mrb[73].mxu1 }
 0x991   :  { %v2851_v23 = vadd.f32 %v3147_v40, %v2850_v19  ;;  %v3657_v29 = vpop.f32.mrb[74].mxu1 }
 0x992   :  { %2907 = vst [vmem:[%s5165_s5 + $0x50] sm:$0xff] %v2859_v18  ;;  %v2862_v24 = vadd.f32 %v3657_v29, %v3147_v40  ;;  %v2853_v62 = vpop.f32.mrb[75].mxu1 }
 0x993   :  { %2905 = vst [vmem:[%s5165_s5 + $0x40] sm:$0xff] %v2851_v23  ;;  %v2854_v50 = vadd.f32 %v3147_v40, %v2853_v62 }
 0x994   :  { %2908 = vst [vmem:[%s5165_s5 + $0x58] sm:$0xff] %v2862_v24 }
 0x995   :  { %2906 = vst [vmem:[%s5165_s5 + $0x48] sm:$0xff] %v2854_v50 }
 0x997   :  { %v3660_v21 = vpop.f32.mrb[76].mxu1 }
 0x998   :  { %v2875_v30 = vadd.f32 %v3660_v21, %v3147_v40  ;;  %v2866_v47 = vpop.f32.mrb[77].mxu1 }
 0x999   :  { %v2867_v43 = vadd.f32 %v3147_v40, %v2866_v47  ;;  %v3661_v28 = vpop.f32.mrb[78].mxu1 }
 0x99a   :  { %2911 = vst [vmem:[%s5165_s5 + $0x70] sm:$0xff] %v2875_v30  ;;  %v2878_v8 = vadd.f32 %v3661_v28, %v3147_v40  ;;  %v2869_v7 = vpop.f32.mrb[79].mxu1 }
 0x99b   :  { %2909 = vst [vmem:[%s5165_s5 + $0x60] sm:$0xff] %v2867_v43  ;;  %v2870_v48 = vadd.f32 %v3147_v40, %v2869_v7 }
 0x99c   :  { %2912 = vst [vmem:[%s5165_s5 + $0x78] sm:$0xff] %v2878_v8 }
 0x99d   :  { %2910 = vst [vmem:[%s5165_s5 + $0x68] sm:$0xff] %v2870_v48 }
 0x99f   :  { %v3664_v16 = vpop.f32.mrb[80].mxu1 }
 0x9a0   :  { %v2891_v35 = vadd.f32 %v3664_v16, %v3147_v40  ;;  %v2882_v59 = vpop.f32.mrb[81].mxu1 }
 0x9a1   :  { %v2883_v20 = vadd.f32 %v3147_v40, %v2882_v59  ;;  %v3665_v63 = vpop.f32.mrb[82].mxu1 }
 0x9a2   :  { %2915 = vst [vmem:[%s5165_s5 + $0x90] sm:$0xff] %v2891_v35  ;;  %v2894_v37 = vadd.f32 %v3665_v63, %v3147_v40  ;;  %v2885_v2 = vpop.f32.mrb[83].mxu1 }
 0x9a3   :  { %2913 = vst [vmem:[%s5165_s5 + $0x80] sm:$0xff] %v2883_v20  ;;  %v2886_v41 = vadd.f32 %v3147_v40, %v2885_v2 }
 0x9a4   :  { %2916 = vst [vmem:[%s5165_s5 + $0x98] sm:$0xff] %v2894_v37 }
 0x9a5   :  { %2914 = vst [vmem:[%s5165_s5 + $0x88] sm:$0xff] %v2886_v41 }

</bundles_post_ra>
